<compile_context>
chip_gen: v7x
topology: tpu7x:2x2x1
jax: 0.10.0
libtpu: 0.0.40
codegen_flags: <defaults>
</compile_context>

<pallas_src>
import functools

import jax
import jax.numpy as jnp
from jax import lax
from jax.experimental import pallas as pl
from jax.experimental.pallas import tpu as pltpu


def _bottleneck_kernel(x_ref, w1_ref, w2_ref, w3_ref,
                       s1_ref, b1_ref, s2_ref, b2_ref, s3_ref, b3_ref,
                       out_ref, y1_ref, col_ref):
    # x_ref  : (H, W, Cin)  one full image, f32
    # out_ref: (H, W, Cout) f32
    # y1_ref : (H+2, W+2, width) f32 scratch, zero border = conv padding
    # col_ref: (H*W, 9*width) im2col slab, matmul dtype (bf16)
    H, W, Cin = x_ref.shape
    width = w1_ref.shape[1]
    Cout = w3_ref.shape[1]
    mm = col_ref.dtype

    # ---- conv1 (1x1) + bn1 + relu over the real (unpadded) image ------------------
    xa = x_ref[...].reshape(H * W, Cin).astype(mm)
    y1 = jnp.dot(xa, w1_ref[...], preferred_element_type=jnp.float32)
    y1 = jnp.maximum(y1 * s1_ref[...] + b1_ref[...], 0.0)

    # ---- stage y1 into a zero-bordered VMEM scratch (border zeroing is O(border)) --
    zrow = jnp.zeros((1, W + 2, width), y1_ref.dtype)
    zcol = jnp.zeros((H + 2, 1, width), y1_ref.dtype)
    y1_ref[0:1, :, :] = zrow
    y1_ref[H + 1:H + 2, :, :] = zrow
    y1_ref[:, 0:1, :] = zcol
    y1_ref[:, W + 1:W + 2, :] = zcol
    y1_ref[1:H + 1, 1:W + 1, :] = y1.reshape(H, W, width)

    # ---- conv2 (3x3, stride=1, pad=1) + bn2 + relu: im2col slab + ONE MXU matmul ---
    for dy in range(3):
        for dx in range(3):
            k = dy * 3 + dx
            col_ref[:, k * width:(k + 1) * width] = (
                y1_ref[dy:dy + H, dx:dx + W, :].reshape(H * W, width).astype(mm))
    y2 = jnp.dot(col_ref[...], w2_ref[...],          # (H*W, 9*width) @ (9*width, width)
                 preferred_element_type=jnp.float32)
    y2 = jnp.maximum(y2 * s2_ref[...] + b2_ref[...], 0.0)

    # ---- conv3 (1x1) + bn3 + residual + relu ---------------------------------------
    y3 = jnp.dot(y2.astype(mm), w3_ref[...], preferred_element_type=jnp.float32)
    y3 = y3 * s3_ref[...] + b3_ref[...]
    resid = x_ref[...].reshape(H * W, Cin)            # clean (no offset) residual read
    out_ref[...] = jnp.maximum(y3 + resid, 0.0).reshape(H, W, Cout)


def bottleneck_pallas(x_nchw, params, *, mm_dtype=jnp.bfloat16):
    """PyTorch-layout forward: x_nchw (N, Cin, H, W) f32 -> (N, Cout, H, W) f32."""
    N, Cin, H, W = x_nchw.shape
    eps = params["eps"]
    w1_t, w2_t, w3_t = params["conv1_w"], params["conv2_w"], params["conv3_w"]
    width = w1_t.shape[0]
    Cout = w3_t.shape[0]
    assert Cout == Cin, "identity residual requires Cout == Cin (downsample=None)"

    # ---- fold eval-mode BN into per-channel scale/shift ----------------------------
    def fold(g, b, m, v):
        s = g / jnp.sqrt(v + eps)
        return (s.reshape(1, -1).astype(jnp.float32),
                (b - m * s).reshape(1, -1).astype(jnp.float32))

    s1, b1 = fold(params["bn1_g"], params["bn1_b"], params["bn1_m"], params["bn1_v"])
    s2, b2 = fold(params["bn2_g"], params["bn2_b"], params["bn2_m"], params["bn2_v"])
    s3, b3 = fold(params["bn3_g"], params["bn3_b"], params["bn3_m"], params["bn3_v"])

    # ---- matmul-dtype weights in kernel-friendly layouts ---------------------------
    w1 = jnp.transpose(w1_t[:, :, 0, 0], (1, 0)).astype(mm_dtype)          # (Cin, width)
    w2 = jnp.transpose(w2_t, (2, 3, 1, 0)).reshape(9 * width, width).astype(mm_dtype)
    w3 = jnp.transpose(w3_t[:, :, 0, 0], (1, 0)).astype(mm_dtype)          # (width, Cout)

    x_nhwc = jnp.transpose(x_nchw, (0, 2, 3, 1)).astype(jnp.float32)       # NCHW -> NHWC

    full = lambda a: pl.BlockSpec(a.shape, lambda n: (0,) * a.ndim)

    grid_spec = pltpu.PrefetchScalarGridSpec(
        num_scalar_prefetch=0,
        grid=(N,),                    # one full image per step: no halo, no wrapper pad
        in_specs=[
            pl.BlockSpec((None, H, W, Cin), lambda n: (n, 0, 0, 0)),
            full(w1), full(w2), full(w3),
            full(s1), full(b1), full(s2), full(b2), full(s3), full(b3),
        ],
        out_specs=pl.BlockSpec((None, H, W, Cout), lambda n: (n, 0, 0, 0)),
        scratch_shapes=[
            pltpu.VMEM((H + 2, W + 2, width), jnp.float32),   # zero-bordered y1
            pltpu.VMEM((H * W, 9 * width), mm_dtype),         # im2col slab
        ],
    )

    itm = jnp.dtype(mm_dtype).itemsize
    flops = 2 * N * H * W * (Cin * width + 9 * width * width + width * Cout)
    bytes_accessed = int(x_nhwc.size * 4 + N * H * W * Cout * 4
                         + (w1.size + w2.size + w3.size) * itm)
    vmem_est = (2 * (H * W * Cin + H * W * Cout) * 4                # dbl-buffered I/O tiles
                + (w1.size + w2.size + w3.size) * itm
                + (H + 2) * (W + 2) * width * 4                     # y1 scratch
                + H * W * 9 * width * itm)                          # col scratch
    vmem_limit = int(min(48 * 2**20, max(32 * 2**20, 2 * vmem_est)))  # v7x-safe cap

    out_nhwc = pl.pallas_call(
        _bottleneck_kernel,
        out_shape=jax.ShapeDtypeStruct((N, H, W, Cout), jnp.float32),
        grid_spec=grid_spec,
        compiler_params=pltpu.CompilerParams(
            dimension_semantics=("parallel",),      # N>=2 keeps both v7x TCs busy
            vmem_limit_bytes=vmem_limit),
        cost_estimate=pl.CostEstimate(flops=flops, transcendentals=0,
                                      bytes_accessed=bytes_accessed),
    )(x_nhwc, w1, w2, w3, s1, b1, s2, b2, s3, b3)

    return jnp.transpose(out_nhwc, (0, 3, 1, 2))                    # NHWC -> NCHW


def bottleneck_reference(x_nchw, params):
    """Exact f32 PyTorch-semantics reference (lax.conv, HIGHEST precision)."""
    eps = params["eps"]

    def bn(y, g, b, m, v):
        s = g / jnp.sqrt(v + eps)
        return y * s[None, :, None, None] + (b - m * s)[None, :, None, None]

    conv = functools.partial(
        lax.conv_general_dilated,
        window_strides=(1, 1),
        dimension_numbers=("NCHW", "OIHW", "NCHW"),
        precision=lax.Precision.HIGHEST)

    y = conv(x_nchw, params["conv1_w"], padding=((0, 0), (0, 0)))
    y = jnp.maximum(bn(y, params["bn1_g"], params["bn1_b"], params["bn1_m"], params["bn1_v"]), 0.0)
    y = conv(y, params["conv2_w"], padding=((1, 1), (1, 1)))
    y = jnp.maximum(bn(y, params["bn2_g"], params["bn2_b"], params["bn2_m"], params["bn2_v"]), 0.0)
    y = conv(y, params["conv3_w"], padding=((0, 0), (0, 0)))
    y = bn(y, params["bn3_g"], params["bn3_b"], params["bn3_m"], params["bn3_v"])
    return jnp.maximum(y + x_nchw, 0.0)


def make_params(key, inplanes, planes, base_width=64, groups=1, eps=1e-5):
    """PyTorch-layout parameters (conv OIHW weights, BN gamma/beta/mean/var)."""
    width = int(planes * (base_width / 64.0)) * groups
    cout = planes * 4                                   # Bottleneck.expansion == 4
    ks = jax.random.split(key, 15)

    def bn(i, c):
        g = 1.0 + 0.1 * jax.random.normal(ks[i], (c,), jnp.float32)
        b = 0.1 * jax.random.normal(ks[i + 1], (c,), jnp.float32)
        m = 0.1 * jax.random.normal(ks[i + 2], (c,), jnp.float32)
        v = jnp.abs(jax.random.normal(ks[i + 3], (c,), jnp.float32)) + 0.5
        return g, b, m, v

    p = dict(eps=eps)
    p["conv1_w"] = 0.08 * jax.random.normal(ks[0], (width, inplanes, 1, 1), jnp.float32)
    p["conv2_w"] = 0.08 * jax.random.normal(ks[1], (width, width, 3, 3), jnp.float32)
    p["conv3_w"] = 0.08 * jax.random.normal(ks[2], (cout, width, 1, 1), jnp.float32)
    p["bn1_g"], p["bn1_b"], p["bn1_m"], p["bn1_v"] = bn(3, width)
    p["bn2_g"], p["bn2_b"], p["bn2_m"], p["bn2_v"] = bn(7, width)
    p["bn3_g"], p["bn3_b"], p["bn3_m"], p["bn3_v"] = bn(11, cout)
    return p


if __name__ == "__main__":
    # Small but lane-aligned Bottleneck shapes: inplanes=512, planes=128
    # (=> width=128, expansion out=512), N=2, H=W=16.
    N, inplanes, planes, H, W = 2, 512, 128, 16, 16
    key = jax.random.PRNGKey(0)
    kx, kp = jax.random.split(key)

    x_nchw = jax.random.normal(kx, (N, inplanes, H, W), jnp.float32)   # PyTorch layout
    params = make_params(kp, inplanes, planes)

    out = bottleneck_pallas(x_nchw, params, mm_dtype=jnp.bfloat16)
    jax.block_until_ready(out)

    ref = bottleneck_reference(x_nchw, params)
    assert out.shape == ref.shape == (N, planes * 4, H, W)

    # bf16 matmul inputs with f32 accumulation vs. exact-f32 reference: check the
    # deviation normalized by the output scale (robust to near-zero elements).
    scale = float(jnp.max(jnp.abs(ref))) + 1e-6
    max_rel = float(jnp.max(jnp.abs(out - ref))) / scale
    assert max_rel < 0.05, f"deviation from f32 reference too large: {max_rel}"

    print("KERNEL_OK")
</pallas_src>

<mosaic_0001>
module attributes {stable_mosaic.version = 11 : i64} {
  func.func @_bottleneck_kernel(%arg0: i32, %arg1: memref<1x16x16x512xf32, #tpu.memory_space<vmem>>, %arg2: memref<512x128xbf16, #tpu.memory_space<vmem>>, %arg3: memref<1152x128xbf16, #tpu.memory_space<vmem>>, %arg4: memref<128x512xbf16, #tpu.memory_space<vmem>>, %arg5: memref<1x128xf32, #tpu.memory_space<vmem>>, %arg6: memref<1x128xf32, #tpu.memory_space<vmem>>, %arg7: memref<1x128xf32, #tpu.memory_space<vmem>>, %arg8: memref<1x128xf32, #tpu.memory_space<vmem>>, %arg9: memref<1x512xf32, #tpu.memory_space<vmem>>, %arg10: memref<1x512xf32, #tpu.memory_space<vmem>>, %arg11: memref<1x16x16x512xf32, #tpu.memory_space<vmem>>, %arg12: memref<18x18x128xf32, #tpu.memory_space<vmem>>, %arg13: memref<256x1152xbf16, #tpu.memory_space<vmem>>) attributes {dimension_semantics = [#tpu.dimension_semantics<parallel>], iteration_bounds = array<i64: 2>, scalar_prefetch = 0 : i64, scratch_operands = 2 : i64, tpu.core_type = #tpu.core_type<tc>, window_params = [{transform_indices = @transform_0, window_bounds = array<i64: 1, 16, 16, 512>}, {pipeline_mode = #tpu.pipeline_mode<synchronous>, transform_indices = @transform_1, window_bounds = array<i64: 512, 128>}, {pipeline_mode = #tpu.pipeline_mode<synchronous>, transform_indices = @transform_2, window_bounds = array<i64: 1152, 128>}, {pipeline_mode = #tpu.pipeline_mode<synchronous>, transform_indices = @transform_3, window_bounds = array<i64: 128, 512>}, {pipeline_mode = #tpu.pipeline_mode<synchronous>, transform_indices = @transform_4, window_bounds = array<i64: 1, 128>}, {pipeline_mode = #tpu.pipeline_mode<synchronous>, transform_indices = @transform_5, window_bounds = array<i64: 1, 128>}, {pipeline_mode = #tpu.pipeline_mode<synchronous>, transform_indices = @transform_6, window_bounds = array<i64: 1, 128>}, {pipeline_mode = #tpu.pipeline_mode<synchronous>, transform_indices = @transform_7, window_bounds = array<i64: 1, 128>}, {pipeline_mode = #tpu.pipeline_mode<synchronous>, transform_indices = @transform_8, window_bounds = array<i64: 1, 512>}, {pipeline_mode = #tpu.pipeline_mode<synchronous>, transform_indices = @transform_9, window_bounds = array<i64: 1, 512>}, {transform_indices = @transform_10, window_bounds = array<i64: 1, 16, 16, 512>}]} {
    %c0 = arith.constant 0 : index
    %c0_0 = arith.constant 0 : index
    %c0_1 = arith.constant 0 : index
    %c0_2 = arith.constant 0 : index
    %0 = vector.load %arg1[%c0, %c0_0, %c0_1, %c0_2] : memref<1x16x16x512xf32, #tpu.memory_space<vmem>>, vector<1x16x16x512xf32>
    %1 = vector.shape_cast %0 : vector<1x16x16x512xf32> to vector<16x16x512xf32>
    %2 = vector.shape_cast %1 : vector<16x16x512xf32> to vector<256x512xf32>
    %3 = arith.truncf %2 : vector<256x512xf32> to vector<256x512xbf16>
    %c0_3 = arith.constant 0 : index
    %c0_4 = arith.constant 0 : index
    %4 = vector.load %arg2[%c0_3, %c0_4] : memref<512x128xbf16, #tpu.memory_space<vmem>>, vector<512x128xbf16>
    %cst = arith.constant dense<0.000000e+00> : vector<256x128xf32>
    %5 = tpu.matmul %3, %4, %cst {dimension_numbers = #tpu.dot_dimension_numbers<[1], [0], [0], [1], [0, 0, 1, 1], [], []>} : vector<256x512xbf16>, vector<512x128xbf16>, vector<256x128xf32> -> vector<256x128xf32>
    %c0_5 = arith.constant 0 : index
    %c0_6 = arith.constant 0 : index
    %6 = vector.load %arg5[%c0_5, %c0_6] : memref<1x128xf32, #tpu.memory_space<vmem>>, vector<1x128xf32>
    %7 = vector.broadcast %6 : vector<1x128xf32> to vector<256x128xf32>
    %8 = arith.mulf %5, %7 : vector<256x128xf32>
    %c0_7 = arith.constant 0 : index
    %c0_8 = arith.constant 0 : index
    %9 = vector.load %arg6[%c0_7, %c0_8] : memref<1x128xf32, #tpu.memory_space<vmem>>, vector<1x128xf32>
    %10 = vector.broadcast %9 : vector<1x128xf32> to vector<256x128xf32>
    %11 = arith.addf %8, %10 : vector<256x128xf32>
    %cst_9 = arith.constant 0.000000e+00 : f32
    %12 = vector.broadcast %cst_9 : f32 to vector<256x128xf32>
    %13 = arith.maximumf %11, %12 : vector<256x128xf32>
    %cst_10 = arith.constant 0.000000e+00 : f32
    %14 = vector.broadcast %cst_10 : f32 to vector<1x18x128xf32>
    %cst_11 = arith.constant 0.000000e+00 : f32
    %15 = vector.broadcast %cst_11 : f32 to vector<18x1x128xf32>
    %c0_12 = arith.constant 0 : index
    %c0_13 = arith.constant 0 : index
    %c0_14 = arith.constant 0 : index
    %16 = vector.load %arg12[%c0_12, %c0_13, %c0_14] : memref<18x18x128xf32, #tpu.memory_space<vmem>>, vector<1x18x128xf32>
    tpu.vector_store %arg12[%c0_12, %c0_13, %c0_14], %14 {strides = array<i32>} : memref<18x18x128xf32, #tpu.memory_space<vmem>>, vector<1x18x128xf32>,
    %c17 = arith.constant 17 : index
    %c0_15 = arith.constant 0 : index
    %c0_16 = arith.constant 0 : index
    %17 = vector.load %arg12[%c17, %c0_15, %c0_16] : memref<18x18x128xf32, #tpu.memory_space<vmem>>, vector<1x18x128xf32>
    tpu.vector_store %arg12[%c17, %c0_15, %c0_16], %14 {strides = array<i32>} : memref<18x18x128xf32, #tpu.memory_space<vmem>>, vector<1x18x128xf32>,
    %c0_17 = arith.constant 0 : index
    %c0_18 = arith.constant 0 : index
    %c0_19 = arith.constant 0 : index
    %18 = vector.load %arg12[%c0_17, %c0_18, %c0_19] : memref<18x18x128xf32, #tpu.memory_space<vmem>>, vector<18x1x128xf32>
    tpu.vector_store %arg12[%c0_17, %c0_18, %c0_19], %15 {strides = array<i32>} : memref<18x18x128xf32, #tpu.memory_space<vmem>>, vector<18x1x128xf32>,
    %c0_20 = arith.constant 0 : index
    %c17_21 = arith.constant 17 : index
    %c0_22 = arith.constant 0 : index
    %19 = vector.load %arg12[%c0_20, %c17_21, %c0_22] : memref<18x18x128xf32, #tpu.memory_space<vmem>>, vector<18x1x128xf32>
    tpu.vector_store %arg12[%c0_20, %c17_21, %c0_22], %15 {strides = array<i32>} : memref<18x18x128xf32, #tpu.memory_space<vmem>>, vector<18x1x128xf32>,
    %20 = vector.shape_cast %13 : vector<256x128xf32> to vector<16x16x128xf32>
    %c1 = arith.constant 1 : index
    %c1_23 = arith.constant 1 : index
    %c0_24 = arith.constant 0 : index
    %21 = vector.load %arg12[%c1, %c1_23, %c0_24] : memref<18x18x128xf32, #tpu.memory_space<vmem>>, vector<16x16x128xf32>
    tpu.vector_store %arg12[%c1, %c1_23, %c0_24], %20 {strides = array<i32>} : memref<18x18x128xf32, #tpu.memory_space<vmem>>, vector<16x16x128xf32>,
    %c0_25 = arith.constant 0 : index
    %c0_26 = arith.constant 0 : index
    %c0_27 = arith.constant 0 : index
    %22 = vector.load %arg12[%c0_25, %c0_26, %c0_27] : memref<18x18x128xf32, #tpu.memory_space<vmem>>, vector<16x16x128xf32>
    %23 = vector.shape_cast %22 : vector<16x16x128xf32> to vector<256x128xf32>
    %24 = arith.truncf %23 : vector<256x128xf32> to vector<256x128xbf16>
    %c0_28 = arith.constant 0 : index
    %c0_29 = arith.constant 0 : index
    %25 = vector.load %arg13[%c0_28, %c0_29] : memref<256x1152xbf16, #tpu.memory_space<vmem>>, vector<256x128xbf16>
    tpu.vector_store %arg13[%c0_28, %c0_29], %24 {strides = array<i32>} : memref<256x1152xbf16, #tpu.memory_space<vmem>>, vector<256x128xbf16>,
    %c0_30 = arith.constant 0 : index
    %c1_31 = arith.constant 1 : index
    %c0_32 = arith.constant 0 : index
    %26 = vector.load %arg12[%c0_30, %c1_31, %c0_32] : memref<18x18x128xf32, #tpu.memory_space<vmem>>, vector<16x16x128xf32>
    %27 = vector.shape_cast %26 : vector<16x16x128xf32> to vector<256x128xf32>
    %28 = arith.truncf %27 : vector<256x128xf32> to vector<256x128xbf16>
    %c0_33 = arith.constant 0 : index
    %c128 = arith.constant 128 : index
    %29 = vector.load %arg13[%c0_33, %c128] : memref<256x1152xbf16, #tpu.memory_space<vmem>>, vector<256x128xbf16>
    tpu.vector_store %arg13[%c0_33, %c128], %28 {strides = array<i32>} : memref<256x1152xbf16, #tpu.memory_space<vmem>>, vector<256x128xbf16>,
    %c0_34 = arith.constant 0 : index
    %c2 = arith.constant 2 : index
    %c0_35 = arith.constant 0 : index
    %30 = vector.load %arg12[%c0_34, %c2, %c0_35] : memref<18x18x128xf32, #tpu.memory_space<vmem>>, vector<16x16x128xf32>
    %31 = vector.shape_cast %30 : vector<16x16x128xf32> to vector<256x128xf32>
    %32 = arith.truncf %31 : vector<256x128xf32> to vector<256x128xbf16>
    %c0_36 = arith.constant 0 : index
    %c256 = arith.constant 256 : index
    %33 = vector.load %arg13[%c0_36, %c256] : memref<256x1152xbf16, #tpu.memory_space<vmem>>, vector<256x128xbf16>
    tpu.vector_store %arg13[%c0_36, %c256], %32 {strides = array<i32>} : memref<256x1152xbf16, #tpu.memory_space<vmem>>, vector<256x128xbf16>,
    %c1_37 = arith.constant 1 : index
    %c0_38 = arith.constant 0 : index
    %c0_39 = arith.constant 0 : index
    %34 = vector.load %arg12[%c1_37, %c0_38, %c0_39] : memref<18x18x128xf32, #tpu.memory_space<vmem>>, vector<16x16x128xf32>
    %35 = vector.shape_cast %34 : vector<16x16x128xf32> to vector<256x128xf32>
    %36 = arith.truncf %35 : vector<256x128xf32> to vector<256x128xbf16>
    %c0_40 = arith.constant 0 : index
    %c384 = arith.constant 384 : index
    %37 = vector.load %arg13[%c0_40, %c384] : memref<256x1152xbf16, #tpu.memory_space<vmem>>, vector<256x128xbf16>
    tpu.vector_store %arg13[%c0_40, %c384], %36 {strides = array<i32>} : memref<256x1152xbf16, #tpu.memory_space<vmem>>, vector<256x128xbf16>,
    %c1_41 = arith.constant 1 : index
    %c1_42 = arith.constant 1 : index
    %c0_43 = arith.constant 0 : index
    %38 = vector.load %arg12[%c1_41, %c1_42, %c0_43] : memref<18x18x128xf32, #tpu.memory_space<vmem>>, vector<16x16x128xf32>
    %39 = vector.shape_cast %38 : vector<16x16x128xf32> to vector<256x128xf32>
    %40 = arith.truncf %39 : vector<256x128xf32> to vector<256x128xbf16>
    %c0_44 = arith.constant 0 : index
    %c512 = arith.constant 512 : index
    %41 = vector.load %arg13[%c0_44, %c512] : memref<256x1152xbf16, #tpu.memory_space<vmem>>, vector<256x128xbf16>
    tpu.vector_store %arg13[%c0_44, %c512], %40 {strides = array<i32>} : memref<256x1152xbf16, #tpu.memory_space<vmem>>, vector<256x128xbf16>,
    %c1_45 = arith.constant 1 : index
    %c2_46 = arith.constant 2 : index
    %c0_47 = arith.constant 0 : index
    %42 = vector.load %arg12[%c1_45, %c2_46, %c0_47] : memref<18x18x128xf32, #tpu.memory_space<vmem>>, vector<16x16x128xf32>
    %43 = vector.shape_cast %42 : vector<16x16x128xf32> to vector<256x128xf32>
    %44 = arith.truncf %43 : vector<256x128xf32> to vector<256x128xbf16>
    %c0_48 = arith.constant 0 : index
    %c640 = arith.constant 640 : index
    %45 = vector.load %arg13[%c0_48, %c640] : memref<256x1152xbf16, #tpu.memory_space<vmem>>, vector<256x128xbf16>
    tpu.vector_store %arg13[%c0_48, %c640], %44 {strides = array<i32>} : memref<256x1152xbf16, #tpu.memory_space<vmem>>, vector<256x128xbf16>,
    %c2_49 = arith.constant 2 : index
    %c0_50 = arith.constant 0 : index
    %c0_51 = arith.constant 0 : index
    %46 = vector.load %arg12[%c2_49, %c0_50, %c0_51] : memref<18x18x128xf32, #tpu.memory_space<vmem>>, vector<16x16x128xf32>
    %47 = vector.shape_cast %46 : vector<16x16x128xf32> to vector<256x128xf32>
    %48 = arith.truncf %47 : vector<256x128xf32> to vector<256x128xbf16>
    %c0_52 = arith.constant 0 : index
    %c768 = arith.constant 768 : index
    %49 = vector.load %arg13[%c0_52, %c768] : memref<256x1152xbf16, #tpu.memory_space<vmem>>, vector<256x128xbf16>
    tpu.vector_store %arg13[%c0_52, %c768], %48 {strides = array<i32>} : memref<256x1152xbf16, #tpu.memory_space<vmem>>, vector<256x128xbf16>,
    %c2_53 = arith.constant 2 : index
    %c1_54 = arith.constant 1 : index
    %c0_55 = arith.constant 0 : index
    %50 = vector.load %arg12[%c2_53, %c1_54, %c0_55] : memref<18x18x128xf32, #tpu.memory_space<vmem>>, vector<16x16x128xf32>
    %51 = vector.shape_cast %50 : vector<16x16x128xf32> to vector<256x128xf32>
    %52 = arith.truncf %51 : vector<256x128xf32> to vector<256x128xbf16>
    %c0_56 = arith.constant 0 : index
    %c896 = arith.constant 896 : index
    %53 = vector.load %arg13[%c0_56, %c896] : memref<256x1152xbf16, #tpu.memory_space<vmem>>, vector<256x128xbf16>
    tpu.vector_store %arg13[%c0_56, %c896], %52 {strides = array<i32>} : memref<256x1152xbf16, #tpu.memory_space<vmem>>, vector<256x128xbf16>,
    %c2_57 = arith.constant 2 : index
    %c2_58 = arith.constant 2 : index
    %c0_59 = arith.constant 0 : index
    %54 = vector.load %arg12[%c2_57, %c2_58, %c0_59] : memref<18x18x128xf32, #tpu.memory_space<vmem>>, vector<16x16x128xf32>
    %55 = vector.shape_cast %54 : vector<16x16x128xf32> to vector<256x128xf32>
    %56 = arith.truncf %55 : vector<256x128xf32> to vector<256x128xbf16>
    %c0_60 = arith.constant 0 : index
    %c1024 = arith.constant 1024 : index
    %57 = vector.load %arg13[%c0_60, %c1024] : memref<256x1152xbf16, #tpu.memory_space<vmem>>, vector<256x128xbf16>
    tpu.vector_store %arg13[%c0_60, %c1024], %56 {strides = array<i32>} : memref<256x1152xbf16, #tpu.memory_space<vmem>>, vector<256x128xbf16>,
    %c0_61 = arith.constant 0 : index
    %c0_62 = arith.constant 0 : index
    %58 = vector.load %arg13[%c0_61, %c0_62] : memref<256x1152xbf16, #tpu.memory_space<vmem>>, vector<256x1152xbf16>
    %c0_63 = arith.constant 0 : index
    %c0_64 = arith.constant 0 : index
    %59 = vector.load %arg3[%c0_63, %c0_64] : memref<1152x128xbf16, #tpu.memory_space<vmem>>, vector<1152x128xbf16>
    %cst_65 = arith.constant dense<0.000000e+00> : vector<256x128xf32>
    %60 = tpu.matmul %58, %59, %cst_65 {dimension_numbers = #tpu.dot_dimension_numbers<[1], [0], [0], [1], [0, 0, 1, 1], [], []>} : vector<256x1152xbf16>, vector<1152x128xbf16>, vector<256x128xf32> -> vector<256x128xf32>
    %c0_66 = arith.constant 0 : index
    %c0_67 = arith.constant 0 : index
    %61 = vector.load %arg7[%c0_66, %c0_67] : memref<1x128xf32, #tpu.memory_space<vmem>>, vector<1x128xf32>
    %62 = vector.broadcast %61 : vector<1x128xf32> to vector<256x128xf32>
    %63 = arith.mulf %60, %62 : vector<256x128xf32>
    %c0_68 = arith.constant 0 : index
    %c0_69 = arith.constant 0 : index
    %64 = vector.load %arg8[%c0_68, %c0_69] : memref<1x128xf32, #tpu.memory_space<vmem>>, vector<1x128xf32>
    %65 = vector.broadcast %64 : vector<1x128xf32> to vector<256x128xf32>
    %66 = arith.addf %63, %65 : vector<256x128xf32>
    %cst_70 = arith.constant 0.000000e+00 : f32
    %67 = vector.broadcast %cst_70 : f32 to vector<256x128xf32>
    %68 = arith.maximumf %66, %67 : vector<256x128xf32>
    %69 = arith.truncf %68 : vector<256x128xf32> to vector<256x128xbf16>
    %c0_71 = arith.constant 0 : index
    %c0_72 = arith.constant 0 : index
    %70 = vector.load %arg4[%c0_71, %c0_72] : memref<128x512xbf16, #tpu.memory_space<vmem>>, vector<128x512xbf16>
    %cst_73 = arith.constant dense<0.000000e+00> : vector<256x512xf32>
    %71 = tpu.matmul %69, %70, %cst_73 {dimension_numbers = #tpu.dot_dimension_numbers<[1], [0], [0], [1], [0, 0, 1, 1], [], []>} : vector<256x128xbf16>, vector<128x512xbf16>, vector<256x512xf32> -> vector<256x512xf32>
    %c0_74 = arith.constant 0 : index
    %c0_75 = arith.constant 0 : index
    %72 = vector.load %arg9[%c0_74, %c0_75] : memref<1x512xf32, #tpu.memory_space<vmem>>, vector<1x512xf32>
    %73 = vector.broadcast %72 : vector<1x512xf32> to vector<256x512xf32>
    %74 = arith.mulf %71, %73 : vector<256x512xf32>
    %c0_76 = arith.constant 0 : index
    %c0_77 = arith.constant 0 : index
    %75 = vector.load %arg10[%c0_76, %c0_77] : memref<1x512xf32, #tpu.memory_space<vmem>>, vector<1x512xf32>
    %76 = vector.broadcast %75 : vector<1x512xf32> to vector<256x512xf32>
    %77 = arith.addf %74, %76 : vector<256x512xf32>
    %c0_78 = arith.constant 0 : index
    %c0_79 = arith.constant 0 : index
    %c0_80 = arith.constant 0 : index
    %c0_81 = arith.constant 0 : index
    %78 = vector.load %arg1[%c0_78, %c0_79, %c0_80, %c0_81] : memref<1x16x16x512xf32, #tpu.memory_space<vmem>>, vector<1x16x16x512xf32>
    %79 = vector.shape_cast %78 : vector<1x16x16x512xf32> to vector<16x16x512xf32>
    %80 = vector.shape_cast %79 : vector<16x16x512xf32> to vector<256x512xf32>
    %81 = arith.addf %77, %80 : vector<256x512xf32>
    %cst_82 = arith.constant 0.000000e+00 : f32
    %82 = vector.broadcast %cst_82 : f32 to vector<256x512xf32>
    %83 = arith.maximumf %81, %82 : vector<256x512xf32>
    %84 = vector.shape_cast %83 : vector<256x512xf32> to vector<16x16x512xf32>
    %c0_83 = arith.constant 0 : index
    %c0_84 = arith.constant 0 : index
    %c0_85 = arith.constant 0 : index
    %c0_86 = arith.constant 0 : index
    %85 = vector.load %arg11[%c0_83, %c0_84, %c0_85, %c0_86] : memref<1x16x16x512xf32, #tpu.memory_space<vmem>>, vector<1x16x16x512xf32>
    %86 = vector.shape_cast %85 : vector<1x16x16x512xf32> to vector<16x16x512xf32>
    %87 = vector.shape_cast %84 : vector<16x16x512xf32> to vector<1x16x16x512xf32>
    tpu.vector_store %arg11[%c0_83, %c0_84, %c0_85, %c0_86], %87 {strides = array<i32>} : memref<1x16x16x512xf32, #tpu.memory_space<vmem>>, vector<1x16x16x512xf32>,
    return
  }
  func.func @transform_0(%arg0: i32) -> (i32, i32, i32, i32) {
    %c0_i32 = arith.constant 0 : i32
    %c0_i32_0 = arith.constant 0 : i32
    %c0_i32_1 = arith.constant 0 : i32
    %c0_i32_2 = arith.constant 0 : i32
    return %arg0, %c0_i32, %c0_i32_0, %c0_i32_1 : i32, i32, i32, i32
  }
  func.func @transform_1(%arg0: i32) -> (i32, i32) {
    %c0_i32 = arith.constant 0 : i32
    %c0_i32_0 = arith.constant 0 : i32
    %c0_i32_1 = arith.constant 0 : i32
    return %c0_i32, %c0_i32_0 : i32, i32
  }
  func.func @transform_2(%arg0: i32) -> (i32, i32) {
    %c0_i32 = arith.constant 0 : i32
    %c0_i32_0 = arith.constant 0 : i32
    %c0_i32_1 = arith.constant 0 : i32
    return %c0_i32, %c0_i32_0 : i32, i32
  }
  func.func @transform_3(%arg0: i32) -> (i32, i32) {
    %c0_i32 = arith.constant 0 : i32
    %c0_i32_0 = arith.constant 0 : i32
    %c0_i32_1 = arith.constant 0 : i32
    return %c0_i32, %c0_i32_0 : i32, i32
  }
  func.func @transform_4(%arg0: i32) -> (i32, i32) {
    %c0_i32 = arith.constant 0 : i32
    %c0_i32_0 = arith.constant 0 : i32
    %c0_i32_1 = arith.constant 0 : i32
    return %c0_i32, %c0_i32_0 : i32, i32
  }
  func.func @transform_5(%arg0: i32) -> (i32, i32) {
    %c0_i32 = arith.constant 0 : i32
    %c0_i32_0 = arith.constant 0 : i32
    %c0_i32_1 = arith.constant 0 : i32
    return %c0_i32, %c0_i32_0 : i32, i32
  }
  func.func @transform_6(%arg0: i32) -> (i32, i32) {
    %c0_i32 = arith.constant 0 : i32
    %c0_i32_0 = arith.constant 0 : i32
    %c0_i32_1 = arith.constant 0 : i32
    return %c0_i32, %c0_i32_0 : i32, i32
  }
  func.func @transform_7(%arg0: i32) -> (i32, i32) {
    %c0_i32 = arith.constant 0 : i32
    %c0_i32_0 = arith.constant 0 : i32
    %c0_i32_1 = arith.constant 0 : i32
    return %c0_i32, %c0_i32_0 : i32, i32
  }
  func.func @transform_8(%arg0: i32) -> (i32, i32) {
    %c0_i32 = arith.constant 0 : i32
    %c0_i32_0 = arith.constant 0 : i32
    %c0_i32_1 = arith.constant 0 : i32
    return %c0_i32, %c0_i32_0 : i32, i32
  }
  func.func @transform_9(%arg0: i32) -> (i32, i32) {
    %c0_i32 = arith.constant 0 : i32
    %c0_i32_0 = arith.constant 0 : i32
    %c0_i32_1 = arith.constant 0 : i32
    return %c0_i32, %c0_i32_0 : i32, i32
  }
  func.func @transform_10(%arg0: i32) -> (i32, i32, i32, i32) {
    %c0_i32 = arith.constant 0 : i32
    %c0_i32_0 = arith.constant 0 : i32
    %c0_i32_1 = arith.constant 0 : i32
    %c0_i32_2 = arith.constant 0 : i32
    return %arg0, %c0_i32, %c0_i32_0, %c0_i32_1 : i32, i32, i32, i32
  }
}

</mosaic_0001>

<bundles_post_ra>
// kernel: tpu_custom_call.1
= control target key start
LH: loop header
LB: loop body
LE: loop exit
PB: predicated region body
PF: predicated region fallthrough
CT: control target
= control target key end

     0   :  { %s8140_s0 = inlined_call_operand.hbm [shape: f32[2,16,16,512], index: 0, kind: input, shape index: {}]   ;;  %s8141_s1 = inlined_call_operand.hbm [shape: bf16[512,128], index: 1, kind: input, shape index: {}]   ;;  %s8142_s2 = inlined_call_operand.hbm [shape: bf16[1152,128], index: 2, kind: input, shape index: {}]   ;;  %s8143_s3 = inlined_call_operand.hbm [shape: bf16[128,512], index: 3, kind: input, shape index: {}]   ;;  %s8144_s4 = inlined_call_operand.vmem [shape: f32[1,128], index: 4, kind: input, shape index: {}]   ;;  %s8145_s5 = inlined_call_operand.vmem [shape: f32[1,128], index: 5, kind: input, shape index: {}]   ;;  %s8146_s6 = inlined_call_operand.vmem [shape: f32[1,128], index: 6, kind: input, shape index: {}]   ;;  %s8147_s7 = inlined_call_operand.vmem [shape: f32[1,128], index: 7, kind: input, shape index: {}]   ;;  %s8148_s8 = inlined_call_operand.vmem [shape: f32[1,512], index: 8, kind: input, shape index: {}]   ;;  %s8149_s9 = inlined_call_operand.vmem [shape: f32[1,512], index: 9, kind: input, shape index: {}]   ;;  %s8150_s10 = inlined_call_operand.hbm [shape: f32[2,16,16,512], index: 10, kind: output, shape index: {}]  }
   0x1   :  { %8157 = sst [smem:[#allocation19_spill]] %s8149_s9 }
   0x2   :  { %8158 = sst [smem:[#allocation20_spill]] %s8150_s10 }
   0x3   :  { %15 = vsyncpa [#allocation5], 0 }
   0x4   :  { %17 = vsyncpa [#allocation5 + $0x1], 0 }
   0x5   :  { %18 = vsyncpa [#allocation8], 0 }
   0x6   :  { %19 = vsyncpa [#allocation11], 0 }
   0x7   :  { %20 = vsyncpa [#allocation6], 0 }
   0x8   :  { %22 = vsyncpa [#allocation6 + $0x1], 0  ;;  %s6535_s13 = smov 0   ;;  %s6537_s14 = smov 0  }
   0x9   :  { %s6539_s15 = smov 0   ;;  %s6541_s16 = smov 0  }
   0xa LB: > { %8159 = sst [smem:[#allocation17_spill]] %s6451_s13  ;;  %s6556_s17 = sadd.s32 4294967295, %s6463_s16   ;;  %s6463_s16 = sphi %s6541_s16, %s8184_s16   ;;  %s6459_s15 = sphi %s6539_s15, %s8183_s15   ;;  %s6455_s14 = sphi %s6537_s14, %s8182_s14   ;;  %s6451_s13 = sphi %s6535_s13, %s8181_s13  }
   0xb   : > { %s5113_s18 = sadd.s32 4294967294, %s6463_s16   ;;  %p48_p0 = scmp.ne.s32.totalorder %s6455_s14, %s6451_s13 }
   0xc   : > { %p8151_p1 = scmp.eq.s32.totalorder %s6556_s17, 0  ;;  %p267_p3 = scmp.eq.s32.totalorder %s5113_s18, 1 }
   0xd   : > { %p5114_p5 = scmp.ge.s32.totalorder %s6463_s16, 1  ;;  %p274_p7 = scmp.lt.s32.totalorder %s6463_s16, 3 }
   0xe   : > { %p6565_p4 = por %p8151_p1, %p48_p0  ;;  %p6570_p6 = por %p267_p3, %p48_p0 }
   0xf   : > { %p6575_p8 = pnand %p5114_p5, %p274_p7  ;;  %s6465_s22 = smov [#allocation7]  }
  0x10   : > { %s8160_s19 = scalar_select %p6565_p4, 1, 0 }
  0x11   : > { %s8161_s20 = scalar_select %p6570_p6, 1, 0 }
  0x12   : > { %s8163_s21 = scalar_select %p6575_p8, 1, 0 }
  0x13   : > { %8162 = sst [smem:[#allocation18_spill]] %s8161_s20  ;;  %s286_s23 = sshll.u32 %s6465_s22, 4  ;;  %s6579_s23 = int_to_ptr.vmem [resolvable:$true] %s286_s23 }
  0x14   : > { %p6051_p9 = pneg %p6575_p8  ;;  %s6466_s25 = smov [#allocation9]  }
  0x15   : > { %s299_s26 = sshll.u32 %s6466_s25, 4  ;;  %s6467_s27 = smov [#allocation10]   ;;  %s6590_s26 = int_to_ptr.vmem [resolvable:$true] %s299_s26 }
  0x16   : > { %p6586_p11 = pnand %p6051_p9, %p8151_p1  ;;  %s6592_s28 = sshll.u32 %s6467_s27, 4  ;;  %s313_s28 = int_to_ptr.vmem [resolvable:$true] %s6592_s28 }
  0x17   : > { %s6275_s11 = scalar_lea.hbm %s8141_s1, 4096 }
  0x18   : > { %p6276_p12 = scmp.ne.s32.totalorder %s8141_s1, %s6275_s11  ;;  %p6602_p13 = pneg %p6586_p11 }
  0x19   : > { %p6282_p5 = scmp.lt.u32.totalorder %s6275_s11, %s8141_s1 }
  0x1a   : > { %p6278_p0 = pnand %p6602_p13, %p6276_p12 }
  0x1c   : > { %p6279_p3 = pneg %p6278_p0 }
  0x1e   : > { %p6284_p7 = pnand %p6282_p5, %p6279_p3 }
  0x20   : > { %6287 = shalt.err (!%p6284_p7)
}
  0x21   : > { %s6288_s29 = scalar_lea.vmem %s6579_s23, 4096  ;;  %p6296_p2 = scmp.lt.s32.totalorder %s6579_s23, %s6579_s23 }
  0x22   : > { %p6289_p9 = scmp.ne.s32.totalorder %s6579_s23, %s6288_s29  ;;  %p6297_p6 = scmp.lt.s32.totalorder %s6288_s29, %s6288_s29 }
  0x24   : > { %p6291_p10 = pnand %p6289_p9, %p6602_p13  ;;  %p6298_p12 = por %p6297_p6, %p6296_p2 }
  0x26   : > { %p6292_p1 = pneg %p6291_p10 }
  0x28   : > { %p6299_p0 = pnand %p6298_p12, %p6292_p1 }
  0x2a   : > { %6302 = shalt.err (!%p6299_p0)
}
  0x2b   : > { %s6468_s30 = smov 64   ;;  %s6469_s11 = smov 4  }
  0x2c   : > { %6054 = dma.hbm_to_vmem [thread:$0]  (!%p6586_p11), %s8141_s1, 4096, %s6579_s23, [#allocation8], %s6468_s30, %s6468_s30, %s6469_s11  }
  0x2d   : > { %s6303_s20 = scalar_lea.hbm %s8142_s2, 9216 }
  0x2e   : > { %p6304_p2 = scmp.ne.s32.totalorder %s8142_s2, %s6303_s20  ;;  %p6310_p10 = scmp.lt.u32.totalorder %s6303_s20, %s8142_s2 }
  0x30   : > { %p6306_p1 = pnand %p6304_p2, %p6602_p13 }
  0x32   : > { %p6307_p6 = pneg %p6306_p1 }
  0x34   : > { %p6312_p3 = pnand %p6310_p10, %p6307_p6 }
  0x36   : > { %6315 = shalt.err (!%p6312_p3)
}
  0x37   : > { %s6316_s23 = scalar_lea.vmem %s6590_s26, 9216  ;;  %p6324_p12 = scmp.lt.s32.totalorder %s6590_s26, %s6590_s26 }
  0x38   : > { %p6317_p5 = scmp.ne.s32.totalorder %s6590_s26, %s6316_s23  ;;  %p6325_p0 = scmp.lt.s32.totalorder %s6316_s23, %s6316_s23 }
  0x3a   : > { %p6319_p7 = pnand %p6317_p5, %p6602_p13  ;;  %p6326_p2 = por %p6325_p0, %p6324_p12 }
  0x3c   : > { %p6320_p9 = pneg %p6319_p7 }
  0x3e   : > { %p6327_p1 = pnand %p6326_p2, %p6320_p9 }
  0x40   : > { %6330 = shalt.err (!%p6327_p1)
}
  0x41   : > { %6057 = dma.hbm_to_vmem [thread:$0]  (!%p6586_p11), %s8142_s2, 9216, %s6590_s26, [#allocation8], %s6468_s30, %s6468_s30, %s6469_s11  }
  0x42   : > { %s6331_s12 = scalar_lea.hbm %s8143_s3, 4096 }
  0x43   : > { %p6332_p6 = scmp.ne.s32.totalorder %s8143_s3, %s6331_s12  ;;  %p6338_p5 = scmp.lt.u32.totalorder %s6331_s12, %s8143_s3 }
  0x45   : > { %p6334_p10 = pnand %p6332_p6, %p6602_p13 }
  0x47   : > { %p6335_p3 = pneg %p6334_p10 }
  0x49   : > { %p6340_p7 = pnand %p6338_p5, %p6335_p3 }
  0x4b   : > { %6343 = shalt.err (!%p6340_p7)
}
  0x4c   : > { %s6344_s23 = scalar_lea.vmem %s313_s28, 4096  ;;  %p6352_p2 = scmp.lt.s32.totalorder %s313_s28, %s313_s28 }
  0x4d   : > { %p6345_p9 = scmp.ne.s32.totalorder %s313_s28, %s6344_s23  ;;  %p6353_p1 = scmp.lt.s32.totalorder %s6344_s23, %s6344_s23 }
  0x4f   : > { %p6347_p12 = pnand %p6345_p9, %p6602_p13  ;;  %p6354_p4 = por %p6353_p1, %p6352_p2 }
  0x51   : > { %p6348_p0 = pneg %p6347_p12 }
  0x53   : > { %p6355_p8 = pnand %p6354_p4, %p6348_p0 }
  0x55   : > { %6358 = shalt.err (!%p6355_p8)
}
  0x56   : > { %s6470_s26 = smov 256   ;;  %s6471_s22 = smov 16  }
  0x57   : > { %6060 = dma.hbm_to_vmem [thread:$0]  (!%p6586_p11), %s8143_s3, 4096, %s313_s28, [#allocation11], %s6470_s26, %s6470_s26, %s6471_s22  }
  0x58   : > { %s6666_s9 = sadd.s32 1, %s6463_s16   ;;  %s35_s13 = sadd.s32 1, %s6459_s15 }
  0x59   : > { %s32_s10 = ssub.s32 %s6463_s16, %s6666_s9  ;;  %p42_p8 = scmp.ne.s32.totalorder %s6459_s15, %s6455_s14 }
  0x5a   : > { %p33_p4 = scmp.eq.s32.totalorder %s32_s10, 0  ;;  %p43_p13 = scmp.eq.s32.totalorder %s6463_s16, 0 }
  0x5b   : > { %p6072_p6 = scmp.lt.s32.totalorder %s6463_s16, 2  ;;  %p8166_p3 = scmp.eq.s32.totalorder %s6556_s17, 1 }
  0x5c   : > { %s6676_s20 = scalar_select %p33_p4, %s6459_s15, %s35_s13  }
  0x5d   : > { %p44_p10 = por %p43_p13, %p42_p8  ;;  %p6680_p5 = por %p8166_p3, %p42_p8 }
  0x5e   : > { %s344_s24 = sand.u32 1, %s6459_s15   ;;  %s5273_s18 = sshll.u32 %s6463_s16, 14 }
  0x5f   : > { %s5119_s28 = sshll.u32 %s344_s24, 10  ;;  %s6689_s29 = scalar_lea.hbm %s8140_s0, %s5273_s18 }
  0x60   : > { %s348_s23 = scalar_lea.vmem [#allocation4], %s5119_s28  ;;  %p6691_p11 = pnand %p6072_p6, %p44_p10 }
  0x61   : > { %s355_s26 = sshll.u32 %s348_s23, 4  ;;  %s6697_s30 = scalar_lea.sflag [#allocation5], %s344_s24  ;;  %s6695_s26 = int_to_ptr.vmem [resolvable:$true] %s355_s26 }
  0x62   : > { %s6359_s11 = scalar_lea.hbm %s6689_s29, 16384  ;;  %p6361_p9 = pneg %p6691_p11 }
  0x63   : > { %p6360_p7 = scmp.ne.s32.totalorder %s6689_s29, %s6359_s11  ;;  %s6364_s18 = scalar_lea.hbm %s8140_s0, 32768 }
  0x64   : > { %p6365_p2 = scmp.lt.u32.totalorder %s6689_s29, %s8140_s0  ;;  %p6366_p1 = scmp.lt.u32.totalorder %s6364_s18, %s6359_s11 }
  0x65   : > { %p6362_p12 = pnand %p6361_p9, %p6360_p7  ;;  %p6368_p8 = scmp.lt.u32.totalorder %s6359_s11, %s6689_s29 }
  0x66   : > { %p6367_p4 = por %p6366_p1, %p6365_p2 }
  0x67   : > { %p6363_p0 = pneg %p6362_p12 }
  0x68   : > { %p6369_p13 = por %p6368_p8, %p6367_p4 }
  0x6a   : > { %p6370_p6 = pnand %p6369_p13, %p6363_p0 }
  0x6c   : > { %6373 = shalt.err (!%p6370_p6)
}
  0x6d   : > { %s6374_s24 = scalar_lea.vmem %s6695_s26, 16384  ;;  %s6472_s27 = smov [#allocation4]  }
  0x6e   : > { %p6375_p10 = scmp.ne.s32.totalorder %s6695_s26, %s6374_s24  ;;  %s6379_s23 = sshll.u32 %s6472_s27, 4  ;;  %s6380_s23 = int_to_ptr.vmem [resolvable:$false] %s6379_s23 }
  0x6f   : > { %s6381_s10 = scalar_lea.vmem %s6380_s23, 32768  ;;  %p6382_p12 = scmp.lt.s32.totalorder %s6695_s26, %s6380_s23 }
  0x70   : > { %p6377_p3 = pnand %p6375_p10, %p6361_p9  ;;  %p6383_p2 = scmp.lt.s32.totalorder %s6381_s10, %s6374_s24 }
  0x72   : > { %p6378_p7 = pneg %p6377_p3  ;;  %p6384_p1 = por %p6383_p2, %p6382_p12 }
  0x74   : > { %p6385_p4 = pnand %p6384_p1, %p6378_p7 }
  0x76   : > { %6388 = shalt.err (!%p6385_p4)
}
  0x77   : > { %s6473_s11 = smov 512   ;;  %s6474_s13 = smov 32  }
  0x78   : > { %6064 = dma.hbm_to_vmem [thread:$0]  (!%p6691_p11), %s6689_s29, 16384, %s6695_s26, %s6697_s30, %s6473_s11, %s6473_s11, %s6474_s13  }
  0x79   : > { %p8169_p9 = scmp.ne.s32.totalorder %s8163_s21, 0 }
  0x7a   : > { %s6728_s18 = sand.u32 (!%p8169_p9), 1, %s6455_s14   ;;  %p8170_p0 = scmp.ne.s32.totalorder (!%p8169_p9), %s8160_s19, 0 }
  0x7b   : > { %367 = sbr.rel (%p8169_p9) target bundleno = 1278 (0x4fe), region = 60  ;;  %s5123_s28 = sshll.u32 (!%p8169_p9), %s6728_s18, 10 }
  0x7c   : > { %s370_s25 = scalar_lea.sflag (!%p8169_p9), [#allocation5], %s6728_s18  ;;  %s6734_s24 = scalar_lea.vmem (!%p8169_p9), [#allocation4], %s5123_s28 }
  0x82   : > { %6434 = dma.done.wait (%p8170_p0), %s370_s25, 16384  }
  0x83   : > { %6436 = vsyncadd (%p8170_p0), %s370_s25, 4294950912  ;;  %p8171_p11 = scmp.eq.s32.totalorder %s6556_s17, 0 }
  0x85   : > { %6438 = dma.done.wait (%p8171_p11), [#allocation8], 13312   ;;  %p8172_p8 = pmov %p8171_p11 }
  0x87   : > { %6440 = vsyncadd (%p8172_p8), [#allocation8], 4294953984  ;;  %p8173_p13 = pmov %p8172_p8 }
  0x88   : > { %p8174_p6 = pmov %p8172_p8 }
  0x89   : > { %6442 = dma.done.wait (%p8173_p13), [#allocation11], 4096  }
  0x8a   : > { %6444 = vsyncadd (%p8174_p6), [#allocation11], 4294963200  ;;  %v6122_v0 = vld [vmem:[#allocation7 + $0x40] sm:$0xff]   ;;  %v6124_v2 = vld [vmem:[#allocation7 + $0x48] sm:$0xff]   ;;  %s8175_s19 = sld [smem:[#allocation19_spill]]  ;;  %s7599_s21 = scalar_lea.vmem [#allocation12], %s5123_s28 }
  0x8b   : > { %v6123_v1 = vld [vmem:[#allocation7] sm:$0xff]   ;;  %6019 = vmatprep.subr.bf16.mxu1 %v6122_v0  ;;  %5275 = vmatprep.subr.bf16.mxu0 %v6122_v0  ;;  %v6125_v3 = vld [vmem:[#allocation7 + $0x8] sm:$0xff]   ;;  %v6126_v4 = vld [vmem:[#allocation7 + $0x50] sm:$0xff]   ;;  %s5274_s28 = sshll.u32 %s6556_s17, 14  ;;  %s5011_s29 = sshll.u32 %s7599_s21, 4  ;;  %s8090_s29 = int_to_ptr.vmem [resolvable:$true] %s5011_s29 }
  0x8c   : > { %6027 = vmatpush3.bf16.msra.mxu1 %v6123_v1  ;;  %5276 = vmatpush3.bf16.msra.mxu0 %v6123_v1  ;;  %v6127_v5 = vld [vmem:[#allocation7 + $0x10] sm:$0xff]   ;;  %v6128_v6 = vld [vmem:[#allocation7 + $0x58] sm:$0xff]   ;;  %v6130_v8 = vld [vmem:[#allocation7 + $0x60] sm:$0xff]   ;;  %s8176_s26 = sld [smem:[#allocation20_spill]]  ;;  %s4998_s30 = scalar_lea.sflag [#allocation6], %s6728_s18 }
  0x8d   : > { %6020 = vmatprep.subr.bf16.mxu1 %v6124_v2  ;;  %5277 = vmatprep.subr.bf16.mxu0 %v6124_v2  ;;  %v6129_v7 = vld [vmem:[#allocation7 + $0x18] sm:$0xff]   ;;  %v6131_v9 = vld [vmem:[#allocation7 + $0x20] sm:$0xff]   ;;  %v6132_v10 = vld [vmem:[#allocation7 + $0x68] sm:$0xff]   ;;  %s6389_s27 = scalar_lea.vmem %s8090_s29, 16384  ;;  %s6477_s23 = smov [#allocation12]  }
  0x8e   : > { %v520_v11 = vld [vmem:[%s6734_s24 + $0x308] sm:$0xff]  ;;  %v6134_v15 = vld [vmem:[#allocation7 + $0x70] sm:$0xff]   ;;  %v6136_v17 = vld [vmem:[#allocation7 + $0x78] sm:$0xff]   ;;  %p6390_p10 = scmp.ne.s32.totalorder %s8090_s29, %s6389_s27  ;;  %s6393_s10 = sshll.u32 %s6477_s23, 4  ;;  %s6394_s10 = int_to_ptr.vmem [resolvable:$false] %s6393_s10 }
  0x8f   : > { %v524_v12 = vld [vmem:[%s6734_s24 + $0x328] sm:$0xff]  ;;  %v6135_v16 = vld [vmem:[#allocation7 + $0x30] sm:$0xff]   ;;  %v6137_v18 = vld [vmem:[#allocation7 + $0x38] sm:$0xff]   ;;  %s6395_s11 = scalar_lea.vmem %s6394_s10, 32768  ;;  %p6396_p12 = scmp.lt.s32.totalorder %s8090_s29, %s6394_s10 }
  0x90   : > { %6028 = vmatpush3.bf16.msra.mxu1 %v6125_v3  ;;  %5278 = vmatpush3.bf16.msra.mxu0 %v6125_v3  ;;  %v600_v13 = vpack.c.bf16 %v524_v12, %v520_v11  ;;  %v6133_v14 = vld [vmem:[#allocation7 + $0x28] sm:$0xff]   ;;  %v519_v19 = vld [vmem:[%s6734_s24 + $0x300] sm:$0xff]  ;;  %v6142_v31 = vld [vmem:[#allocation7 + $0xd0] sm:$0xff]   ;;  %p6391_p3 = pnand %p6390_p10, %p6680_p5  ;;  %p6397_p2 = scmp.lt.s32.totalorder %s6395_s11, %s6389_s27 }
  0x91   : > { %6021 = vmatprep.subr.bf16.mxu1 %v6126_v4  ;;  %5279 = vmatprep.subr.bf16.mxu0 %v6126_v4  ;;  %v523_v20 = vld [vmem:[%s6734_s24 + $0x320] sm:$0xff]  ;;  %v528_v22 = vld [vmem:[%s6734_s24 + $0x348] sm:$0xff]  ;;  %v6143_v40 = vld [vmem:[#allocation7 + $0x90] sm:$0xff]  }
  0x92   : > { %999 = vmatprep.mubr.bf16.mxu1 %v600_v13  ;;  %v6138_v21 = vld [vmem:[#allocation7 + $0xc0] sm:$0xff]   ;;  %v532_v23 = vld [vmem:[%s6734_s24 + $0x368] sm:$0xff]  ;;  %v599_v24 = vpack.c.bf16 %v523_v20, %v519_v19  ;;  %v6144_v43 = vld [vmem:[#allocation7 + $0xd8] sm:$0xff]   ;;  %s8088_s22 = scalar_lea.hbm %s8176_s26, %s5274_s28  ;;  %p6392_p7 = pneg %p6391_p3 }
  0x93   : > { %v6139_v25 = vld [vmem:[#allocation7 + $0x80] sm:$0xff]   ;;  %v604_v26 = vpack.c.bf16 %v532_v23, %v528_v22  ;;  %v6140_v27 = vld [vmem:[#allocation7 + $0xc8] sm:$0xff]   ;;  %v6145_v46 = vld [vmem:[#allocation7 + $0x98] sm:$0xff]   ;;  %p6398_p1 = por %p6397_p2, %p6396_p12 }
  0x94   : > { %6029 = vmatpush3.bf16.msra.mxu1 %v6127_v5  ;;  %5280 = vmatpush3.bf16.msra.mxu0 %v6127_v5  ;;  %v6141_v28 = vld [vmem:[#allocation7 + $0x88] sm:$0xff]   ;;  %v527_v29 = vld [vmem:[%s6734_s24 + $0x340] sm:$0xff]  ;;  %v6151_v12 = vld [vmem:[#allocation7 + $0xb0] sm:$0xff]  }
  0x95   : > { %6022 = vmatprep.subr.bf16.mxu1 %v6128_v6  ;;  %5281 = vmatprep.subr.bf16.mxu0 %v6128_v6  ;;  %v531_v30 = vld [vmem:[%s6734_s24 + $0x360] sm:$0xff]  ;;  %v536_v32 = vld [vmem:[%s6734_s24 + $0x388] sm:$0xff]  ;;  %v6150_v6 = vld [vmem:[#allocation7 + $0xf0] sm:$0xff]   ;;  %p6399_p4 = pnand %p6398_p1, %p6392_p7 }
  0x96   : > { %v540_v33 = vld [vmem:[%s6734_s24 + $0x3a8] sm:$0xff]  ;;  %v603_v37 = vpack.c.bf16 %v531_v30, %v527_v29  ;;  %v423_v38 = vld [vmem:[%s6734_s24] sm:$0xff]  ;;  %v429_v19 = vld [vmem:[%s6734_s24 + $0x30] sm:$0xff] }
  0x97   : > { %v424_v34 = vld [vmem:[%s6734_s24 + $0x8] sm:$0xff]  ;;  %v427_v39 = vld [vmem:[%s6734_s24 + $0x20] sm:$0xff]  ;;  %v608_v41 = vpack.c.bf16 %v540_v33, %v536_v32  ;;  %v434_v22 = vld [vmem:[%s6734_s24 + $0x58] sm:$0xff] }
  0x98   : > { %6030 = vmatpush3.bf16.msra.mxu1 %v6129_v7  ;;  %5282 = vmatpush3.bf16.msra.mxu0 %v6129_v7  ;;  %v428_v35 = vld [vmem:[%s6734_s24 + $0x28] sm:$0xff]  ;;  %v551_v42 = vpack.c.bf16 %v427_v39, %v423_v38  ;;  %v535_v48 = vld [vmem:[%s6734_s24 + $0x380] sm:$0xff]  ;;  %v426_v7 = vld [vmem:[%s6734_s24 + $0x18] sm:$0xff] }
  0x99   : > { %6023 = vmatprep.subr.bf16.mxu1 %v6130_v8  ;;  %5283 = vmatprep.subr.bf16.mxu0 %v6130_v8  ;;  %v552_v36 = vpack.c.bf16 %v428_v35, %v424_v34  ;;  %v432_v44 = vld [vmem:[%s6734_s24 + $0x48] sm:$0xff]  ;;  %v431_v49 = vld [vmem:[%s6734_s24 + $0x40] sm:$0xff]  ;;  %v430_v8 = vld [vmem:[%s6734_s24 + $0x38] sm:$0xff] }
  0x9a   : > { %v436_v45 = vld [vmem:[%s6734_s24 + $0x68] sm:$0xff]  ;;  %v435_v50 = vld [vmem:[%s6734_s24 + $0x60] sm:$0xff]  ;;  %v554_v13 = vpack.c.bf16 %v430_v8, %v426_v7  ;;  %v438_v23 = vld [vmem:[%s6734_s24 + $0x78] sm:$0xff] }
  0x9b   : > { %903 = vmatprep.mubr.bf16.mxu0 %v552_v36  ;;  %v556_v47 = vpack.c.bf16 %v436_v45, %v432_v44  ;;  %v539_v51 = vld [vmem:[%s6734_s24 + $0x3a0] sm:$0xff]  ;;  %v440_v52 = vld [vmem:[%s6734_s24 + $0x88] sm:$0xff]  ;;  %v555_v57 = vpack.c.bf16 %v435_v50, %v431_v49  ;;  %v442_v34 = vld [vmem:[%s6734_s24 + $0x98] sm:$0xff] }
  0x9c   : > { %6031 = vmatpush3.bf16.msra.mxu1 %v6131_v9  ;;  %5284 = vmatpush3.bf16.msra.mxu0 %v6131_v9  ;;  %v444_v53 = vld [vmem:[%s6734_s24 + $0xa8] sm:$0xff]  ;;  %v6146_v54 = vld [vmem:[#allocation7 + $0xe0] sm:$0xff]   ;;  %v607_v58 = vpack.c.bf16 %v539_v51, %v535_v48  ;;  %v446_v35 = vld [vmem:[%s6734_s24 + $0xb8] sm:$0xff] }
  0x9d   : > { %6024 = vmatprep.subr.bf16.mxu1 %v6132_v10  ;;  %5285 = vmatprep.subr.bf16.mxu0 %v6132_v10  ;;  %v544_v55 = vld [vmem:[%s6734_s24 + $0x3c8] sm:$0xff]  ;;  %v560_v59 = vpack.c.bf16 %v444_v53, %v440_v52  ;;  %v6147_v60 = vld [vmem:[#allocation7 + $0xa0] sm:$0xff]   ;;  %v562_v39 = vpack.c.bf16 %v446_v35, %v442_v34  ;;  %v450_v44 = vld [vmem:[%s6734_s24 + $0xd8] sm:$0xff] }
  0x9e   : > { %v548_v56 = vld [vmem:[%s6734_s24 + $0x3e8] sm:$0xff]  ;;  %v543_v0 = vld [vmem:[%s6734_s24 + $0x3c0] sm:$0xff]  ;;  %v454_v45 = vld [vmem:[%s6734_s24 + $0xf8] sm:$0xff] }
  0x9f   : > { %v612_v61 = vpack.c.bf16 %v548_v56, %v544_v55  ;;  %v6148_v62 = vld [vmem:[#allocation7 + $0xe8] sm:$0xff]   ;;  %v439_v1 = vld [vmem:[%s6734_s24 + $0x80] sm:$0xff]  ;;  %v473_v34 = vld [vmem:[%s6734_s24 + $0x190] sm:$0xff] }
  0xa0   : > { %6032 = vmatpush3.bf16.msra.mxu1 %v6133_v14  ;;  %5286 = vmatpush3.bf16.msra.mxu0 %v6133_v14  ;;  %v6149_v63 = vld [vmem:[#allocation7 + $0xa8] sm:$0xff]   ;;  %v443_v2 = vld [vmem:[%s6734_s24 + $0xa0] sm:$0xff]  ;;  %v6152_v14 = vld [vmem:[#allocation7 + $0xf8] sm:$0xff]  }
  0xa1   : > { %6025 = vmatprep.subr.bf16.mxu1 %v6134_v15  ;;  %5287 = vmatprep.subr.bf16.mxu0 %v6134_v15  ;;  %v547_v3 = vld [vmem:[%s6734_s24 + $0x3e0] sm:$0xff]  ;;  %v448_v4 = vld [vmem:[%s6734_s24 + $0xc8] sm:$0xff]  ;;  %v559_v9 = vpack.c.bf16 %v443_v2, %v439_v1  ;;  %v6153_v15 = vld [vmem:[#allocation7 + $0xb8] sm:$0xff]  }
  0xa2   : > { %v452_v5 = vld [vmem:[%s6734_s24 + $0xe8] sm:$0xff]  ;;  %v611_v10 = vpack.c.bf16 %v547_v3, %v543_v0  ;;  %v455_v29 = vld [vmem:[%s6734_s24 + $0x100] sm:$0xff]  ;;  %v458_v0 = vld [vmem:[%s6734_s24 + $0x118] sm:$0xff] }
  0xa3   : > { %v564_v11 = vpack.c.bf16 %v452_v5, %v448_v4  ;;  %v456_v20 = vld [vmem:[%s6734_s24 + $0x108] sm:$0xff]  ;;  %v459_v30 = vld [vmem:[%s6734_s24 + $0x120] sm:$0xff]  ;;  %v462_v1 = vld [vmem:[%s6734_s24 + $0x138] sm:$0xff] }
  0xa4   : > { %6033 = vmatpush3.bf16.msra.mxu1 %v6135_v16  ;;  %5288 = vmatpush3.bf16.msra.mxu0 %v6135_v16  ;;  %v425_v16 = vld [vmem:[%s6734_s24 + $0x10] sm:$0xff]  ;;  %v464_v32 = vld [vmem:[%s6734_s24 + $0x148] sm:$0xff]  ;;  %v567_v36 = vpack.c.bf16 %v459_v30, %v455_v29  ;;  %v6154_v48 = vld [vmem:[#allocation9 + $0x40] sm:$0xff]   ;;  %v570_v7 = vpack.c.bf16 %v462_v1, %v458_v0 }
  0xa5   : > { %6026 = vmatprep.subr.bf16.mxu1 %v6136_v17  ;;  %5289 = vmatprep.subr.bf16.mxu0 %v6136_v17  ;;  %v447_v17 = vld [vmem:[%s6734_s24 + $0xc0] sm:$0xff]  ;;  %v468_v33 = vld [vmem:[%s6734_s24 + $0x168] sm:$0xff]  ;;  %v6160_v2 = vld [vmem:[#allocation9 + $0x58] sm:$0xff]  }
  0xa6   : > { %v572_v38 = vpack.c.bf16 %v468_v33, %v464_v32  ;;  %v6155_v49 = vld [vmem:[#allocation9] sm:$0xff]   ;;  %v6156_v51 = vld [vmem:[#allocation9 + $0x48] sm:$0xff]   ;;  %v6161_v4 = vld [vmem:[#allocation9 + $0x18] sm:$0xff]  }
  0xa7   : > { %v6157_v55 = vld [vmem:[#allocation9 + $0x8] sm:$0xff]   ;;  %v471_v56 = vld [vmem:[%s6734_s24 + $0x180] sm:$0xff]  ;;  %v477_v35 = vld [vmem:[%s6734_s24 + $0x1b0] sm:$0xff] }
  0xa8   : > { %6034 = vmatpush3.bf16.msra.mxu1 %v6137_v18  ;;  %5290 = vmatpush3.bf16.msra.mxu0 %v6137_v18  ;;  %v451_v18 = vld [vmem:[%s6734_s24 + $0xe0] sm:$0xff] }
  0xa9   : > { %5387 = vmatprep.subr.bf16.mxu1 %v6138_v21  ;;  %v460_v21 = vld [vmem:[%s6734_s24 + $0x128] sm:$0xff]  ;;  %5499 = vmatprep.subr.bf16.mxu0 %v6154_v48  ;;  %v479_v8 = vld [vmem:[%s6734_s24 + $0x1c0] sm:$0xff] }
  0xaa   : > { %v495_v32 = vld [vmem:[%s6734_s24 + $0x240] sm:$0xff]  ;;  %v512_v48 = vld [vmem:[%s6734_s24 + $0x2c8] sm:$0xff] }
  0xab   : > { %1000 = vmatmul.mubr.bf16.vlgmr.msra.gmra.mrb[0].mxu1 %v599_v24  ;;  %904 = vmatmul.mubr.bf16.vlgmr.msra.gmra.mrb[0].mxu0 %v551_v42  ;;  %v563_v24 = vpack.c.bf16 %v451_v18, %v447_v17  ;;  %v463_v42 = vld [vmem:[%s6734_s24 + $0x140] sm:$0xff] }
  0xac   : > { %5388 = vmatpush3.bf16.msra.mxu1 %v6139_v25  ;;  %1007 = vmatprep.mubr.bf16.mxu1 %v604_v26  ;;  %v553_v25 = vpack.c.bf16 %v429_v19, %v425_v16  ;;  %v568_v26 = vpack.c.bf16 %v460_v21, %v456_v20  ;;  %v487_v20 = vld [vmem:[%s6734_s24 + $0x200] sm:$0xff] }
  0xad   : > { %5389 = vmatprep.subr.bf16.mxu1 %v6140_v27  ;;  %911 = vmatprep.mubr.bf16.mxu0 %v556_v47  ;;  %v558_v27 = vpack.c.bf16 %v438_v23, %v434_v22  ;;  %v476_v47 = vld [vmem:[%s6734_s24 + $0x1a8] sm:$0xff]  ;;  %v491_v21 = vld [vmem:[%s6734_s24 + $0x220] sm:$0xff]  ;;  %v465_v22 = vld [vmem:[%s6734_s24 + $0x150] sm:$0xff] }
  0xae   : > { %5500 = vmatpush3.bf16.msra.mxu0 %v6155_v49  ;;  %v469_v23 = vld [vmem:[%s6734_s24 + $0x170] sm:$0xff]  ;;  %v499_v33 = vld [vmem:[%s6734_s24 + $0x260] sm:$0xff]  ;;  %v516_v49 = vld [vmem:[%s6734_s24 + $0x2e8] sm:$0xff] }
  0xaf   : > { %5501 = vmatprep.subr.bf16.mxu0 %v6156_v51  ;;  %v573_v29 = vpack.c.bf16 %v469_v23, %v465_v22  ;;  %v494_v51 = vld [vmem:[%s6734_s24 + $0x238] sm:$0xff]  ;;  %v6171_v22 = vld [vmem:[#allocation9 + $0x88] sm:$0xff]   ;;  %v513_v23 = vld [vmem:[%s6734_s24 + $0x2d0] sm:$0xff] }
  0xb0   : > { %5390 = vmatpush3.bf16.msra.mxu1 %v6141_v28  ;;  %v433_v28 = vld [vmem:[%s6734_s24 + $0x50] sm:$0xff] }
  0xb1   : > { %5391 = vmatprep.subr.bf16.mxu1 %v6142_v31  ;;  %v437_v31 = vld [vmem:[%s6734_s24 + $0x70] sm:$0xff] }
  0xb2   : > { %5502 = vmatpush3.bf16.msra.mxu0 %v6157_v55 }
  0xb3   : > { %1008 = vmatmul.mubr.bf16.gmra.mrb[4].mxu1 %v603_v37  ;;  %912 = vmatmul.mubr.bf16.gmra.mrb[4].mxu0 %v555_v57  ;;  %v557_v37 = vpack.c.bf16 %v437_v31, %v433_v28  ;;  %v475_v57 = vld [vmem:[%s6734_s24 + $0x1a0] sm:$0xff]  ;;  %v583_v28 = vpack.c.bf16 %v491_v21, %v487_v20  ;;  %v6168_v20 = vld [vmem:[#allocation9 + $0x30] sm:$0xff]   ;;  %v6170_v21 = vld [vmem:[#allocation9 + $0xc8] sm:$0xff]  }
  0xb4   : > { %5392 = vmatpush3.bf16.msra.mxu1 %v6143_v40  ;;  %1015 = vmatprep.mubr.bf16.mxu1 %v608_v41  ;;  %v441_v40 = vld [vmem:[%s6734_s24 + $0x90] sm:$0xff]  ;;  %v575_v3 = vpack.c.bf16 %v475_v57, %v471_v56  ;;  %v6162_v56 = vld [vmem:[#allocation9 + $0x60] sm:$0xff]  }
  0xb5   : > { %5393 = vmatprep.subr.bf16.mxu1 %v6144_v43  ;;  %919 = vmatprep.mubr.bf16.mxu0 %v560_v59  ;;  %v445_v41 = vld [vmem:[%s6734_s24 + $0xb0] sm:$0xff]  ;;  %v467_v43 = vld [vmem:[%s6734_s24 + $0x160] sm:$0xff] }
  0xb6   : > { %v571_v50 = vpack.c.bf16 %v467_v43, %v463_v42  ;;  %v561_v52 = vpack.c.bf16 %v445_v41, %v441_v40  ;;  %v449_v59 = vld [vmem:[%s6734_s24 + $0xd0] sm:$0xff]  ;;  %v587_v40 = vpack.c.bf16 %v499_v33, %v495_v32  ;;  %v577_v41 = vpack.c.bf16 %v477_v35, %v473_v34  ;;  %v6163_v57 = vld [vmem:[#allocation9 + $0x20] sm:$0xff]   ;;  %v6175_v32 = vld [vmem:[#allocation9 + $0xd8] sm:$0xff]  }
  0xb7   : > { %v6177_v33 = vld [vmem:[#allocation9 + $0x98] sm:$0xff]   ;;  %v521_v34 = vld [vmem:[%s6734_s24 + $0x310] sm:$0xff] }
  0xb8   : > { %5394 = vmatpush3.bf16.msra.mxu1 %v6145_v46  ;;  %v472_v46 = vld [vmem:[%s6734_s24 + $0x188] sm:$0xff]  ;;  %v525_v35 = vld [vmem:[%s6734_s24 + $0x330] sm:$0xff] }
  0xb9   : > { %5395 = vmatprep.subr.bf16.mxu1 %v6146_v54  ;;  %v576_v53 = vpack.c.bf16 %v476_v47, %v472_v46  ;;  %v566_v54 = vpack.c.bf16 %v454_v45, %v450_v44  ;;  %v503_v44 = vld [vmem:[%s6734_s24 + $0x280] sm:$0xff]  ;;  %v481_v46 = vld [vmem:[%s6734_s24 + $0x1d0] sm:$0xff] }
  0xba   : > { %v507_v45 = vld [vmem:[%s6734_s24 + $0x2a0] sm:$0xff]  ;;  %v485_v47 = vld [vmem:[%s6734_s24 + $0x1f0] sm:$0xff] }
  0xbb   : > { %1016 = vmatmul.mubr.bf16.gmra.mrb[8].mxu1 %v607_v58  ;;  %920 = vmatmul.mubr.bf16.gmra.mrb[8].mxu0 %v559_v9  ;;  %v6158_v58 = vld [vmem:[#allocation9 + $0x50] sm:$0xff]   ;;  %v483_v9 = vld [vmem:[%s6734_s24 + $0x1e0] sm:$0xff] }
  0xbc   : > { %5396 = vmatpush3.bf16.msra.mxu1 %v6147_v60  ;;  %1023 = vmatprep.mubr.bf16.mxu1 %v612_v61  ;;  %v453_v60 = vld [vmem:[%s6734_s24 + $0xf0] sm:$0xff]  ;;  %v480_v61 = vld [vmem:[%s6734_s24 + $0x1c8] sm:$0xff]  ;;  %v579_v16 = vpack.c.bf16 %v483_v9, %v479_v8  ;;  %v510_v8 = vld [vmem:[%s6734_s24 + $0x2b8] sm:$0xff] }
  0xbd   : > { %5397 = vmatprep.subr.bf16.mxu1 %v6148_v62  ;;  %927 = vmatprep.mubr.bf16.mxu0 %v564_v11  ;;  %v484_v62 = vld [vmem:[%s6734_s24 + $0x1e8] sm:$0xff]  ;;  %v565_v5 = vpack.c.bf16 %v453_v60, %v449_v59  ;;  %v461_v11 = vld [vmem:[%s6734_s24 + $0x130] sm:$0xff]  ;;  %v515_v59 = vld [vmem:[%s6734_s24 + $0x2e0] sm:$0xff] }
  0xbe   : > { %5503 = vmatprep.subr.bf16.mxu0 %v6158_v58  ;;  %v511_v58 = vld [vmem:[%s6734_s24 + $0x2c0] sm:$0xff]  ;;  %v489_v60 = vld [vmem:[%s6734_s24 + $0x210] sm:$0xff] }
  0xbf   : > { %v595_v0 = vpack.c.bf16 %v515_v59, %v511_v58  ;;  %v6186_v59 = vld [vmem:[#allocation9 + $0xf8] sm:$0xff]  }
  0xc0   : > { %5398 = vmatpush3.bf16.msra.mxu1 %v6149_v63  ;;  %v6159_v63 = vld [vmem:[#allocation9 + $0x10] sm:$0xff]  }
  0xc1   : > { %5399 = vmatprep.subr.bf16.mxu1 %v6150_v6  ;;  %v580_v6 = vpack.c.bf16 %v484_v62, %v480_v61  ;;  %5504 = vmatpush3.bf16.msra.mxu0 %v6159_v63  ;;  %v493_v61 = vld [vmem:[%s6734_s24 + $0x230] sm:$0xff]  ;;  %v498_v62 = vld [vmem:[%s6734_s24 + $0x258] sm:$0xff] }
  0xc2   : > { %5505 = vmatprep.subr.bf16.mxu0 %v6160_v2  ;;  %v502_v63 = vld [vmem:[%s6734_s24 + $0x278] sm:$0xff]  ;;  %v585_v1 = vpack.c.bf16 %v493_v61, %v489_v60  ;;  %v537_v61 = vld [vmem:[%s6734_s24 + $0x390] sm:$0xff] }
  0xc3   : > { %1024 = vmatmul.mubr.bf16.gmra.mrb[12].mxu1 %v611_v10  ;;  %928 = vmatmul.mubr.bf16.gmra.mrb[12].mxu0 %v563_v24  ;;  %v457_v10 = vld [vmem:[%s6734_s24 + $0x110] sm:$0xff]  ;;  %v496_v24 = vld [vmem:[%s6734_s24 + $0x248] sm:$0xff]  ;;  %v590_v2 = vpack.c.bf16 %v502_v63, %v498_v62  ;;  %v6187_v60 = vld [vmem:[#allocation9 + $0xb8] sm:$0xff]  }
  0xc4   : > { %5400 = vmatpush3.bf16.msra.mxu1 %v6151_v12  ;;  %1064 = vmatprep.mubr.bf16.mxu1 %v554_v13  ;;  %v488_v12 = vld [vmem:[%s6734_s24 + $0x208] sm:$0xff]  ;;  %v569_v17 = vpack.c.bf16 %v461_v11, %v457_v10  ;;  %v505_v11 = vld [vmem:[%s6734_s24 + $0x290] sm:$0xff]  ;;  %v546_v63 = vld [vmem:[%s6734_s24 + $0x3d8] sm:$0xff] }
  0xc5   : > { %5401 = vmatprep.subr.bf16.mxu1 %v6152_v14  ;;  %935 = vmatprep.mubr.bf16.mxu0 %v568_v26  ;;  %v492_v13 = vld [vmem:[%s6734_s24 + $0x228] sm:$0xff]  ;;  %v466_v14 = vld [vmem:[%s6734_s24 + $0x158] sm:$0xff]  ;;  %v541_v62 = vld [vmem:[%s6734_s24 + $0x3b0] sm:$0xff] }
  0xc6   : > { %5506 = vmatpush3.bf16.msra.mxu0 %v6161_v4  ;;  %v584_v18 = vpack.c.bf16 %v492_v13, %v488_v12  ;;  %v474_v26 = vld [vmem:[%s6734_s24 + $0x198] sm:$0xff]  ;;  %v501_v4 = vld [vmem:[%s6734_s24 + $0x270] sm:$0xff] }
  0xc7   : > { %5507 = vmatprep.subr.bf16.mxu0 %v6162_v56  ;;  %v509_v12 = vld [vmem:[%s6734_s24 + $0x2b0] sm:$0xff]  ;;  %v514_v13 = vld [vmem:[%s6734_s24 + $0x2d8] sm:$0xff] }
  0xc8   : > { %5402 = vmatpush3.bf16.msra.mxu1 %v6153_v15  ;;  %v470_v15 = vld [vmem:[%s6734_s24 + $0x178] sm:$0xff]  ;;  %v6184_v56 = vld [vmem:[#allocation9 + $0xb0] sm:$0xff]  }
  0xc9   : > { %v574_v19 = vpack.c.bf16 %v470_v15, %v466_v14  ;;  %v518_v14 = vld [vmem:[%s6734_s24 + $0x2f8] sm:$0xff]  ;;  %v6167_v15 = vld [vmem:[#allocation9 + $0xc0] sm:$0xff]  }
  0xca   : > { %5508 = vmatpush3.bf16.msra.mxu0 %v6163_v57  ;;  %5611 = vmatprep.subr.bf16.mxu1 %v6167_v15  ;;  %v6195_v15 = vld [vmem:[#allocation9 + $0x120] sm:$0xff]  }
  0xcb   : > { %1065 = vmatmul.mubr.bf16.vlgmr.msra.gmra.mrb[16].mxu1 %v553_v25  ;;  %936 = vmatmul.mubr.bf16.gmra.mrb[16].mxu0 %v567_v36  ;;  %v500_v25 = vld [vmem:[%s6734_s24 + $0x268] sm:$0xff] }
  0xcc   : > { %1072 = vmatprep.mubr.bf16.mxu1 %v558_v27  ;;  %943 = vmatprep.mubr.bf16.mxu0 %v572_v38  ;;  %v478_v27 = vld [vmem:[%s6734_s24 + $0x1b8] sm:$0xff]  ;;  %v588_v30 = vpack.c.bf16 %v500_v25, %v496_v24  ;;  %v504_v36 = vld [vmem:[%s6734_s24 + $0x288] sm:$0xff]  ;;  %v517_v24 = vld [vmem:[%s6734_s24 + $0x2f0] sm:$0xff] }
  0xcd   : > { %v578_v31 = vpack.c.bf16 %v478_v27, %v474_v26  ;;  %v482_v38 = vld [vmem:[%s6734_s24 + $0x1d8] sm:$0xff]  ;;  %v6172_v27 = vld [vmem:[#allocation9 + $0xd0] sm:$0xff]  }
  0xce   : > { %v522_v25 = vld [vmem:[%s6734_s24 + $0x318] sm:$0xff] }
  0xcf   : > { %v526_v26 = vld [vmem:[%s6734_s24 + $0x338] sm:$0xff] }
  0xd3   : > { %1073 = vmatmul.mubr.bf16.gmra.mrb[20].mxu1 %v557_v37  ;;  %944 = vmatmul.mubr.bf16.gmra.mrb[20].mxu0 %v571_v50  ;;  %v508_v37 = vld [vmem:[%s6734_s24 + $0x2a8] sm:$0xff]  ;;  %v490_v50 = vld [vmem:[%s6734_s24 + $0x218] sm:$0xff] }
  0xd4   : > { %1080 = vmatprep.mubr.bf16.mxu1 %v562_v39  ;;  %951 = vmatprep.mubr.bf16.mxu0 %v576_v53  ;;  %v486_v39 = vld [vmem:[%s6734_s24 + $0x1f8] sm:$0xff]  ;;  %v592_v42 = vpack.c.bf16 %v508_v37, %v504_v36  ;;  %v581_v53 = vpack.c.bf16 %v485_v47, %v481_v46  ;;  %v586_v55 = vpack.c.bf16 %v494_v51, %v490_v50  ;;  %v6181_v50 = vld [vmem:[#allocation9 + $0xa8] sm:$0xff]   ;;  %v529_v51 = vld [vmem:[%s6734_s24 + $0x350] sm:$0xff] }
  0xd5   : > { %v582_v43 = vpack.c.bf16 %v486_v39, %v482_v38  ;;  %v530_v36 = vld [vmem:[%s6734_s24 + $0x358] sm:$0xff]  ;;  %v6178_v39 = vld [vmem:[#allocation9 + $0xe0] sm:$0xff]  }
  0xd6   : > { %v534_v37 = vld [vmem:[%s6734_s24 + $0x378] sm:$0xff] }
  0xd7   : > { %v6174_v38 = vld [vmem:[#allocation9 + $0x78] sm:$0xff]  }
  0xdb   : > { %1081 = vmatmul.mubr.bf16.gmra.mrb[24].mxu1 %v561_v52  ;;  %952 = vmatmul.mubr.bf16.gmra.mrb[24].mxu0 %v575_v3  ;;  %v591_v52 = vpack.c.bf16 %v507_v45, %v503_v44  ;;  %v497_v3 = vld [vmem:[%s6734_s24 + $0x250] sm:$0xff]  ;;  %v606_v45 = vpack.c.bf16 %v534_v37, %v530_v36 }
  0xdc   : > { %1088 = vmatprep.mubr.bf16.mxu1 %v566_v54  ;;  %959 = vmatprep.mubr.bf16.mxu0 %v580_v6  ;;  %v596_v54 = vpack.c.bf16 %v516_v49, %v512_v48  ;;  %v6165_v6 = vld [vmem:[#allocation9 + $0x28] sm:$0xff]   ;;  %v589_v9 = vpack.c.bf16 %v501_v4, %v497_v3  ;;  %v6183_v3 = vld [vmem:[#allocation9 + $0x140] sm:$0xff]  }
  0xdd   : > { %v6180_v48 = vld [vmem:[#allocation9 + $0xe8] sm:$0xff]   ;;  %v6185_v4 = vld [vmem:[#allocation9 + $0x100] sm:$0xff]  }
  0xe3   : > { %1089 = vmatmul.mubr.bf16.gmra.mrb[28].mxu1 %v565_v5  ;;  %960 = vmatmul.mubr.bf16.gmra.mrb[28].mxu0 %v579_v16  ;;  %v6164_v5 = vld [vmem:[#allocation9 + $0x68] sm:$0xff]   ;;  %v6169_v16 = vld [vmem:[#allocation9 + $0x80] sm:$0xff]  }
  0xe4   : > { %1096 = vmatprep.mubr.bf16.mxu1 %v570_v7  ;;  %967 = vmatprep.mubr.bf16.mxu0 %v584_v18  ;;  %v506_v7 = vld [vmem:[%s6734_s24 + $0x298] sm:$0xff]  ;;  %v598_v18 = vpack.c.bf16 %v518_v14, %v514_v13  ;;  %v6194_v14 = vld [vmem:[#allocation9 + $0x160] sm:$0xff]  }
  0xe5   : > { %5509 = vmatprep.subr.bf16.mxu0 %v6164_v5  ;;  %v594_v10 = vpack.c.bf16 %v510_v8, %v506_v7  ;;  %5612 = vmatpush3.bf16.msra.mxu1 %v6169_v16  ;;  %v545_v5 = vld [vmem:[%s6734_s24 + $0x3d0] sm:$0xff]  ;;  %v6188_v8 = vld [vmem:[#allocation9 + $0x148] sm:$0xff]   ;;  %v6193_v13 = vld [vmem:[#allocation9 + $0x118] sm:$0xff]  }
  0xe6   : > { %5510 = vmatpush3.bf16.msra.mxu0 %v6165_v6  ;;  %5613 = vmatprep.subr.bf16.mxu1 %v6170_v21  ;;  %v549_v6 = vld [vmem:[%s6734_s24 + $0x3f0] sm:$0xff] }
  0xe7   : > { %v613_v7 = vpack.c.bf16 %v549_v6, %v545_v5 }
  0xe9   : > { %5614 = vmatpush3.bf16.msra.mxu1 %v6171_v22 }
  0xea   : > { %5615 = vmatprep.subr.bf16.mxu1 %v6172_v27 }
  0xeb   : > { %1097 = vmatmul.mubr.bf16.gmra.mrb[32].mxu1 %v569_v17  ;;  %968 = vmatmul.mubr.bf16.gmra.mrb[32].mxu0 %v583_v28  ;;  %v593_v17 = vpack.c.bf16 %v509_v12, %v505_v11  ;;  %v6173_v28 = vld [vmem:[#allocation9 + $0x90] sm:$0xff]   ;;  %v6192_v12 = vld [vmem:[#allocation9 + $0x158] sm:$0xff]  }
  0xec   : > { %1104 = vmatprep.mubr.bf16.mxu1 %v574_v19  ;;  %975 = vmatprep.mubr.bf16.mxu0 %v588_v30  ;;  %v6166_v19 = vld [vmem:[#allocation9 + $0x70] sm:$0xff]   ;;  %v602_v30 = vpack.c.bf16 %v526_v26, %v522_v25 }
  0xed   : > { %5511 = vmatprep.subr.bf16.mxu0 %v6166_v19  ;;  %5616 = vmatpush3.bf16.msra.mxu1 %v6173_v28  ;;  %v6191_v11 = vld [vmem:[#allocation9 + $0x110] sm:$0xff]  }
  0xee   : > { %5512 = vmatpush3.bf16.msra.mxu0 %v6168_v20  ;;  %5617 = vmatprep.subr.bf16.mxu1 %v6175_v32 }
  0xef   : > { %5513 = vmatprep.subr.bf16.mxu0 %v6174_v38 }
  0xf1   : > { %5618 = vmatpush3.bf16.msra.mxu1 %v6177_v33 }
  0xf2   : > { %5619 = vmatprep.subr.bf16.mxu1 %v6178_v39 }
  0xf3   : > { %1105 = vmatmul.mubr.bf16.gmra.mrb[36].mxu1 %v573_v29  ;;  %976 = vmatmul.mubr.bf16.gmra.mrb[36].mxu0 %v587_v40  ;;  %v597_v29 = vpack.c.bf16 %v517_v24, %v513_v23  ;;  %v6176_v40 = vld [vmem:[#allocation9 + $0x38] sm:$0xff]  }
  0xf4   : > { %1112 = vmatprep.mubr.bf16.mxu1 %v578_v31  ;;  %983 = vmatprep.mubr.bf16.mxu0 %v592_v42  ;;  %v6475_v31 = vmov 0.0   ;;  %v601_v42 = vpack.c.bf16 %v525_v35, %v521_v34  ;;  %v6196_v34 = vld [vmem:[#allocation9 + $0x168] sm:$0xff]  }
  0xf5   : > { %1303 = vst [vmem:[#allocation2] sm:$0xff] %v6475_v31  ;;  %1304 = vst [vmem:[#allocation2 + $0x8] sm:$0xff] %v6475_v31  ;;  %5514 = vmatpush3.bf16.msra.mxu0 %v6176_v40  ;;  %v6197_v35 = vld [vmem:[#allocation9 + $0x128] sm:$0xff]  }
  0xf6   : > { %1305 = vst [vmem:[#allocation2 + $0x10] sm:$0x3] %v6475_v31  ;;  %1307 = vst [vmem:[#allocation2 + $0x198] sm:$0xff] %v6475_v31  ;;  %5723 = vmatprep.subr.bf16.mxu0 %v6183_v3 }
  0xf7   : > { %1308 = vst [vmem:[#allocation2 + $0x1a0] sm:$0xff] %v6475_v31  ;;  %1309 = vst [vmem:[#allocation2 + $0x1a8] sm:$0x3] %v6475_v31 }
  0xf8   : > { %1311 = vst [vmem:[#allocation2 + $0x18] sm:$0x1] %v6475_v31  ;;  %1312 = vst [vmem:[#allocation2 + $0x30] sm:$0x1] %v6475_v31 }
  0xf9   : > { %1313 = vst [vmem:[#allocation2 + $0x48] sm:$0x1] %v6475_v31  ;;  %1314 = vst [vmem:[#allocation2 + $0x60] sm:$0x1] %v6475_v31 }
  0xfa   : > { %1315 = vst [vmem:[#allocation2 + $0x78] sm:$0x1] %v6475_v31  ;;  %1316 = vst [vmem:[#allocation2 + $0x90] sm:$0x1] %v6475_v31 }
  0xfb   : > { %1113 = vmatmul.mubr.bf16.gmra.mrb[40].mxu1 %v577_v41  ;;  %984 = vmatmul.mubr.bf16.gmra.mrb[40].mxu0 %v591_v52  ;;  %1317 = vst [vmem:[#allocation2 + $0xa8] sm:$0x1] %v6475_v31  ;;  %1318 = vst [vmem:[#allocation2 + $0xc0] sm:$0x1] %v6475_v31  ;;  %v6179_v41 = vld [vmem:[#allocation9 + $0xa0] sm:$0xff]   ;;  %v533_v52 = vld [vmem:[%s6734_s24 + $0x370] sm:$0xff] }
  0xfc   : > { %1120 = vmatprep.mubr.bf16.mxu1 %v582_v43  ;;  %991 = vmatprep.mubr.bf16.mxu0 %v596_v54  ;;  %1319 = vst [vmem:[#allocation2 + $0xd8] sm:$0x1] %v6475_v31  ;;  %1320 = vst [vmem:[#allocation2 + $0xf0] sm:$0x1] %v6475_v31  ;;  %v1443_v43 = vld [vmem:[#allocation2 + $0x1] sm:$0xff]  ;;  %v605_v57 = vpack.c.bf16 %v533_v52, %v529_v51  ;;  %v6200_v51 = vld [vmem:[#allocation9 + $0x1c0] sm:$0xff]  }
  0xfd   : > { %1321 = vst [vmem:[#allocation2 + $0x108] sm:$0x1] %v6475_v31  ;;  %1322 = vst [vmem:[#allocation2 + $0x120] sm:$0x1] %v6475_v31  ;;  %v1444_v44 = vld [vmem:[#allocation2 + $0x9] sm:$0xff]  ;;  %5620 = vmatpush3.bf16.msra.mxu1 %v6179_v41 }
  0xfe   : > { %1323 = vst [vmem:[#allocation2 + $0x138] sm:$0x1] %v6475_v31  ;;  %1324 = vst [vmem:[#allocation2 + $0x150] sm:$0x1] %v6475_v31  ;;  %v1475_v46 = vpack.c.bf16 %v1444_v44, %v1443_v43  ;;  %5621 = vmatprep.subr.bf16.mxu1 %v6180_v48  ;;  %v542_v54 = vld [vmem:[%s6734_s24 + $0x3b8] sm:$0xff] }
  0xff   : > { %1325 = vst [vmem:[#allocation2 + $0x168] sm:$0x1] %v6475_v31  ;;  %1326 = vst [vmem:[#allocation2 + $0x180] sm:$0x1] %v6475_v31 }
 0x100   : > { %1329 = vst [vmem:[#allocation2 + $0x29] sm:$0x1] %v6475_v31  ;;  %1330 = vst [vmem:[#allocation2 + $0x41] sm:$0x1] %v6475_v31 }
 0x101   : > { %1331 = vst [vmem:[#allocation2 + $0x59] sm:$0x1] %v6475_v31  ;;  %1332 = vst [vmem:[#allocation2 + $0x71] sm:$0x1] %v6475_v31  ;;  %5622 = vmatpush3.bf16.msra.mxu1 %v6181_v50 }
 0x102   : > { %1333 = vst [vmem:[#allocation2 + $0x89] sm:$0x1] %v6475_v31  ;;  %1334 = vst [vmem:[#allocation2 + $0xa1] sm:$0x1] %v6475_v31 }
 0x103   : > { %1121 = vmatmul.mubr.bf16.gmra.mrb[44].mxu1 %v581_v53  ;;  %992 = vmatmul.mubr.bf16.gmra.mrb[44].mxu0 %v595_v0  ;;  %1335 = vst [vmem:[#allocation2 + $0xb9] sm:$0x1] %v6475_v31  ;;  %1336 = vst [vmem:[#allocation2 + $0xd1] sm:$0x1] %v6475_v31  ;;  %v538_v53 = vld [vmem:[%s6734_s24 + $0x398] sm:$0xff] }
 0x104   : > { %1128 = vmatprep.mubr.bf16.mxu1 %v586_v55  ;;  %1337 = vst [vmem:[#allocation2 + $0xe9] sm:$0x1] %v6475_v31  ;;  %1338 = vst [vmem:[#allocation2 + $0x101] sm:$0x1] %v6475_v31  ;;  %2708 = vmatprep.mubr.bf16.mxu0 %v1475_v46  ;;  %v6182_v55 = vld [vmem:[#allocation9 + $0xf0] sm:$0xff]   ;;  %v610_v58 = vpack.c.bf16 %v542_v54, %v538_v53  ;;  %v550_v0 = vld [vmem:[%s6734_s24 + $0x3f8] sm:$0xff] }
 0x105   : > { %1339 = vst [vmem:[#allocation2 + $0x119] sm:$0x1] %v6475_v31  ;;  %1340 = vst [vmem:[#allocation2 + $0x131] sm:$0x1] %v6475_v31  ;;  %5623 = vmatprep.subr.bf16.mxu1 %v6182_v55 }
 0x106   : > { %1341 = vst [vmem:[#allocation2 + $0x149] sm:$0x1] %v6475_v31  ;;  %1342 = vst [vmem:[#allocation2 + $0x161] sm:$0x1] %v6475_v31  ;;  %5624 = vmatpush3.bf16.msra.mxu1 %v6184_v56 }
 0x107   : > { %1343 = vst [vmem:[#allocation2 + $0x179] sm:$0x1] %v6475_v31  ;;  %1344 = vst [vmem:[#allocation2 + $0x191] sm:$0x1] %v6475_v31  ;;  %5625 = vmatprep.subr.bf16.mxu1 %v6186_v59 }
 0x108   : > { %1310 = vst [vmem:[#allocation2] sm:$0x1] %v6475_v31  ;;  %1328 = vst [vmem:[#allocation2 + $0x11] sm:$0x1] %v6475_v31 }
 0x109   : > { %1327 = vst [vmem:[#allocation2 + $0x198] sm:$0x1] %v6475_v31  ;;  %1345 = vst [vmem:[#allocation2 + $0x1a9] sm:$0x1] %v6475_v31 }
 0x10a   : > { %5626 = vmatpush3.bf16.msra.mxu1 %v6187_v60 }
 0x10b   : > { %1129 = vmatmul.mubr.bf16.gmra.mrb[48].mxu1 %v585_v1  ;;  %v609_v1 = vpack.c.bf16 %v541_v62, %v537_v61  ;;  %5835 = vmatprep.subr.bf16.mxu1 %v6200_v51  ;;  %v6198_v61 = vld [vmem:[#allocation9 + $0x170] sm:$0xff]  }
 0x10c   : > { %1136 = vmatprep.mubr.bf16.mxu1 %v590_v2  ;;  %v614_v2 = vpack.c.bf16 %v550_v0, %v546_v63  ;;  %v6199_v62 = vld [vmem:[#allocation9 + $0x130] sm:$0xff]  }
 0x10f   : > { %v1379_v47 = vld [vmem:[#allocation2] sm:$0xff] }
 0x110   : > { %v1411_v49 = vpack.c.bf16 %v6475_v31, %v1379_v47 }
 0x112   : > { %2709 = vmatmul.mubr.bf16.vlgmr.msra.gmra.mrb[48].mxu0 %v1411_v49 }
 0x113   : > { %1137 = vmatmul.mubr.bf16.gmra.mrb[52].mxu1 %v589_v9  ;;  %5724 = vmatpush3.bf16.msra.mxu0 %v6185_v4  ;;  %v6189_v9 = vld [vmem:[#allocation9 + $0x108] sm:$0xff]  }
 0x114   : > { %1144 = vmatprep.mubr.bf16.mxu1 %v594_v10  ;;  %5725 = vmatprep.subr.bf16.mxu0 %v6188_v8  ;;  %v6190_v10 = vld [vmem:[#allocation9 + $0x150] sm:$0xff]  }
 0x115   : > { %v6946_v8 = vld [vmem:[%s8144_s4] ss:$0 sm:$0xff] }
 0x117   : > { %5726 = vmatpush3.bf16.msra.mxu0 %v6189_v9 }
 0x118   : > { %5727 = vmatprep.subr.bf16.mxu0 %v6190_v10 }
 0x11b   : > { %1145 = vmatmul.mubr.bf16.gmra.mrb[56].mxu1 %v593_v17  ;;  %5728 = vmatpush3.bf16.msra.mxu0 %v6191_v11 }
 0x11c   : > { %1152 = vmatprep.mubr.bf16.mxu1 %v598_v18  ;;  %5729 = vmatprep.subr.bf16.mxu0 %v6192_v12 }
 0x11f   : > { %5730 = vmatpush3.bf16.msra.mxu0 %v6193_v13  ;;  %v6953_v13 = vld [vmem:[%s8145_s5] ss:$0 sm:$0xff] }
 0x120   : > { %5731 = vmatprep.subr.bf16.mxu0 %v6194_v14 }
 0x123   : > { %1153 = vmatmul.mubr.bf16.gmra.mrb[60].mxu1 %v597_v29  ;;  %5732 = vmatpush3.bf16.msra.mxu0 %v6195_v15 }
 0x124   : > { %1160 = vmatprep.mubr.bf16.mxu1 %v602_v30  ;;  %5733 = vmatprep.subr.bf16.mxu0 %v6196_v34 }
 0x127   : > { %5734 = vmatpush3.bf16.msra.mxu0 %v6197_v35 }
 0x128   : > { %5735 = vmatprep.subr.bf16.mxu0 %v6198_v61 }
 0x12b   : > { %1161 = vmatmul.mubr.bf16.gmra.mrb[64].mxu1 %v601_v42  ;;  %5736 = vmatpush3.bf16.msra.mxu0 %v6199_v62  ;;  %v1507_v62 = vld [vmem:[#allocation2 + $0x2] sm:$0xff] }
 0x12c   : > { %1168 = vmatprep.mubr.bf16.mxu1 %v606_v45 }
 0x133   : > { %1169 = vmatmul.mubr.bf16.gmra.mrb[68].mxu1 %v605_v57 }
 0x134   : > { %1176 = vmatprep.mubr.bf16.mxu1 %v610_v58 }
 0x13b   : > { %1177 = vmatmul.mubr.bf16.gmra.mrb[72].mxu1 %v609_v1 }
 0x13c   : > { %1184 = vmatprep.mubr.bf16.mxu1 %v614_v2 }
 0x143   : > { %1185 = vmatmul.mubr.bf16.gmra.mrb[76].mxu1 %v613_v7 }
 0x17e   : > { %v5363_v16 = vpop.f32.mrb[0].mxu1  ;;  %v5291_v22 = vpop.f32.mrb[0].mxu0 }
 0x17f   : > { %v5364_v17 = vpop.f32.mrb[1].mxu1  ;;  %v5292_v24 = vpop.f32.mrb[1].mxu0 }
 0x180   : > { %v6919_v18 = vadd.f32 %v5364_v17, %v5363_v16  ;;  %v5366_v19 = vpop.f32.mrb[2].mxu1  ;;  %v5293_v26 = vadd.f32 %v5292_v24, %v5291_v22  ;;  %v5294_v27 = vpop.f32.mrb[2].mxu0  ;;  %v6204_v16 = vld [vmem:[#allocation9 + $0x178] sm:$0xff]  }
 0x181   : > { %v5367_v20 = vpop.f32.mrb[3].mxu1  ;;  %v5295_v30 = vpop.f32.mrb[3].mxu0  ;;  %v6206_v17 = vld [vmem:[#allocation9 + $0x138] sm:$0xff]   ;;  %5737 = vmatprep.subr.bf16.mxu0 %v6204_v16 }
 0x182   : > { %v6921_v21 = vadd.f32 %v5367_v20, %v5366_v19  ;;  %v5296_v32 = vadd.f32 %v5295_v30, %v5294_v27  ;;  %5738 = vmatpush3.bf16.msra.mxu0 %v6206_v17  ;;  %v6201_v17 = vld [vmem:[#allocation9 + $0x180] sm:$0xff]  }
 0x186   : > { %v5369_v23 = vpop.f32.mrb[4].mxu1  ;;  %v5297_v36 = vpop.f32.mrb[4].mxu0 }
 0x187   : > { %v5370_v25 = vpop.f32.mrb[5].mxu1  ;;  %v5298_v38 = vpop.f32.mrb[5].mxu0 }
 0x188   : > { %v6923_v28 = vadd.f32 %v5370_v25, %v5369_v23  ;;  %v5372_v29 = vpop.f32.mrb[6].mxu1  ;;  %v6927_v40 = vadd.f32 %v5298_v38, %v5297_v36  ;;  %v5300_v41 = vpop.f32.mrb[6].mxu0 }
 0x189   : > { %v5373_v31 = vpop.f32.mrb[7].mxu1  ;;  %v5301_v44 = vpop.f32.mrb[7].mxu0 }
 0x18a   : > { %v6925_v33 = vadd.f32 %v5373_v31, %v5372_v29  ;;  %v5302_v46 = vadd.f32 %v5301_v44, %v5300_v41 }
 0x18e   : > { %v5375_v37 = vpop.f32.mrb[8].mxu1  ;;  %v5303_v48 = vpop.f32.mrb[8].mxu0 }
 0x18f   : > { %v5376_v39 = vpop.f32.mrb[9].mxu1  ;;  %v5304_v50 = vpop.f32.mrb[9].mxu0 }
 0x190   : > { %v6929_v42 = vadd.f32 %v5376_v39, %v5375_v37  ;;  %v5378_v43 = vpop.f32.mrb[10].mxu1  ;;  %v6933_v53 = vadd.f32 %v5304_v50, %v5303_v48  ;;  %v5306_v54 = vpop.f32.mrb[10].mxu0 }
 0x191   : > { %v5379_v45 = vpop.f32.mrb[11].mxu1  ;;  %v5307_v57 = vpop.f32.mrb[11].mxu0 }
 0x192   : > { %v6931_v47 = vadd.f32 %v5379_v45, %v5378_v43  ;;  %v6937_v59 = vadd.f32 %v5307_v57, %v5306_v54  ;;  %v6969_v57 = vld [vmem:[#allocation9 + $0x200] sm:$0xff]  }
 0x193   : > { %5971 = vmatprep.subr.bf16.mxu0 %v6969_v57 }
 0x196   : > { %v5381_v49 = vpop.f32.mrb[12].mxu1  ;;  %v5309_v63 = vpop.f32.mrb[12].mxu0 }
 0x197   : > { %v5382_v52 = vpop.f32.mrb[13].mxu1  ;;  %v5310_v1 = vpop.f32.mrb[13].mxu0 }
 0x198   : > { %v6935_v55 = vadd.f32 %v5382_v52, %v5381_v49  ;;  %v5384_v56 = vpop.f32.mrb[14].mxu1  ;;  %v6941_v3 = vadd.f32 %v5310_v1, %v5309_v63  ;;  %v5312_v4 = vpop.f32.mrb[14].mxu0  ;;  %v1508_v63 = vld [vmem:[#allocation2 + $0xa] sm:$0xff] }
 0x199   : > { %v5385_v58 = vpop.f32.mrb[15].mxu1  ;;  %v5313_v7 = vpop.f32.mrb[15].mxu0 }
 0x19a   : > { %v6939_v60 = vadd.f32 %v5385_v58, %v5384_v56  ;;  %v6948_v10 = vadd.f32 %v5313_v7, %v5312_v4 }
 0x19e   : > { %v5403_v0 = vpop.f32.mrb[16].mxu1  ;;  %v5315_v19 = vpop.f32.mrb[16].mxu0 }
 0x19f   : > { %v5404_v2 = vpop.f32.mrb[17].mxu1  ;;  %v5316_v24 = vpop.f32.mrb[17].mxu0 }
 0x1a0   : > { %v5405_v5 = vadd.f32 %v5404_v2, %v5403_v0  ;;  %v5406_v6 = vpop.f32.mrb[18].mxu1  ;;  %v5318_v27 = vpop.f32.mrb[18].mxu0 }
 0x1a1   : > { %v5407_v9 = vpop.f32.mrb[19].mxu1  ;;  %v5319_v34 = vpop.f32.mrb[19].mxu0 }
 0x1a2   : > { %v1067_v11 = vadd.f32 %v5405_v5, %v5293_v26  ;;  %v5408_v12 = vadd.f32 %v5407_v9, %v5406_v6  ;;  %v6958_v26 = vadd.f32 %v5316_v24, %v5315_v19  ;;  %v6961_v36 = vadd.f32 %v5319_v34, %v5318_v27 }
 0x1a4   : > { %v1200_v14 = vmul.f32 %v6946_v8, %v1067_v11  ;;  %v1070_v15 = vadd.f32 %v5408_v12, %v5296_v32  ;;  %v1539_v11 = vpack.c.bf16 %v1508_v63, %v1507_v62  ;;  %v6208_v62 = vld [vmem:[#allocation9 + $0x1d8] sm:$0xff]  }
 0x1a6   : > { %v1239_v20 = vadd.f32 %v6953_v13, %v1200_v14  ;;  %v1201_v22 = vmul.f32 %v6946_v8, %v1070_v15  ;;  %v5409_v23 = vpop.f32.mrb[20].mxu1  ;;  %v5321_v45 = vpop.f32.mrb[20].mxu0 }
 0x1a7   : > { %v5410_v25 = vpop.f32.mrb[21].mxu1  ;;  %v5322_v51 = vpop.f32.mrb[21].mxu0 }
 0x1a8   : > { %v1271_v29 = vmax.f32 %v1239_v20, 0.0  ;;  %v1240_v30 = vadd.f32 %v6953_v13, %v1201_v22  ;;  %v5411_v31 = vadd.f32 %v5410_v25, %v5409_v23  ;;  %v5412_v32 = vpop.f32.mrb[22].mxu1  ;;  %v6967_v54 = vadd.f32 %v5322_v51, %v5321_v45  ;;  %v5324_v56 = vpop.f32.mrb[22].mxu0  ;;  %v6202_v20 = vld [vmem:[#allocation9 + $0x1c8] sm:$0xff]  }
 0x1a9   : > { %v5413_v35 = vpop.f32.mrb[23].mxu1  ;;  %v5325_v0 = vpop.f32.mrb[23].mxu0 }
 0x1aa   : > { %1347 = vst [vmem:[#allocation2 + $0x19] sm:$0xff] %v1271_v29  ;;  %v1272_v37 = vmax.f32 %v1240_v30, 0.0  ;;  %v1075_v38 = vadd.f32 %v5411_v31, %v6927_v40  ;;  %v5414_v39 = vadd.f32 %v5413_v35, %v5412_v32  ;;  %v6972_v2 = vadd.f32 %v5325_v0, %v5324_v56  ;;  %v6203_v35 = vld [vmem:[#allocation9 + $0x188] sm:$0xff]  }
 0x1ac   : > { %1348 = vst [vmem:[#allocation2 + $0x21] sm:$0xff] %v1272_v37  ;;  %v1202_v41 = vmul.f32 %v6946_v8, %v1075_v38  ;;  %v1078_v43 = vadd.f32 %v5414_v39, %v5302_v46  ;;  %v1476_v44 = vpack.c.bf16 %v1272_v37, %v1271_v29  ;;  %v6205_v39 = vld [vmem:[#allocation9 + $0x1d0] sm:$0xff]  }
 0x1ae   : > { %v1241_v48 = vadd.f32 %v6953_v13, %v1202_v41  ;;  %v1203_v49 = vmul.f32 %v6946_v8, %v1078_v43  ;;  %v5415_v50 = vpop.f32.mrb[24].mxu1  ;;  %2716 = vmatprep.mubr.bf16.mxu0 %v1476_v44  ;;  %v5327_v19 = vpop.f32.mrb[24].mxu0 }
 0x1af   : > { %v5416_v52 = vpop.f32.mrb[25].mxu1 }
 0x1b0   : > { %v1273_v40 = vmax.f32 %v1241_v48, 0.0  ;;  %v1242_v58 = vadd.f32 %v6953_v13, %v1203_v49  ;;  %v5417_v61 = vadd.f32 %v5416_v52, %v5415_v50  ;;  %v5418_v46 = vpop.f32.mrb[26].mxu1 }
 0x1b1   : > { %v5419_v1 = vpop.f32.mrb[27].mxu1  ;;  %v1571_v7 = vld [vmem:[#allocation2 + $0x18] sm:$0xff] }
 0x1b2   : > { %1349 = vst [vmem:[#allocation2 + $0x31] sm:$0xff] %v1273_v40  ;;  %v1274_v4 = vmax.f32 %v1242_v58, 0.0  ;;  %v1083_v5 = vadd.f32 %v5417_v61, %v6933_v53  ;;  %v5420_v6 = vadd.f32 %v5419_v1, %v5418_v46  ;;  %v5328_v53 = vpop.f32.mrb[25].mxu0  ;;  %v6207_v58 = vld [vmem:[#allocation9 + $0x190] sm:$0xff]  }
 0x1b3   : > { %v1572_v9 = vld [vmem:[#allocation2 + $0x20] sm:$0xff]  ;;  %v6980_v27 = vadd.f32 %v5328_v53, %v5327_v19  ;;  %v5330_v29 = vpop.f32.mrb[26].mxu0 }
 0x1b4   : > { %1350 = vst [vmem:[#allocation2 + $0x39] sm:$0xff] %v1274_v4  ;;  %v1204_v12 = vmul.f32 %v6946_v8, %v1083_v5  ;;  %v1086_v14 = vadd.f32 %v5420_v6, %v6937_v59  ;;  %v1603_v15 = vpack.c.bf16 %v1572_v9, %v1571_v7  ;;  %v1477_v16 = vpack.c.bf16 %v1274_v4, %v1273_v40  ;;  %v5331_v34 = vpop.f32.mrb[27].mxu0  ;;  %v1509_v45 = vld [vmem:[#allocation2 + $0x1a] sm:$0xff]  ;;  %v1510_v48 = vld [vmem:[#allocation2 + $0x22] sm:$0xff] }
 0x1b5   : > { %v6983_v38 = vadd.f32 %v5331_v34, %v5330_v29  ;;  %v1540_v61 = vpack.c.bf16 %v1510_v48, %v1509_v45 }
 0x1b6   : > { %v1243_v22 = vadd.f32 %v6953_v13, %v1204_v12  ;;  %v1205_v23 = vmul.f32 %v6946_v8, %v1086_v14  ;;  %v5421_v24 = vpop.f32.mrb[28].mxu1  ;;  %2869 = vmatprep.mubr.bf16.mxu1 %v1603_v15  ;;  %2717 = vmatmul.mubr.bf16.gmra.mrb[52].mxu0 %v1603_v15  ;;  %v5333_v46 = vpop.f32.mrb[28].mxu0  ;;  %v6209_v14 = vld [vmem:[#allocation9 + $0x198] sm:$0xff]  }
 0x1b7   : > { %v5422_v25 = vpop.f32.mrb[29].mxu1  ;;  %2870 = vmatmul.mubr.bf16.vlgmr.msra.gmra.mrb[80].mxu1 %v1539_v11  ;;  %2724 = vmatprep.mubr.bf16.mxu0 %v1477_v16  ;;  %v5334_v1 = vpop.f32.mrb[29].mxu0 }
 0x1b8   : > { %v1275_v59 = vmax.f32 %v1243_v22, 0.0  ;;  %v1244_v30 = vadd.f32 %v6953_v13, %v1205_v23  ;;  %v5423_v31 = vadd.f32 %v5422_v25, %v5421_v24  ;;  %v5424_v32 = vpop.f32.mrb[30].mxu1  ;;  %5836 = vmatpush3.bf16.msra.mxu1 %v6201_v17  ;;  %v5336_v5 = vpop.f32.mrb[30].mxu0  ;;  %v6210_v17 = vld [vmem:[#allocation9 + $0x1e0] sm:$0xff]  }
 0x1b9   : > { %v5425_v37 = vpop.f32.mrb[31].mxu1  ;;  %5837 = vmatprep.subr.bf16.mxu1 %v6202_v20  ;;  %v1573_v49 = vld [vmem:[#allocation2 + $0x30] sm:$0xff]  ;;  %v5337_v12 = vpop.f32.mrb[31].mxu0 }
 0x1ba   : > { %1351 = vst [vmem:[#allocation2 + $0x49] sm:$0xff] %v1275_v59  ;;  %v1276_v41 = vmax.f32 %v1244_v30, 0.0  ;;  %v1091_v43 = vadd.f32 %v5423_v31, %v6941_v3  ;;  %v5426_v44 = vadd.f32 %v5425_v37, %v5424_v32  ;;  %v6993_v16 = vadd.f32 %v5337_v12, %v5336_v5  ;;  %v6211_v32 = vld [vmem:[#allocation9 + $0x1a0] sm:$0xff]   ;;  %v6212_v37 = vld [vmem:[#allocation9 + $0x1e8] sm:$0xff]  }
 0x1bb   : > { %v1574_v50 = vld [vmem:[#allocation2 + $0x38] sm:$0xff] }
 0x1bc   : > { %1352 = vst [vmem:[#allocation2 + $0x51] sm:$0xff] %v1276_v41  ;;  %v1206_v51 = vmul.f32 %v6946_v8, %v1091_v43  ;;  %v1094_v52 = vadd.f32 %v5426_v44, %v6948_v10  ;;  %v1604_v56 = vpack.c.bf16 %v1574_v50, %v1573_v49  ;;  %v1478_v40 = vpack.c.bf16 %v1276_v41, %v1275_v59  ;;  %v1511_v23 = vld [vmem:[#allocation2 + $0x32] sm:$0xff]  ;;  %v1512_v24 = vld [vmem:[#allocation2 + $0x3a] sm:$0xff] }
 0x1bd   : > { %5838 = vmatpush3.bf16.msra.mxu1 %v6203_v35  ;;  %v6990_v10 = vadd.f32 %v5334_v1, %v5333_v46  ;;  %v1541_v34 = vpack.c.bf16 %v1512_v24, %v1511_v23 }
 0x1be   : > { %5839 = vmatprep.subr.bf16.mxu1 %v6205_v39  ;;  %v1245_v3 = vadd.f32 %v6953_v13, %v1206_v51  ;;  %v1207_v63 = vmul.f32 %v6946_v8, %v1094_v52  ;;  %v5427_v0 = vpop.f32.mrb[32].mxu1  ;;  %2877 = vmatprep.mubr.bf16.mxu1 %v1604_v56  ;;  %v5339_v35 = vpop.f32.mrb[32].mxu0 }
 0x1bf   : > { %2725 = vmatmul.mubr.bf16.gmra.mrb[56].mxu0 %v1604_v56  ;;  %v5428_v4 = vpop.f32.mrb[33].mxu1  ;;  %2878 = vmatmul.mubr.bf16.gmra.mrb[84].mxu1 %v1540_v61  ;;  %v5340_v43 = vpop.f32.mrb[33].mxu0  ;;  %v6213_v56 = vld [vmem:[#allocation9 + $0x1a8] sm:$0xff]   ;;  %v6214_v61 = vld [vmem:[#allocation9 + $0x1f0] sm:$0xff]  }
 0x1c0   : > { %2732 = vmatprep.mubr.bf16.mxu0 %v1478_v40  ;;  %v1277_v6 = vmax.f32 %v1245_v3, 0.0  ;;  %v1246_v7 = vadd.f32 %v6953_v13, %v1207_v63  ;;  %v5429_v9 = vadd.f32 %v5428_v4, %v5427_v0  ;;  %v5430_v11 = vpop.f32.mrb[34].mxu1  ;;  %v5342_v45 = vpop.f32.mrb[34].mxu0 }
 0x1c1   : > { %5840 = vmatpush3.bf16.msra.mxu1 %v6207_v58  ;;  %v5431_v15 = vpop.f32.mrb[35].mxu1  ;;  %v1575_v53 = vld [vmem:[#allocation2 + $0x48] sm:$0xff]  ;;  %v5343_v52 = vpop.f32.mrb[35].mxu0 }
 0x1c2   : > { %5841 = vmatprep.subr.bf16.mxu1 %v6208_v62  ;;  %1353 = vst [vmem:[#allocation2 + $0x61] sm:$0xff] %v1277_v6  ;;  %v1278_v19 = vmax.f32 %v1246_v7, 0.0  ;;  %v1099_v20 = vadd.f32 %v5429_v9, %v6958_v26  ;;  %v5432_v22 = vadd.f32 %v5431_v15, %v5430_v11  ;;  %v7003_v58 = vadd.f32 %v5343_v52, %v5342_v45  ;;  %v6216_v11 = vld [vmem:[#allocation9 + $0x1b0] sm:$0xff]   ;;  %v6217_v15 = vld [vmem:[#allocation9 + $0x1f8] sm:$0xff]  }
 0x1c3   : > { %v1576_v25 = vld [vmem:[#allocation2 + $0x50] sm:$0xff] }
 0x1c4   : > { %1354 = vst [vmem:[#allocation2 + $0x69] sm:$0xff] %v1278_v19  ;;  %v1208_v29 = vmul.f32 %v6946_v8, %v1099_v20  ;;  %v1102_v59 = vadd.f32 %v5432_v22, %v6961_v36  ;;  %v1605_v30 = vpack.c.bf16 %v1576_v25, %v1575_v53  ;;  %v1479_v31 = vpack.c.bf16 %v1278_v19, %v1277_v6  ;;  %v1513_v63 = vld [vmem:[#allocation2 + $0x4a] sm:$0xff]  ;;  %v1514_v0 = vld [vmem:[#allocation2 + $0x52] sm:$0xff] }
 0x1c5   : > { %5842 = vmatpush3.bf16.msra.mxu1 %v6209_v14  ;;  %v7000_v36 = vadd.f32 %v5340_v43, %v5339_v35  ;;  %v7008_v12 = vpack.c.bf16 %v1514_v0, %v1513_v63 }
 0x1c6   : > { %5843 = vmatprep.subr.bf16.mxu1 %v6210_v17  ;;  %v1247_v26 = vadd.f32 %v6953_v13, %v1208_v29  ;;  %v1209_v39 = vmul.f32 %v6946_v8, %v1102_v59  ;;  %v5433_v41 = vpop.f32.mrb[36].mxu1  ;;  %2885 = vmatprep.mubr.bf16.mxu1 %v1605_v30  ;;  %v5345_v14 = vpop.f32.mrb[36].mxu0 }
 0x1c7   : > { %2733 = vmatmul.mubr.bf16.gmra.mrb[60].mxu0 %v1605_v30  ;;  %v5434_v44 = vpop.f32.mrb[37].mxu1  ;;  %2886 = vmatmul.mubr.bf16.gmra.mrb[88].mxu1 %v1541_v34  ;;  %v5346_v20 = vpop.f32.mrb[37].mxu0  ;;  %v6218_v30 = vld [vmem:[#allocation9 + $0x1b8] sm:$0xff]  }
 0x1c8   : > { %2740 = vmatprep.mubr.bf16.mxu0 %v1479_v31  ;;  %v1279_v48 = vmax.f32 %v1247_v26, 0.0  ;;  %v1248_v49 = vadd.f32 %v6953_v13, %v1209_v39  ;;  %v5435_v50 = vadd.f32 %v5434_v44, %v5433_v41  ;;  %v5436_v51 = vpop.f32.mrb[38].mxu1  ;;  %v5348_v23 = vpop.f32.mrb[38].mxu0 }
 0x1c9   : > { %5844 = vmatpush3.bf16.msra.mxu1 %v6211_v32  ;;  %v5437_v40 = vpop.f32.mrb[39].mxu1  ;;  %v1577_v1 = vld [vmem:[#allocation2 + $0x60] sm:$0xff]  ;;  %v5349_v59 = vpop.f32.mrb[39].mxu0 }
 0x1ca   : > { %5845 = vmatprep.subr.bf16.mxu1 %v6212_v37  ;;  %1355 = vst [vmem:[#allocation2 + $0x79] sm:$0xff] %v1279_v48  ;;  %v1280_v46 = vmax.f32 %v1248_v49, 0.0  ;;  %v1107_v62 = vadd.f32 %v5435_v50, %v6967_v54  ;;  %v5438_v3 = vadd.f32 %v5437_v40, %v5436_v51  ;;  %v7016_v32 = vadd.f32 %v5349_v59, %v5348_v23 }
 0x1cb   : > { %v1578_v4 = vld [vmem:[#allocation2 + $0x68] sm:$0xff] }
 0x1cc   : > { %1356 = vst [vmem:[#allocation2 + $0x81] sm:$0xff] %v1280_v46  ;;  %v1210_v5 = vmul.f32 %v6946_v8, %v1107_v62  ;;  %v1110_v6 = vadd.f32 %v5438_v3, %v6972_v2  ;;  %v1606_v7 = vpack.c.bf16 %v1578_v4, %v1577_v1  ;;  %v1480_v9 = vpack.c.bf16 %v1280_v46, %v1279_v48  ;;  %v1515_v26 = vld [vmem:[#allocation2 + $0x62] sm:$0xff]  ;;  %v1516_v39 = vld [vmem:[#allocation2 + $0x6a] sm:$0xff] }
 0x1cd   : > { %5846 = vmatpush3.bf16.msra.mxu1 %v6213_v56  ;;  %v7013_v2 = vadd.f32 %v5346_v20, %v5345_v14  ;;  %v7021_v50 = vpack.c.bf16 %v1516_v39, %v1515_v26 }
 0x1ce   : > { %5847 = vmatprep.subr.bf16.mxu1 %v6214_v61  ;;  %v1249_v54 = vadd.f32 %v6953_v13, %v1210_v5  ;;  %v1211_v17 = vmul.f32 %v6946_v8, %v1110_v6  ;;  %v5439_v19 = vpop.f32.mrb[40].mxu1  ;;  %2893 = vmatprep.mubr.bf16.mxu1 %v1606_v7  ;;  %v5351_v51 = vpop.f32.mrb[40].mxu0 }
 0x1cf   : > { %2741 = vmatmul.mubr.bf16.gmra.mrb[64].mxu0 %v1606_v7  ;;  %v5440_v22 = vpop.f32.mrb[41].mxu1  ;;  %2894 = vmatmul.mubr.bf16.gmra.mrb[92].mxu1 %v7008_v12  ;;  %v5352_v40 = vpop.f32.mrb[41].mxu0 }
 0x1d0   : > { %2748 = vmatprep.mubr.bf16.mxu0 %v1480_v9  ;;  %v1281_v24 = vmax.f32 %v1249_v54, 0.0  ;;  %v1250_v53 = vadd.f32 %v6953_v13, %v1211_v17  ;;  %v5441_v25 = vadd.f32 %v5440_v22, %v5439_v19  ;;  %v5442_v29 = vpop.f32.mrb[42].mxu1  ;;  %v7026_v46 = vadd.f32 %v5352_v40, %v5351_v51 }
 0x1d1   : > { %5848 = vmatpush3.bf16.msra.mxu1 %v6216_v11  ;;  %v5443_v31 = vpop.f32.mrb[43].mxu1  ;;  %v1579_v41 = vld [vmem:[#allocation2 + $0x78] sm:$0xff] }
 0x1d2   : > { %5849 = vmatprep.subr.bf16.mxu1 %v6217_v15  ;;  %1357 = vst [vmem:[#allocation2 + $0x91] sm:$0xff] %v1281_v24  ;;  %v1282_v34 = vmax.f32 %v1250_v53, 0.0  ;;  %v1115_v35 = vadd.f32 %v5441_v25, %v6980_v27  ;;  %v5444_v37 = vadd.f32 %v5443_v31, %v5442_v29 }
 0x1d3   : > { %v1580_v43 = vld [vmem:[#allocation2 + $0x80] sm:$0xff] }
 0x1d4   : > { %1358 = vst [vmem:[#allocation2 + $0x99] sm:$0xff] %v1282_v34  ;;  %v1212_v44 = vmul.f32 %v6946_v8, %v1115_v35  ;;  %v1118_v45 = vadd.f32 %v5444_v37, %v6983_v38  ;;  %v1607_v48 = vpack.c.bf16 %v1580_v43, %v1579_v41  ;;  %v1481_v49 = vpack.c.bf16 %v1282_v34, %v1281_v24  ;;  %v5354_v38 = vpop.f32.mrb[42].mxu0  ;;  %v1517_v11 = vld [vmem:[#allocation2 + $0x7a] sm:$0xff]  ;;  %v1518_v14 = vld [vmem:[#allocation2 + $0x82] sm:$0xff] }
 0x1d5   : > { %5850 = vmatpush3.bf16.msra.mxu1 %v6218_v30  ;;  %v5355_v1 = vpop.f32.mrb[43].mxu0  ;;  %v7034_v23 = vpack.c.bf16 %v1518_v14, %v1517_v11 }
 0x1d6   : > { %v1251_v52 = vadd.f32 %v6953_v13, %v1212_v44  ;;  %v1213_v27 = vmul.f32 %v6946_v8, %v1118_v45  ;;  %v5445_v56 = vpop.f32.mrb[44].mxu1  ;;  %2901 = vmatprep.mubr.bf16.mxu1 %v1607_v48  ;;  %v7029_v5 = vadd.f32 %v5355_v1, %v5354_v38  ;;  %v5357_v24 = vpop.f32.mrb[44].mxu0 }
 0x1d7   : > { %2749 = vmatmul.mubr.bf16.gmra.mrb[68].mxu0 %v1607_v48  ;;  %v5446_v61 = vpop.f32.mrb[45].mxu1  ;;  %2902 = vmatmul.mubr.bf16.gmra.mrb[96].mxu1 %v7021_v50  ;;  %v5358_v29 = vpop.f32.mrb[45].mxu0 }
 0x1d8   : > { %2756 = vmatprep.mubr.bf16.mxu0 %v1481_v49  ;;  %v1283_v62 = vmax.f32 %v1251_v52, 0.0  ;;  %v1252_v3 = vadd.f32 %v6953_v13, %v1213_v27  ;;  %v5447_v63 = vadd.f32 %v5446_v61, %v5445_v56  ;;  %v5448_v0 = vpop.f32.mrb[46].mxu1  ;;  %v7039_v30 = vadd.f32 %v5358_v29, %v5357_v24 }
 0x1d9   : > { %v5449_v4 = vpop.f32.mrb[47].mxu1  ;;  %v1581_v15 = vld [vmem:[#allocation2 + $0x90] sm:$0xff] }
 0x1da   : > { %1359 = vst [vmem:[#allocation2 + $0xa9] sm:$0xff] %v1283_v62  ;;  %v1284_v6 = vmax.f32 %v1252_v3, 0.0  ;;  %v1123_v7 = vadd.f32 %v5447_v63, %v6990_v10  ;;  %v5450_v9 = vadd.f32 %v5449_v4, %v5448_v0 }
 0x1db   : > { %v1582_v54 = vld [vmem:[#allocation2 + $0x98] sm:$0xff] }
 0x1dc   : > { %1360 = vst [vmem:[#allocation2 + $0xb1] sm:$0xff] %v1284_v6  ;;  %v1214_v17 = vmul.f32 %v6946_v8, %v1123_v7  ;;  %v1126_v19 = vadd.f32 %v5450_v9, %v6993_v16  ;;  %v1608_v20 = vpack.c.bf16 %v1582_v54, %v1581_v15  ;;  %v1482_v22 = vpack.c.bf16 %v1284_v6, %v1283_v62  ;;  %v5360_v16 = vpop.f32.mrb[46].mxu0  ;;  %v1519_v48 = vld [vmem:[#allocation2 + $0x92] sm:$0xff]  ;;  %v1520_v49 = vld [vmem:[#allocation2 + $0x9a] sm:$0xff] }
 0x1dd   : > { %v5361_v26 = vpop.f32.mrb[47].mxu0  ;;  %v7049_v38 = vpack.c.bf16 %v1520_v49, %v1519_v48 }
 0x1de   : > { %v1253_v53 = vadd.f32 %v6953_v13, %v1214_v17  ;;  %v1215_v25 = vmul.f32 %v6946_v8, %v1126_v19  ;;  %v5451_v10 = vpop.f32.mrb[48].mxu1  ;;  %2909 = vmatprep.mubr.bf16.mxu1 %v1608_v20  ;;  %v7042_v41 = vadd.f32 %v5361_v26, %v5360_v16 }
 0x1df   : > { %2757 = vmatmul.mubr.bf16.gmra.mrb[72].mxu0 %v1608_v20  ;;  %v5452_v59 = vpop.f32.mrb[49].mxu1  ;;  %2910 = vmatmul.mubr.bf16.gmra.mrb[100].mxu1 %v7034_v23 }
 0x1e0   : > { %2764 = vmatprep.mubr.bf16.mxu0 %v1482_v22  ;;  %v1285_v31 = vmax.f32 %v1253_v53, 0.0  ;;  %v1254_v34 = vadd.f32 %v6953_v13, %v1215_v25  ;;  %v5453_v35 = vadd.f32 %v5452_v59, %v5451_v10  ;;  %v5454_v37 = vpop.f32.mrb[50].mxu1 }
 0x1e1   : > { %v5455_v39 = vpop.f32.mrb[51].mxu1  ;;  %v1583_v51 = vld [vmem:[#allocation2 + $0xa8] sm:$0xff] }
 0x1e2   : > { %1361 = vst [vmem:[#allocation2 + $0xc1] sm:$0xff] %v1285_v31  ;;  %v1286_v43 = vmax.f32 %v1254_v34, 0.0  ;;  %v1131_v44 = vadd.f32 %v5453_v35, %v7000_v36  ;;  %v5456_v45 = vadd.f32 %v5455_v39, %v5454_v37 }
 0x1e3   : > { %v1584_v52 = vld [vmem:[#allocation2 + $0xb0] sm:$0xff] }
 0x1e4   : > { %1362 = vst [vmem:[#allocation2 + $0xc9] sm:$0xff] %v1286_v43  ;;  %v1216_v27 = vmul.f32 %v6946_v8, %v1131_v44  ;;  %v1134_v56 = vadd.f32 %v5456_v45, %v7003_v58  ;;  %v7047_v40 = vpack.c.bf16 %v1584_v52, %v1583_v51  ;;  %v1483_v61 = vpack.c.bf16 %v1286_v43, %v1285_v31  ;;  %v1521_v14 = vld [vmem:[#allocation2 + $0xaa] sm:$0xff]  ;;  %v1522_v15 = vld [vmem:[#allocation2 + $0xb2] sm:$0xff] }
 0x1e5   : > { %v7062_v53 = vpack.c.bf16 %v1522_v15, %v1521_v14 }
 0x1e6   : > { %v1255_v62 = vadd.f32 %v6953_v13, %v1216_v27  ;;  %v1217_v3 = vmul.f32 %v6946_v8, %v1134_v56  ;;  %v5457_v36 = vpop.f32.mrb[52].mxu1  ;;  %2917 = vmatprep.mubr.bf16.mxu1 %v7047_v40 }
 0x1e7   : > { %2765 = vmatmul.mubr.bf16.gmra.mrb[76].mxu0 %v7047_v40  ;;  %v5458_v63 = vpop.f32.mrb[53].mxu1  ;;  %2918 = vmatmul.mubr.bf16.gmra.mrb[104].mxu1 %v7049_v38 }
 0x1e8   : > { %2772 = vmatprep.mubr.bf16.mxu0 %v1483_v61  ;;  %v1287_v0 = vmax.f32 %v1255_v62, 0.0  ;;  %v1256_v58 = vadd.f32 %v6953_v13, %v1217_v3  ;;  %v5459_v1 = vadd.f32 %v5458_v63, %v5457_v36  ;;  %v5460_v4 = vpop.f32.mrb[54].mxu1 }
 0x1e9   : > { %v5461_v6 = vpop.f32.mrb[55].mxu1  ;;  %v1585_v54 = vld [vmem:[#allocation2 + $0xc0] sm:$0xff] }
 0x1ea   : > { %1363 = vst [vmem:[#allocation2 + $0xd9] sm:$0xff] %v1287_v0  ;;  %v1288_v7 = vmax.f32 %v1256_v58, 0.0  ;;  %v1139_v9 = vadd.f32 %v5459_v1, %v7013_v2  ;;  %v5462_v11 = vadd.f32 %v5461_v6, %v5460_v4 }
 0x1eb   : > { %v1586_v17 = vld [vmem:[#allocation2 + $0xc8] sm:$0xff] }
 0x1ec   : > { %1364 = vst [vmem:[#allocation2 + $0xe1] sm:$0xff] %v1288_v7  ;;  %v1218_v19 = vmul.f32 %v6946_v8, %v1139_v9  ;;  %v1142_v20 = vadd.f32 %v5462_v11, %v7016_v32  ;;  %v7060_v22 = vpack.c.bf16 %v1586_v17, %v1585_v54  ;;  %v1484_v24 = vpack.c.bf16 %v1288_v7, %v1287_v0  ;;  %v1523_v39 = vld [vmem:[#allocation2 + $0xc2] sm:$0xff]  ;;  %v1524_v43 = vld [vmem:[#allocation2 + $0xca] sm:$0xff] }
 0x1ed   : > { %v7079_v27 = vpack.c.bf16 %v1524_v43, %v1523_v39 }
 0x1ee   : > { %v1257_v25 = vadd.f32 %v6953_v13, %v1218_v19  ;;  %v1219_v10 = vmul.f32 %v6946_v8, %v1142_v20  ;;  %v5463_v2 = vpop.f32.mrb[56].mxu1  ;;  %2925 = vmatprep.mubr.bf16.mxu1 %v7060_v22 }
 0x1ef   : > { %2773 = vmatmul.mubr.bf16.gmra.mrb[80].mxu0 %v7060_v22  ;;  %v5464_v29 = vpop.f32.mrb[57].mxu1  ;;  %2926 = vmatmul.mubr.bf16.gmra.mrb[108].mxu1 %v7062_v53 }
 0x1f0   : > { %2780 = vmatprep.mubr.bf16.mxu0 %v1484_v24  ;;  %v1289_v59 = vmax.f32 %v1257_v25, 0.0  ;;  %v1258_v32 = vadd.f32 %v6953_v13, %v1219_v10  ;;  %v5465_v16 = vadd.f32 %v5464_v29, %v5463_v2  ;;  %v5466_v31 = vpop.f32.mrb[58].mxu1 }
 0x1f1   : > { %v5467_v34 = vpop.f32.mrb[59].mxu1  ;;  %v1587_v44 = vld [vmem:[#allocation2 + $0xd8] sm:$0xff] }
 0x1f2   : > { %1365 = vst [vmem:[#allocation2 + $0xf1] sm:$0xff] %v1289_v59  ;;  %v7070_v35 = vmax.f32 %v1258_v32, 0.0  ;;  %v1147_v37 = vadd.f32 %v5465_v16, %v7026_v46  ;;  %v5468_v26 = vadd.f32 %v5467_v34, %v5466_v31 }
 0x1f3   : > { %v1588_v45 = vld [vmem:[#allocation2 + $0xe0] sm:$0xff] }
 0x1f4   : > { %1366 = vst [vmem:[#allocation2 + $0xf9] sm:$0xff] %v7070_v35  ;;  %v1220_v48 = vmul.f32 %v6946_v8, %v1147_v37  ;;  %v1150_v49 = vadd.f32 %v5468_v26, %v7029_v5  ;;  %v7076_v51 = vpack.c.bf16 %v1588_v45, %v1587_v44  ;;  %v1485_v52 = vpack.c.bf16 %v7070_v35, %v1289_v59  ;;  %v1525_v6 = vld [vmem:[#allocation2 + $0xda] sm:$0xff]  ;;  %v1526_v7 = vld [vmem:[#allocation2 + $0xe2] sm:$0xff] }
 0x1f5   : > { %v7094_v19 = vpack.c.bf16 %v1526_v7, %v1525_v6 }
 0x1f6   : > { %v1259_v56 = vadd.f32 %v6953_v13, %v1220_v48  ;;  %v1221_v46 = vmul.f32 %v6946_v8, %v1150_v49  ;;  %v5469_v61 = vpop.f32.mrb[60].mxu1  ;;  %2933 = vmatprep.mubr.bf16.mxu1 %v7076_v51 }
 0x1f7   : > { %2781 = vmatmul.mubr.bf16.gmra.mrb[84].mxu0 %v7076_v51  ;;  %v5470_v62 = vpop.f32.mrb[61].mxu1  ;;  %2934 = vmatmul.mubr.bf16.gmra.mrb[112].mxu1 %v7079_v27 }
 0x1f8   : > { %2788 = vmatprep.mubr.bf16.mxu0 %v1485_v52  ;;  %v1291_v5 = vmax.f32 %v1259_v56, 0.0  ;;  %v1260_v3 = vadd.f32 %v6953_v13, %v1221_v46  ;;  %v5471_v36 = vadd.f32 %v5470_v62, %v5469_v61  ;;  %v5472_v63 = vpop.f32.mrb[62].mxu1 }
 0x1f9   : > { %v5473_v0 = vpop.f32.mrb[63].mxu1  ;;  %v1589_v9 = vld [vmem:[#allocation2 + $0xf0] sm:$0xff] }
 0x1fa   : > { %1367 = vst [vmem:[#allocation2 + $0x109] sm:$0xff] %v1291_v5  ;;  %v1292_v58 = vmax.f32 %v1260_v3, 0.0  ;;  %v1155_v1 = vadd.f32 %v5471_v36, %v7039_v30  ;;  %v5474_v4 = vadd.f32 %v5473_v0, %v5472_v63 }
 0x1fb   : > { %v1590_v11 = vld [vmem:[#allocation2 + $0xf8] sm:$0xff] }
 0x1fc   : > { %1368 = vst [vmem:[#allocation2 + $0x111] sm:$0xff] %v1292_v58  ;;  %v1222_v14 = vmul.f32 %v6946_v8, %v1155_v1  ;;  %v1158_v15 = vadd.f32 %v5474_v4, %v7042_v41  ;;  %v7090_v54 = vpack.c.bf16 %v1590_v11, %v1589_v9  ;;  %v7092_v17 = vpack.c.bf16 %v1292_v58, %v1291_v5  ;;  %v5515_v41 = vpop.f32.mrb[48].mxu0  ;;  %v1527_v43 = vld [vmem:[#allocation2 + $0xf2] sm:$0xff]  ;;  %v1528_v44 = vld [vmem:[#allocation2 + $0xfa] sm:$0xff] }
 0x1fd   : > { %v5516_v32 = vpop.f32.mrb[49].mxu0  ;;  %v7114_v5 = vpack.c.bf16 %v1528_v44, %v1527_v43 }
 0x1fe   : > { %v1261_v20 = vadd.f32 %v6953_v13, %v1222_v14  ;;  %v1223_v30 = vmul.f32 %v6946_v8, %v1158_v15  ;;  %v5475_v24 = vpop.f32.mrb[64].mxu1  ;;  %2941 = vmatprep.mubr.bf16.mxu1 %v7090_v54  ;;  %v7103_v31 = vadd.f32 %v5516_v32, %v5515_v41  ;;  %v5518_v34 = vpop.f32.mrb[50].mxu0 }
 0x1ff   : > { %2789 = vmatmul.mubr.bf16.gmra.mrb[88].mxu0 %v7090_v54  ;;  %v5476_v25 = vpop.f32.mrb[65].mxu1  ;;  %2942 = vmatmul.mubr.bf16.gmra.mrb[116].mxu1 %v7094_v19  ;;  %v5519_v45 = vpop.f32.mrb[51].mxu0 }
 0x200   : > { %2796 = vmatprep.mubr.bf16.mxu0 %v7092_v17  ;;  %v1293_v10 = vmax.f32 %v1261_v20, 0.0  ;;  %v1262_v2 = vadd.f32 %v6953_v13, %v1223_v30  ;;  %v5477_v29 = vadd.f32 %v5476_v25, %v5475_v24  ;;  %v5478_v59 = vpop.f32.mrb[66].mxu1  ;;  %v7106_v52 = vadd.f32 %v5519_v45, %v5518_v34 }
 0x201   : > { %v5479_v16 = vpop.f32.mrb[67].mxu1  ;;  %v1591_v48 = vld [vmem:[#allocation2 + $0x108] sm:$0xff] }
 0x202   : > { %1369 = vst [vmem:[#allocation2 + $0x121] sm:$0xff] %v1293_v10  ;;  %v1294_v37 = vmax.f32 %v1262_v2, 0.0  ;;  %v1163_v26 = vadd.f32 %v5477_v29, %v6919_v18  ;;  %v5480_v39 = vadd.f32 %v5479_v16, %v5478_v59 }
 0x203   : > { %v1592_v49 = vld [vmem:[#allocation2 + $0x110] sm:$0xff] }
 0x204   : > { %1370 = vst [vmem:[#allocation2 + $0x129] sm:$0xff] %v1294_v37  ;;  %v1224_v56 = vmul.f32 %v6946_v8, %v1163_v26  ;;  %v1166_v46 = vadd.f32 %v5480_v39, %v6921_v21  ;;  %v7110_v61 = vpack.c.bf16 %v1592_v49, %v1591_v48  ;;  %v7112_v62 = vpack.c.bf16 %v1294_v37, %v1293_v10  ;;  %v1529_v11 = vld [vmem:[#allocation2 + $0x10a] sm:$0xff]  ;;  %v1530_v14 = vld [vmem:[#allocation2 + $0x112] sm:$0xff] }
 0x205   : > { %v7130_v10 = vpack.c.bf16 %v1530_v14, %v1529_v11 }
 0x206   : > { %v1263_v18 = vadd.f32 %v6953_v13, %v1224_v56  ;;  %v1225_v3 = vmul.f32 %v6946_v8, %v1166_v46  ;;  %v5481_v36 = vpop.f32.mrb[68].mxu1  ;;  %2949 = vmatprep.mubr.bf16.mxu1 %v7110_v61 }
 0x207   : > { %2797 = vmatmul.mubr.bf16.gmra.mrb[92].mxu0 %v7110_v61  ;;  %v5482_v63 = vpop.f32.mrb[69].mxu1  ;;  %2950 = vmatmul.mubr.bf16.gmra.mrb[120].mxu1 %v7114_v5 }
 0x208   : > { %2804 = vmatprep.mubr.bf16.mxu0 %v7112_v62  ;;  %v1295_v21 = vmax.f32 %v1263_v18, 0.0  ;;  %v1264_v0 = vadd.f32 %v6953_v13, %v1225_v3  ;;  %v5483_v58 = vadd.f32 %v5482_v63, %v5481_v36  ;;  %v5484_v1 = vpop.f32.mrb[70].mxu1 }
 0x209   : > { %v5485_v4 = vpop.f32.mrb[71].mxu1  ;;  %v1593_v15 = vld [vmem:[#allocation2 + $0x120] sm:$0xff] }
 0x20a   : > { %1371 = vst [vmem:[#allocation2 + $0x139] sm:$0xff] %v1295_v21  ;;  %v1296_v6 = vmax.f32 %v1264_v0, 0.0  ;;  %v1171_v7 = vadd.f32 %v5483_v58, %v6923_v28  ;;  %v5486_v9 = vadd.f32 %v5485_v4, %v5484_v1 }
 0x20b   : > { %v1594_v20 = vld [vmem:[#allocation2 + $0x128] sm:$0xff] }
 0x20c   : > { %1372 = vst [vmem:[#allocation2 + $0x141] sm:$0xff] %v1296_v6  ;;  %v1226_v30 = vmul.f32 %v6946_v8, %v1171_v7  ;;  %v1174_v24 = vadd.f32 %v5486_v9, %v6925_v33  ;;  %v7126_v25 = vpack.c.bf16 %v1594_v20, %v1593_v15  ;;  %v7128_v41 = vpack.c.bf16 %v1296_v6, %v1295_v21  ;;  %v1531_v44 = vld [vmem:[#allocation2 + $0x122] sm:$0xff]  ;;  %v1532_v45 = vld [vmem:[#allocation2 + $0x12a] sm:$0xff] }
 0x20d   : > { %v7146_v36 = vpack.c.bf16 %v1532_v45, %v1531_v44 }
 0x20e   : > { %v1265_v2 = vadd.f32 %v6953_v13, %v1226_v30  ;;  %v1227_v28 = vmul.f32 %v6946_v8, %v1174_v24  ;;  %v5487_v29 = vpop.f32.mrb[72].mxu1  ;;  %2957 = vmatprep.mubr.bf16.mxu1 %v7126_v25 }
 0x20f   : > { %2805 = vmatmul.mubr.bf16.gmra.mrb[96].mxu0 %v7126_v25  ;;  %v5488_v59 = vpop.f32.mrb[73].mxu1  ;;  %2958 = vmatmul.mubr.bf16.gmra.mrb[124].mxu1 %v7130_v10 }
 0x210   : > { %2812 = vmatprep.mubr.bf16.mxu0 %v7128_v41  ;;  %v1297_v33 = vmax.f32 %v1265_v2, 0.0  ;;  %v1266_v32 = vadd.f32 %v6953_v13, %v1227_v28  ;;  %v5489_v16 = vadd.f32 %v5488_v59, %v5487_v29  ;;  %v5490_v34 = vpop.f32.mrb[74].mxu1 }
 0x211   : > { %v5491_v37 = vpop.f32.mrb[75].mxu1  ;;  %v1595_v48 = vld [vmem:[#allocation2 + $0x138] sm:$0xff] }
 0x212   : > { %1373 = vst [vmem:[#allocation2 + $0x151] sm:$0xff] %v1297_v33  ;;  %v1298_v26 = vmax.f32 %v1266_v32, 0.0  ;;  %v1179_v39 = vadd.f32 %v5489_v16, %v6929_v42  ;;  %v5492_v43 = vadd.f32 %v5491_v37, %v5490_v34  ;;  %v1699_v16 = vld [vmem:[#allocation2 + $0x1a] sm:$0xff] }
 0x213   : > { %v1596_v49 = vld [vmem:[#allocation2 + $0x140] sm:$0xff] }
 0x214   : > { %1374 = vst [vmem:[#allocation2 + $0x159] sm:$0xff] %v1298_v26  ;;  %v1228_v56 = vmul.f32 %v6946_v8, %v1179_v39  ;;  %v1182_v46 = vadd.f32 %v5492_v43, %v6931_v47  ;;  %v7142_v18 = vpack.c.bf16 %v1596_v49, %v1595_v48  ;;  %v7144_v3 = vpack.c.bf16 %v1298_v26, %v1297_v33  ;;  %v1533_v14 = vld [vmem:[#allocation2 + $0x13a] sm:$0xff]  ;;  %v1534_v15 = vld [vmem:[#allocation2 + $0x142] sm:$0xff] }
 0x215   : > { %v7162_v59 = vpack.c.bf16 %v1534_v15, %v1533_v14  ;;  %v1700_v39 = vld [vmem:[#allocation2 + $0x22] sm:$0xff] }
 0x216   : > { %v1267_v63 = vadd.f32 %v6953_v13, %v1228_v56  ;;  %v1229_v42 = vmul.f32 %v6946_v8, %v1182_v46  ;;  %v5493_v21 = vpop.f32.mrb[76].mxu1  ;;  %2965 = vmatprep.mubr.bf16.mxu1 %v7142_v18  ;;  %v1731_v49 = vpack.c.bf16 %v1700_v39, %v1699_v16  ;;  %v1636_v56 = vld [vmem:[#allocation2 + $0x21] sm:$0xff]  ;;  %v1701_v46 = vld [vmem:[#allocation2 + $0x32] sm:$0xff]  ;;  %v1833_v16 = vld [vmem:[#allocation2 + $0x69] sm:$0xff] }
 0x217   : > { %2813 = vmatmul.mubr.bf16.gmra.mrb[100].mxu0 %v7142_v18  ;;  %v5494_v0 = vpop.f32.mrb[77].mxu1  ;;  %2966 = vmatmul.mubr.bf16.gmra.mrb[128].mxu1 %v7146_v36  ;;  %v6220_v15 = vld [vmem:[#allocation9 + $0x210] sm:$0xff]   ;;  %v6223_v39 = vld [vmem:[#allocation9 + $0x228] sm:$0xff]  }
 0x218   : > { %2820 = vmatprep.mubr.bf16.mxu0 %v7144_v3  ;;  %v1299_v47 = vmax.f32 %v1267_v63, 0.0  ;;  %v1268_v58 = vadd.f32 %v6953_v13, %v1229_v42  ;;  %v5495_v1 = vadd.f32 %v5494_v0, %v5493_v21  ;;  %v5496_v4 = vpop.f32.mrb[78].mxu1  ;;  %v1702_v21 = vld [vmem:[#allocation2 + $0x3a] sm:$0xff] }
 0x219   : > { %v5497_v6 = vpop.f32.mrb[79].mxu1  ;;  %v1597_v20 = vld [vmem:[#allocation2 + $0x150] sm:$0xff] }
 0x21a   : > { %1375 = vst [vmem:[#allocation2 + $0x169] sm:$0xff] %v1299_v47  ;;  %v1300_v7 = vmax.f32 %v1268_v58, 0.0  ;;  %v1187_v9 = vadd.f32 %v5495_v1, %v6935_v55  ;;  %v5498_v11 = vadd.f32 %v5497_v6, %v5496_v4  ;;  %v1829_v58 = vld [vmem:[#allocation2 + $0x39] sm:$0xff] }
 0x21b   : > { %v1598_v30 = vld [vmem:[#allocation2 + $0x158] sm:$0xff] }
 0x21c   : > { %1376 = vst [vmem:[#allocation2 + $0x171] sm:$0xff] %v1300_v7  ;;  %v1230_v24 = vmul.f32 %v6946_v8, %v1187_v9  ;;  %v1190_v2 = vadd.f32 %v5498_v11, %v6939_v60  ;;  %v7158_v28 = vpack.c.bf16 %v1598_v30, %v1597_v20  ;;  %v7160_v29 = vpack.c.bf16 %v1300_v7, %v1299_v47  ;;  %v1535_v37 = vld [vmem:[#allocation2 + $0x152] sm:$0xff]  ;;  %v1536_v26 = vld [vmem:[#allocation2 + $0x15a] sm:$0xff] }
 0x21d   : > { %v7175_v48 = vpack.c.bf16 %v1536_v26, %v1535_v37  ;;  %v7184_v7 = vpack.c.bf16 %v1702_v21, %v1701_v46  ;;  %v1828_v9 = vld [vmem:[#allocation2 + $0x31] sm:$0xff]  ;;  %v1832_v26 = vld [vmem:[#allocation2 + $0x61] sm:$0xff]  ;;  %v1834_v46 = vld [vmem:[#allocation2 + $0x79] sm:$0xff] }
 0x21e   : > { %v1269_v33 = vadd.f32 %v6953_v13, %v1230_v24  ;;  %v1231_v55 = vmul.f32 %v6946_v8, %v1190_v2  ;;  %2973 = vmatprep.mubr.bf16.mxu1 %v7158_v28  ;;  %v6219_v11 = vld [vmem:[#allocation9 + $0x208] sm:$0xff]   ;;  %v1860_v14 = vpack.c.bf16 %v1829_v58, %v1828_v9  ;;  %v1764_v24 = vld [vmem:[#allocation2 + $0x30] sm:$0xff] }
 0x21f   : > { %2821 = vmatmul.mubr.bf16.gmra.mrb[104].mxu0 %v7158_v28  ;;  %2974 = vmatmul.mubr.bf16.gmra.mrb[132].mxu1 %v7162_v59  ;;  %v1765_v20 = vld [vmem:[#allocation2 + $0x38] sm:$0xff] }
 0x220   : > { %2828 = vmatprep.mubr.bf16.mxu0 %v7160_v29  ;;  %v1301_v32 = vmax.f32 %v1269_v33, 0.0  ;;  %v1270_v60 = vadd.f32 %v6953_v13, %v1231_v55  ;;  %v1635_v13 = vld [vmem:[#allocation2 + $0x19] sm:$0xff]  ;;  %v1831_v30 = vld [vmem:[#allocation2 + $0x51] sm:$0xff]  ;;  %v1796_v2 = vpack.c.bf16 %v1765_v20, %v1764_v24  ;;  %v1830_v33 = vld [vmem:[#allocation2 + $0x49] sm:$0xff] }
 0x221   : > { %v1599_v43 = vld [vmem:[#allocation2 + $0x168] sm:$0xff]  ;;  %v1667_v4 = vpack.c.bf16 %v1636_v56, %v1635_v13  ;;  %v1768_v13 = vld [vmem:[#allocation2 + $0x60] sm:$0xff]  ;;  %v1836_v58 = vld [vmem:[#allocation2 + $0x91] sm:$0xff] }
 0x222   : > { %1377 = vst [vmem:[#allocation2 + $0x181] sm:$0xff] %v1301_v32  ;;  %v1302_v34 = vmax.f32 %v1270_v60, 0.0  ;;  %v6221_v55 = vld [vmem:[#allocation9 + $0x218] sm:$0xff]   ;;  %v6222_v60 = vld [vmem:[#allocation9 + $0x220] sm:$0xff]   ;;  %v1837_v21 = vld [vmem:[#allocation2 + $0x99] sm:$0xff] }
 0x223   : > { %v1600_v44 = vld [vmem:[#allocation2 + $0x170] sm:$0xff]  ;;  %v1773_v9 = vld [vmem:[#allocation2 + $0x98] sm:$0xff]  ;;  %v1840_v24 = vld [vmem:[#allocation2 + $0xc1] sm:$0xff] }
 0x224   : > { %1378 = vst [vmem:[#allocation2 + $0x189] sm:$0xff] %v1302_v34  ;;  %v7171_v8 = vpack.c.bf16 %v1600_v44, %v1599_v43  ;;  %v7173_v45 = vpack.c.bf16 %v1302_v34, %v1301_v32  ;;  %v1537_v63 = vld [vmem:[#allocation2 + $0x16a] sm:$0xff]  ;;  %v1538_v42 = vld [vmem:[#allocation2 + $0x172] sm:$0xff]  ;;  %v1861_v32 = vpack.c.bf16 %v1831_v30, %v1830_v33  ;;  %v1862_v43 = vpack.c.bf16 %v1833_v16, %v1832_v26 }
 0x225   : > { %v7182_v6 = vpack.c.bf16 %v1538_v42, %v1537_v63  ;;  %v1766_v34 = vld [vmem:[#allocation2 + $0x48] sm:$0xff]  ;;  %v1842_v33 = vld [vmem:[#allocation2 + $0xd9] sm:$0xff] }
 0x226   : > { %2981 = vmatprep.mubr.bf16.mxu1 %v7171_v8  ;;  %v1769_v44 = vld [vmem:[#allocation2 + $0x68] sm:$0xff] }
 0x227   : > { %2829 = vmatmul.mubr.bf16.gmra.mrb[108].mxu0 %v7171_v8  ;;  %2982 = vmatmul.mubr.bf16.gmra.mrb[136].mxu1 %v7175_v48  ;;  %v1798_v56 = vpack.c.bf16 %v1769_v44, %v1768_v13  ;;  %v6225_v63 = vld [vmem:[#allocation9 + $0x238] sm:$0xff]  }
 0x228   : > { %3030 = vmatprep.mubr.bf16.mxu0 %v1731_v49  ;;  %v1835_v49 = vld [vmem:[#allocation2 + $0x81] sm:$0xff]  ;;  %v1841_v30 = vld [vmem:[#allocation2 + $0xc9] sm:$0xff] }
 0x229   : > { %v1601_v0 = vld [vmem:[#allocation2 + $0x180] sm:$0xff]  ;;  %v1863_v42 = vpack.c.bf16 %v1835_v49, %v1834_v46 }
 0x22b   : > { %v1602_v47 = vld [vmem:[#allocation2 + $0x188] sm:$0xff] }
 0x22c   : > { %v7180_v1 = vpack.c.bf16 %v1602_v47, %v1601_v0  ;;  %v1770_v0 = vld [vmem:[#allocation2 + $0x78] sm:$0xff]  ;;  %v1729_v46 = vld [vmem:[#allocation2 + $0x182] sm:$0xff] }
 0x22e   : > { %2989 = vmatprep.mubr.bf16.mxu1 %v7180_v1 }
 0x22f   : > { %3031 = vmatmul.mubr.bf16.vlgmr.msra.gmra.mrb[112].mxu0 %v1667_v4  ;;  %2990 = vmatmul.mubr.bf16.gmra.mrb[140].mxu1 %v7182_v6  ;;  %v1864_v4 = vpack.c.bf16 %v1837_v21, %v1836_v58 }
 0x230   : > { %3038 = vmatprep.mubr.bf16.mxu0 %v7184_v7  ;;  %3191 = vmatprep.mubr.bf16.mxu1 %v1860_v14 }
 0x231   : > { %5972 = vmatpush3.bf16.msra.mxu0 %v6969_v57  ;;  %v1767_v57 = vld [vmem:[#allocation2 + $0x50] sm:$0xff] }
 0x232   : > { %5973 = vmatprep.subr.bf16.mxu0 %v6219_v11  ;;  %v1797_v37 = vpack.c.bf16 %v1767_v57, %v1766_v34 }
 0x235   : > { %5974 = vmatpush3.bf16.msra.mxu0 %v6219_v11  ;;  %v1839_v11 = vld [vmem:[#allocation2 + $0xb1] sm:$0xff] }
 0x236   : > { %5975 = vmatprep.subr.bf16.mxu0 %v6220_v15 }
 0x237   : > { %3039 = vmatmul.mubr.bf16.gmra.mrb[116].mxu0 %v1860_v14  ;;  %3192 = vmatmul.mubr.bf16.vlgmr.msra.gmra.mrb[144].mxu1 %v1796_v2  ;;  %v1772_v14 = vld [vmem:[#allocation2 + $0x90] sm:$0xff]  ;;  %v1866_v2 = vpack.c.bf16 %v1841_v30, %v1840_v24  ;;  %v1859_v30 = vld [vmem:[#allocation2 + $0x1a1] sm:$0xff] }
 0x238   : > { %3046 = vmatprep.mubr.bf16.mxu0 %v7008_v12  ;;  %3199 = vmatprep.mubr.bf16.mxu1 %v1861_v32  ;;  %v6224_v12 = vld [vmem:[#allocation9 + $0x230] sm:$0xff]  }
 0x239   : > { %5976 = vmatpush3.bf16.msra.mxu0 %v6220_v15  ;;  %v1800_v15 = vpack.c.bf16 %v1773_v9, %v1772_v14  ;;  %v6231_v14 = vld [vmem:[#allocation10 + $0x24] ss:$16 sps:$4 sm:$0xff]  }
 0x23a   : > { %5977 = vmatprep.subr.bf16.mxu0 %v6221_v55 }
 0x23d   : > { %5978 = vmatpush3.bf16.msra.mxu0 %v6221_v55 }
 0x23e   : > { %5979 = vmatprep.subr.bf16.mxu0 %v6222_v60 }
 0x23f   : > { %3047 = vmatmul.mubr.bf16.gmra.mrb[120].mxu0 %v1861_v32  ;;  %3200 = vmatmul.mubr.bf16.gmra.mrb[148].mxu1 %v1797_v37 }
 0x240   : > { %3054 = vmatprep.mubr.bf16.mxu0 %v7021_v50  ;;  %3207 = vmatprep.mubr.bf16.mxu1 %v1862_v43  ;;  %v1771_v50 = vld [vmem:[#allocation2 + $0x80] sm:$0xff] }
 0x241   : > { %5980 = vmatpush3.bf16.msra.mxu0 %v6222_v60  ;;  %v1799_v47 = vpack.c.bf16 %v1771_v50, %v1770_v0 }
 0x242   : > { %5981 = vmatprep.subr.bf16.mxu0 %v6223_v39 }
 0x245   : > { %5982 = vmatpush3.bf16.msra.mxu0 %v6223_v39 }
 0x246   : > { %5983 = vmatprep.subr.bf16.mxu0 %v6224_v12 }
 0x247   : > { %3055 = vmatmul.mubr.bf16.gmra.mrb[124].mxu0 %v1862_v43  ;;  %3208 = vmatmul.mubr.bf16.gmra.mrb[152].mxu1 %v1798_v56 }
 0x248   : > { %3062 = vmatprep.mubr.bf16.mxu0 %v7034_v23  ;;  %3215 = vmatprep.mubr.bf16.mxu1 %v1863_v42  ;;  %v1838_v23 = vld [vmem:[#allocation2 + $0xa9] sm:$0xff] }
 0x249   : > { %5984 = vmatpush3.bf16.msra.mxu0 %v6224_v12  ;;  %v1865_v20 = vpack.c.bf16 %v1839_v11, %v1838_v23  ;;  %v6229_v11 = vld [vmem:[#allocation10 + $0x20] ss:$16 sps:$4 sm:$0xff]  }
 0x24a   : > { %5985 = vmatprep.subr.bf16.mxu0 %v6225_v63 }
 0x24d   : > { %5986 = vmatpush3.bf16.msra.mxu0 %v6225_v63  ;;  %v1730_v63 = vld [vmem:[#allocation2 + $0x18a] sm:$0xff] }
 0x24f   : > { %3063 = vmatmul.mubr.bf16.gmra.mrb[128].mxu0 %v1863_v42  ;;  %3216 = vmatmul.mubr.bf16.gmra.mrb[156].mxu1 %v1799_v47 }
 0x250   : > { %3070 = vmatprep.mubr.bf16.mxu0 %v7049_v38  ;;  %3223 = vmatprep.mubr.bf16.mxu1 %v1864_v4  ;;  %v1843_v38 = vld [vmem:[#allocation2 + $0xe1] sm:$0xff] }
 0x251   : > { %v1867_v55 = vpack.c.bf16 %v1843_v38, %v1842_v33 }
 0x257   : > { %3071 = vmatmul.mubr.bf16.gmra.mrb[132].mxu0 %v1864_v4  ;;  %3224 = vmatmul.mubr.bf16.gmra.mrb[160].mxu1 %v1800_v15 }
 0x258   : > { %3078 = vmatprep.mubr.bf16.mxu0 %v7062_v53  ;;  %3231 = vmatprep.mubr.bf16.mxu1 %v1865_v20  ;;  %v1844_v53 = vld [vmem:[#allocation2 + $0xf1] sm:$0xff] }
 0x259   : > { %v1868_v32 = vpack.c.bf16 %v7070_v35, %v1844_v53 }
 0x25f   : > { %3079 = vmatmul.mubr.bf16.gmra.mrb[136].mxu0 %v1865_v20  ;;  %3232 = vmatmul.mubr.bf16.gmra.mrb[164].mxu1 %v7047_v40  ;;  %v1858_v20 = vld [vmem:[#allocation2 + $0x199] sm:$0xff] }
 0x260   : > { %3086 = vmatprep.mubr.bf16.mxu0 %v7079_v27  ;;  %3239 = vmatprep.mubr.bf16.mxu1 %v1866_v2 }
 0x267   : > { %3087 = vmatmul.mubr.bf16.gmra.mrb[140].mxu0 %v1866_v2  ;;  %3240 = vmatmul.mubr.bf16.gmra.mrb[168].mxu1 %v7060_v22 }
 0x268   : > { %3094 = vmatprep.mubr.bf16.mxu0 %v7094_v19  ;;  %3247 = vmatprep.mubr.bf16.mxu1 %v1867_v55 }
 0x26f   : > { %3095 = vmatmul.mubr.bf16.gmra.mrb[144].mxu0 %v1867_v55  ;;  %3248 = vmatmul.mubr.bf16.gmra.mrb[172].mxu1 %v7076_v51 }
 0x270   : > { %3102 = vmatprep.mubr.bf16.mxu0 %v7114_v5  ;;  %3255 = vmatprep.mubr.bf16.mxu1 %v1868_v32 }
 0x277   : > { %3103 = vmatmul.mubr.bf16.gmra.mrb[148].mxu0 %v1868_v32  ;;  %3256 = vmatmul.mubr.bf16.gmra.mrb[176].mxu1 %v7090_v54  ;;  %v1875_v32 = vpack.c.bf16 %v1859_v30, %v1858_v20 }
 0x278   : > { %3110 = vmatprep.mubr.bf16.mxu0 %v7130_v10  ;;  %3263 = vmatprep.mubr.bf16.mxu1 %v7092_v17 }
 0x27f   : > { %3111 = vmatmul.mubr.bf16.gmra.mrb[152].mxu0 %v7092_v17  ;;  %3264 = vmatmul.mubr.bf16.gmra.mrb[180].mxu1 %v7110_v61 }
 0x280   : > { %3118 = vmatprep.mubr.bf16.mxu0 %v7146_v36  ;;  %3271 = vmatprep.mubr.bf16.mxu1 %v7112_v62 }
 0x287   : > { %3119 = vmatmul.mubr.bf16.gmra.mrb[156].mxu0 %v7112_v62  ;;  %3272 = vmatmul.mubr.bf16.gmra.mrb[184].mxu1 %v7126_v25  ;;  %v6226_v25 = vld [vmem:[#allocation10] ss:$16 sps:$4 sm:$0xff]  }
 0x288   : > { %3126 = vmatprep.mubr.bf16.mxu0 %v7162_v59  ;;  %3279 = vmatprep.mubr.bf16.mxu1 %v7128_v41  ;;  %v6228_v59 = vld [vmem:[#allocation10 + $0x4] ss:$16 sps:$4 sm:$0xff]  }
 0x289   : > { %v5521_v40 = vpop.f32.mrb[52].mxu0  ;;  %3799 = vmatprep.subr.bf16.mxu1 %v6228_v59 }
 0x28a   : > { %v5627_v22 = vpop.f32.mrb[80].mxu1  ;;  %v5522_v35 = vpop.f32.mrb[53].mxu0  ;;  %3800 = vmatpush1.bf16.msra.mxu1 %v6226_v25  ;;  %v1897_v25 = vld [vmem:[#allocation2 + $0x6a] sm:$0xff] }
 0x28b   : > { %v5523_v51 = vadd.f32 %v5522_v35, %v5521_v40  ;;  %v5628_v27 = vpop.f32.mrb[81].mxu1  ;;  %v5524_v54 = vpop.f32.mrb[54].mxu0  ;;  %3801 = vmatprep.subr.bf16.mxu1 %v6231_v14 }
 0x28c   : > { %v5629_v17 = vadd.f32 %v5628_v27, %v5627_v22  ;;  %v5630_v19 = vpop.f32.mrb[82].mxu1  ;;  %v5525_v61 = vpop.f32.mrb[55].mxu0 }
 0x28d   : > { %v5526_v5 = vadd.f32 %v5525_v61, %v5524_v54  ;;  %v5631_v10 = vpop.f32.mrb[83].mxu1  ;;  %v1794_v54 = vld [vmem:[#allocation2 + $0x198] sm:$0xff] }
 0x28e   : > { %v7214_v36 = vadd.f32 %v5629_v17, %v7103_v31  ;;  %v5632_v62 = vadd.f32 %v5631_v10, %v5630_v19  ;;  %3802 = vmatpush1.bf16.msra.mxu1 %v6229_v11  ;;  %v1894_v19 = vld [vmem:[#allocation2 + $0x4a] sm:$0xff]  ;;  %v1895_v61 = vld [vmem:[#allocation2 + $0x52] sm:$0xff] }
 0x28f   : > { %3127 = vmatmul.mubr.bf16.gmra.mrb[160].mxu0 %v7128_v41  ;;  %3280 = vmatmul.mubr.bf16.gmra.mrb[188].mxu1 %v7142_v18 }
 0x290   : > { %3134 = vmatprep.mubr.bf16.mxu0 %v7175_v48  ;;  %v7220_v60 = vadd.f32 %v5632_v62, %v7106_v52  ;;  %3287 = vmatprep.mubr.bf16.mxu1 %v7144_v3  ;;  %v1896_v62 = vld [vmem:[#allocation2 + $0x62] sm:$0xff] }
 0x292   : > { %v5527_v57 = vpop.f32.mrb[56].mxu0  ;;  %v5633_v16 = vpop.f32.mrb[84].mxu1 }
 0x293   : > { %v5528_v34 = vpop.f32.mrb[57].mxu0  ;;  %v5634_v37 = vpop.f32.mrb[85].mxu1 }
 0x294   : > { %v5529_v31 = vadd.f32 %v5528_v34, %v5527_v57  ;;  %v5530_v26 = vpop.f32.mrb[58].mxu0  ;;  %v5635_v41 = vadd.f32 %v5634_v37, %v5633_v16  ;;  %v5636_v39 = vpop.f32.mrb[86].mxu1  ;;  %v6274_v34 = vld [vmem:[#allocation2 + $0x8] sm:$0xff] }
 0x295   : > { %v5531_v18 = vpop.f32.mrb[59].mxu0  ;;  %v5637_v48 = vpop.f32.mrb[87].mxu1 }
 0x296   : > { %v5532_v43 = vadd.f32 %v5531_v18, %v5530_v26  ;;  %v7223_v12 = vadd.f32 %v5635_v41, %v5523_v51  ;;  %v5638_v44 = vadd.f32 %v5637_v48, %v5636_v39  ;;  %v1926_v39 = vpack.c.bf16 %v1897_v25, %v1896_v62  ;;  %v6232_v48 = vld [vmem:[#allocation10 + $0x40] ss:$16 sps:$4 sm:$0xff]  }
 0x297   : > { %3135 = vmatmul.mubr.bf16.gmra.mrb[164].mxu0 %v7144_v3  ;;  %3288 = vmatmul.mubr.bf16.gmra.mrb[192].mxu1 %v7158_v28  ;;  %v7231_v28 = vpack.c.bf16 %v1730_v63, %v1729_v46  ;;  %v1899_v46 = vld [vmem:[#allocation2 + $0x82] sm:$0xff] }
 0x298   : > { %3142 = vmatprep.mubr.bf16.mxu0 %v7182_v6  ;;  %v7228_v52 = vadd.f32 %v5638_v44, %v5526_v5  ;;  %3295 = vmatprep.mubr.bf16.mxu1 %v7160_v29  ;;  %v6234_v44 = vld [vmem:[#allocation10 + $0x44] ss:$16 sps:$4 sm:$0xff]  }
 0x299   : > { %3803 = vmatprep.subr.bf16.mxu1 %v6234_v44 }
 0x29a   : > { %v5533_v49 = vpop.f32.mrb[60].mxu0  ;;  %v5639_v13 = vpop.f32.mrb[88].mxu1  ;;  %3804 = vmatpush1.bf16.msra.mxu1 %v6232_v48 }
 0x29b   : > { %v5534_v56 = vpop.f32.mrb[61].mxu0  ;;  %v5640_v50 = vpop.f32.mrb[89].mxu1 }
 0x29c   : > { %v5535_v42 = vadd.f32 %v5534_v56, %v5533_v49  ;;  %v5536_v21 = vpop.f32.mrb[62].mxu0  ;;  %v5641_v0 = vadd.f32 %v5640_v50, %v5639_v13  ;;  %v5642_v47 = vpop.f32.mrb[90].mxu1  ;;  %v1898_v56 = vld [vmem:[#allocation2 + $0x7a] sm:$0xff]  ;;  %v1900_v50 = vld [vmem:[#allocation2 + $0x92] sm:$0xff] }
 0x29d   : > { %v5537_v58 = vpop.f32.mrb[63].mxu0  ;;  %v5643_v4 = vpop.f32.mrb[91].mxu1  ;;  %v1927_v11 = vpack.c.bf16 %v1899_v46, %v1898_v56 }
 0x29e   : > { %v5538_v3 = vadd.f32 %v5537_v58, %v5536_v21  ;;  %v7233_v6 = vadd.f32 %v5641_v0, %v5529_v31  ;;  %v5644_v9 = vadd.f32 %v5643_v4, %v5642_v47  ;;  %v1901_v21 = vld [vmem:[#allocation2 + $0x9a] sm:$0xff] }
 0x29f   : > { %3143 = vmatmul.mubr.bf16.gmra.mrb[168].mxu0 %v7160_v29  ;;  %3296 = vmatmul.mubr.bf16.gmra.mrb[196].mxu1 %v7171_v8  ;;  %v1928_v20 = vpack.c.bf16 %v1901_v21, %v1900_v50 }
 0x2a0   : > { %3150 = vmatprep.mubr.bf16.mxu0 %v7231_v28  ;;  %v7238_v15 = vadd.f32 %v5644_v9, %v5532_v43  ;;  %3303 = vmatprep.mubr.bf16.mxu1 %v7173_v45 }
 0x2a2   : > { %v5539_v23 = vpop.f32.mrb[64].mxu0  ;;  %v5645_v24 = vpop.f32.mrb[92].mxu1 }
 0x2a3   : > { %v5540_v2 = vpop.f32.mrb[65].mxu0  ;;  %v5646_v33 = vpop.f32.mrb[93].mxu1 }
 0x2a4   : > { %v5541_v38 = vadd.f32 %v5540_v2, %v5539_v23  ;;  %v5542_v29 = vpop.f32.mrb[66].mxu0  ;;  %v5647_v55 = vadd.f32 %v5646_v33, %v5645_v24  ;;  %v5648_v8 = vpop.f32.mrb[94].mxu1  ;;  %v1902_v33 = vld [vmem:[#allocation2 + $0xaa] sm:$0xff] }
 0x2a5   : > { %v5543_v53 = vpop.f32.mrb[67].mxu0  ;;  %v5649_v22 = vpop.f32.mrb[95].mxu1 }
 0x2a6   : > { %v5544_v40 = vadd.f32 %v5543_v53, %v5542_v29  ;;  %v7241_v35 = vadd.f32 %v5647_v55, %v5535_v42  ;;  %v5650_v51 = vadd.f32 %v5649_v22, %v5648_v8  ;;  %v1903_v29 = vld [vmem:[#allocation2 + $0xb2] sm:$0xff]  ;;  %v1904_v53 = vld [vmem:[#allocation2 + $0xc2] sm:$0xff] }
 0x2a7   : > { %3151 = vmatmul.mubr.bf16.gmra.mrb[172].mxu0 %v7173_v45  ;;  %3304 = vmatmul.mubr.bf16.gmra.mrb[200].mxu1 %v7180_v1  ;;  %v1811_v45 = vpack.c.bf16 %v6274_v34, %v1794_v54 }
 0x2a8   : > { %5987 = vmatprep.mubr.bf16.mxu0 %v7184_v7  ;;  %v7246_v27 = vadd.f32 %v5650_v51, %v5538_v3  ;;  %3311 = vmatprep.mubr.bf16.mxu1 %v1875_v32  ;;  %v1925_v7 = vpack.c.bf16 %v1895_v61, %v1894_v19  ;;  %v1905_v32 = vld [vmem:[#allocation2 + $0xca] sm:$0xff]  ;;  %v1929_v61 = vpack.c.bf16 %v1903_v29, %v1902_v33 }
 0x2a9   : > { %v1930_v62 = vpack.c.bf16 %v1905_v32, %v1904_v53 }
 0x2aa   : > { %v5545_v17 = vpop.f32.mrb[68].mxu0  ;;  %v5651_v5 = vpop.f32.mrb[96].mxu1 }
 0x2ab   : > { %v5546_v10 = vpop.f32.mrb[69].mxu0  ;;  %v5652_v57 = vpop.f32.mrb[97].mxu1 }
 0x2ac   : > { %v5547_v59 = vadd.f32 %v5546_v10, %v5545_v17  ;;  %v5548_v16 = vpop.f32.mrb[70].mxu0  ;;  %v5653_v31 = vadd.f32 %v5652_v57, %v5651_v5  ;;  %v5654_v1 = vpop.f32.mrb[98].mxu1  ;;  %v6235_v57 = vld [vmem:[#allocation10 + $0x60] ss:$16 sps:$4 sm:$0xff]  }
 0x2ad   : > { %v5549_v37 = vpop.f32.mrb[71].mxu0  ;;  %v5655_v41 = vpop.f32.mrb[99].mxu1 }
 0x2ae   : > { %v5550_v26 = vadd.f32 %v5549_v37, %v5548_v16  ;;  %v7248_v18 = vadd.f32 %v5653_v31, %v5541_v38  ;;  %v5656_v43 = vadd.f32 %v5655_v41, %v5654_v1  ;;  %v6237_v16 = vld [vmem:[#allocation10 + $0x64] ss:$16 sps:$4 sm:$0xff]   ;;  %v1906_v31 = vld [vmem:[#allocation2 + $0xda] sm:$0xff] }
 0x2af   : > { %5988 = vmatmul.mubr.bf16.vlgmr.msra.gmra.mrb[176].mxu0 %v1925_v7  ;;  %3312 = vmatmul.mubr.bf16.gmra.mrb[204].mxu1 %v1811_v45  ;;  %v1907_v1 = vld [vmem:[#allocation2 + $0xe2] sm:$0xff]  ;;  %v1909_v41 = vld [vmem:[#allocation2 + $0xfa] sm:$0xff] }
 0x2b0   : > { %5991 = vmatprep.mubr.bf16.mxu0 %v1926_v39  ;;  %v7250_v49 = vadd.f32 %v5656_v43, %v5544_v40  ;;  %3805 = vmatprep.subr.bf16.mxu1 %v6237_v16  ;;  %v1931_v46 = vpack.c.bf16 %v1907_v1, %v1906_v31  ;;  %v1917_v31 = vld [vmem:[#allocation2 + $0x15a] sm:$0xff] }
 0x2b1   : > { %3806 = vmatpush1.bf16.msra.mxu1 %v6235_v57 }
 0x2b2   : > { %v5551_v13 = vpop.f32.mrb[72].mxu0  ;;  %v5657_v63 = vpop.f32.mrb[100].mxu1 }
 0x2b3   : > { %v5552_v42 = vpop.f32.mrb[73].mxu0  ;;  %v5658_v47 = vpop.f32.mrb[101].mxu1 }
 0x2b4   : > { %v5553_v0 = vadd.f32 %v5552_v42, %v5551_v13  ;;  %v5554_v58 = vpop.f32.mrb[74].mxu0  ;;  %v5659_v3 = vadd.f32 %v5658_v47, %v5657_v63  ;;  %v5660_v4 = vpop.f32.mrb[102].mxu1 }
 0x2b5   : > { %v5555_v9 = vpop.f32.mrb[75].mxu0  ;;  %v5661_v23 = vpop.f32.mrb[103].mxu1 }
 0x2b6   : > { %v5556_v14 = vadd.f32 %v5555_v9, %v5554_v58  ;;  %v7252_v30 = vadd.f32 %v5659_v3, %v5547_v59  ;;  %v5662_v24 = vadd.f32 %v5661_v23, %v5660_v4  ;;  %v1910_v3 = vld [vmem:[#allocation2 + $0x10a] sm:$0xff]  ;;  %v1911_v4 = vld [vmem:[#allocation2 + $0x112] sm:$0xff] }
 0x2b7   : > { %5992 = vmatmul.mubr.bf16.gmra.mrb[180].mxu0 %v1927_v11  ;;  %v1913_v23 = vld [vmem:[#allocation2 + $0x12a] sm:$0xff] }
 0x2b8   : > { %5995 = vmatprep.mubr.bf16.mxu0 %v1928_v20  ;;  %v7254_v2 = vadd.f32 %v5662_v24, %v5550_v26  ;;  %v1908_v26 = vld [vmem:[#allocation2 + $0xf2] sm:$0xff] }
 0x2b9   : > { %v1932_v50 = vpack.c.bf16 %v1909_v41, %v1908_v26 }
 0x2ba   : > { %v5557_v38 = vpop.f32.mrb[76].mxu0  ;;  %v5663_v55 = vpop.f32.mrb[104].mxu1 }
 0x2bb   : > { %v5558_v8 = vpop.f32.mrb[77].mxu0  ;;  %v5664_v22 = vpop.f32.mrb[105].mxu1 }
 0x2bc   : > { %v5559_v40 = vadd.f32 %v5558_v8, %v5557_v38  ;;  %v5560_v51 = vpop.f32.mrb[78].mxu0  ;;  %v5665_v54 = vadd.f32 %v5664_v22, %v5663_v55  ;;  %v5666_v17 = vpop.f32.mrb[106].mxu1  ;;  %v1933_v8 = vpack.c.bf16 %v1911_v4, %v1910_v3  ;;  %v1919_v3 = vld [vmem:[#allocation2 + $0x172] sm:$0xff] }
 0x2bd   : > { %v5561_v19 = vpop.f32.mrb[79].mxu0  ;;  %v5667_v10 = vpop.f32.mrb[107].mxu1 }
 0x2be   : > { %v5562_v5 = vadd.f32 %v5561_v19, %v5560_v51  ;;  %v7256_v25 = vadd.f32 %v5665_v54, %v5553_v0  ;;  %v5668_v59 = vadd.f32 %v5667_v10, %v5666_v17  ;;  %v6238_v54 = vld [vmem:[#allocation10 + $0x80] ss:$16 sps:$4 sm:$0xff]   ;;  %v6240_v17 = vld [vmem:[#allocation10 + $0x84] ss:$16 sps:$4 sm:$0xff]   ;;  %v6241_v19 = vld [vmem:[#allocation10 + $0x8] ss:$16 sps:$4 sm:$0xff]  }
 0x2bf   : > { %5996 = vmatmul.mubr.bf16.gmra.mrb[184].mxu0 %v1929_v61  ;;  %3807 = vmatprep.subr.bf16.mxu1 %v6240_v17  ;;  %v6250_v17 = vld [vmem:[#allocation10 + $0x48] ss:$16 sps:$4 sm:$0xff]  }
 0x2c0   : > { %5999 = vmatprep.mubr.bf16.mxu0 %v1930_v62  ;;  %v7258_v34 = vadd.f32 %v5668_v59, %v5556_v14  ;;  %v1912_v14 = vld [vmem:[#allocation2 + $0x122] sm:$0xff]  ;;  %v1914_v62 = vld [vmem:[#allocation2 + $0x13a] sm:$0xff]  ;;  %3808 = vmatpush1.bf16.msra.mxu1 %v6238_v54 }
 0x2c1   : > { %v1915_v59 = vld [vmem:[#allocation2 + $0x142] sm:$0xff] }
 0x2c2   : > { %v5563_v45 = vpop.f32.mrb[80].mxu0  ;;  %v5669_v37 = vpop.f32.mrb[108].mxu1  ;;  %v6249_v54 = vld [vmem:[#allocation10 + $0xa4] ss:$16 sps:$4 sm:$0xff]  }
 0x2c3   : > { %v5564_v7 = vpop.f32.mrb[81].mxu0  ;;  %v5670_v43 = vpop.f32.mrb[109].mxu1  ;;  %3809 = vmatprep.subr.bf16.mxu1 %v6249_v54 }
 0x2c4   : > { %v5565_v39 = vadd.f32 %v5564_v7, %v5563_v45  ;;  %v5566_v48 = vpop.f32.mrb[82].mxu0  ;;  %v5671_v44 = vadd.f32 %v5670_v43, %v5669_v37  ;;  %v5672_v13 = vpop.f32.mrb[110].mxu1  ;;  %v1916_v45 = vld [vmem:[#allocation2 + $0x152] sm:$0xff]  ;;  %v1935_v43 = vpack.c.bf16 %v1915_v59, %v1914_v62 }
 0x2c5   : > { %v5567_v56 = vpop.f32.mrb[83].mxu0  ;;  %v5673_v42 = vpop.f32.mrb[111].mxu1 }
 0x2c6   : > { %v5568_v63 = vadd.f32 %v5567_v56, %v5566_v48  ;;  %v7260_v21 = vadd.f32 %v5671_v44, %v5559_v40  ;;  %v5674_v0 = vadd.f32 %v5673_v42, %v5672_v13  ;;  %v1934_v40 = vpack.c.bf16 %v1913_v23, %v1912_v14  ;;  %v6246_v42 = vld [vmem:[#allocation10 + $0x2c] ss:$16 sps:$4 sm:$0xff]  }
 0x2c7   : > { %6000 = vmatmul.mubr.bf16.gmra.mrb[188].mxu0 %v1931_v46  ;;  %v1936_v13 = vpack.c.bf16 %v1917_v31, %v1916_v45 }
 0x2c8   : > { %6003 = vmatprep.mubr.bf16.mxu0 %v1932_v50  ;;  %v7262_v47 = vadd.f32 %v5674_v0, %v5562_v5  ;;  %v6243_v5 = vld [vmem:[#allocation10 + $0xc] ss:$16 sps:$4 sm:$0xff]  }
 0x2c9   : > { %3992 = vmatprep.subr.bf16.mxu0 %v6243_v5  ;;  %v6252_v5 = vld [vmem:[#allocation10 + $0x4c] ss:$16 sps:$4 sm:$0xff]  }
 0x2ca   : > { %v5569_v58 = vpop.f32.mrb[84].mxu0  ;;  %v5675_v9 = vpop.f32.mrb[112].mxu1  ;;  %3993 = vmatpush1.bf16.msra.mxu0 %v6241_v19 }
 0x2cb   : > { %v5570_v11 = vpop.f32.mrb[85].mxu0  ;;  %v5676_v24 = vpop.f32.mrb[113].mxu1  ;;  %3994 = vmatprep.subr.bf16.mxu0 %v6246_v42 }
 0x2cc   : > { %v5571_v20 = vadd.f32 %v5570_v11, %v5569_v58  ;;  %v5572_v38 = vpop.f32.mrb[86].mxu0  ;;  %v5677_v33 = vadd.f32 %v5676_v24, %v5675_v9  ;;  %v5678_v29 = vpop.f32.mrb[114].mxu1  ;;  %v1918_v58 = vld [vmem:[#allocation2 + $0x16a] sm:$0xff] }
 0x2cd   : > { %v5573_v55 = vpop.f32.mrb[87].mxu0  ;;  %v5679_v32 = vpop.f32.mrb[115].mxu1 }
 0x2ce   : > { %v5574_v53 = vadd.f32 %v5573_v55, %v5572_v38  ;;  %v7264_v22 = vadd.f32 %v5677_v33, %v5565_v39  ;;  %v5680_v51 = vadd.f32 %v5679_v32, %v5678_v29  ;;  %v1937_v33 = vpack.c.bf16 %v1919_v3, %v1918_v58  ;;  %v1922_v32 = vld [vmem:[#allocation2 + $0x19a] sm:$0xff] }
 0x2cf   : > { %6004 = vmatmul.mubr.bf16.gmra.mrb[192].mxu0 %v1933_v8 }
 0x2d0   : > { %6007 = vmatprep.mubr.bf16.mxu0 %v1934_v40  ;;  %v7266_v61 = vadd.f32 %v5680_v51, %v5568_v63  ;;  %v6244_v63 = vld [vmem:[#allocation10 + $0x28] ss:$16 sps:$4 sm:$0xff]   ;;  %v6247_v51 = vld [vmem:[#allocation10 + $0xa0] ss:$16 sps:$4 sm:$0xff]  }
 0x2d1   : > { %3995 = vmatpush1.bf16.msra.mxu0 %v6244_v63  ;;  %v1923_v40 = vld [vmem:[#allocation2 + $0x1a2] sm:$0xff]  ;;  %3810 = vmatpush1.bf16.msra.mxu1 %v6247_v51 }
 0x2d2   : > { %v5575_v10 = vpop.f32.mrb[88].mxu0  ;;  %v5681_v57 = vpop.f32.mrb[116].mxu1  ;;  %3996 = vmatprep.subr.bf16.mxu0 %v6252_v5 }
 0x2d3   : > { %v5576_v16 = vpop.f32.mrb[89].mxu0  ;;  %v5682_v37 = vpop.f32.mrb[117].mxu1 }
 0x2d4   : > { %v5577_v1 = vadd.f32 %v5576_v16, %v5575_v10  ;;  %v5578_v7 = vpop.f32.mrb[90].mxu0  ;;  %v5683_v26 = vadd.f32 %v5682_v37, %v5681_v57  ;;  %v5684_v41 = vpop.f32.mrb[118].mxu1  ;;  %v1939_v57 = vpack.c.bf16 %v1923_v40, %v1922_v32 }
 0x2d5   : > { %v5579_v39 = vpop.f32.mrb[91].mxu0  ;;  %v5685_v44 = vpop.f32.mrb[119].mxu1  ;;  %3997 = vmatpush1.bf16.msra.mxu0 %v6250_v17 }
 0x2d6   : > { %v5580_v48 = vadd.f32 %v5579_v39, %v5578_v7  ;;  %v7268_v56 = vadd.f32 %v5683_v26, %v5571_v20  ;;  %v5686_v46 = vadd.f32 %v5685_v44, %v5684_v41 }
 0x2d7   : > { %6008 = vmatmul.mubr.bf16.gmra.mrb[196].mxu0 %v1935_v43  ;;  %v6253_v43 = vld [vmem:[#allocation10 + $0x68] ss:$16 sps:$4 sm:$0xff]  }
 0x2d8   : > { %6011 = vmatprep.mubr.bf16.mxu0 %v1936_v13  ;;  %v7270_v50 = vadd.f32 %v5686_v46, %v5574_v53 }
 0x2da   : > { %v5581_v0 = vpop.f32.mrb[92].mxu0  ;;  %v5687_v4 = vpop.f32.mrb[120].mxu1 }
 0x2db   : > { %v5582_v9 = vpop.f32.mrb[93].mxu0  ;;  %v5688_v14 = vpop.f32.mrb[121].mxu1 }
 0x2dc   : > { %v5583_v11 = vadd.f32 %v5582_v9, %v5581_v0  ;;  %v5584_v23 = vpop.f32.mrb[94].mxu0  ;;  %v5689_v24 = vadd.f32 %v5688_v14, %v5687_v4  ;;  %v5690_v20 = vpop.f32.mrb[122].mxu1 }
 0x2dd   : > { %v5585_v38 = vpop.f32.mrb[95].mxu0  ;;  %v5691_v55 = vpop.f32.mrb[123].mxu1 }
 0x2de   : > { %v5586_v29 = vadd.f32 %v5585_v38, %v5584_v23  ;;  %v7272_v8 = vadd.f32 %v5689_v24, %v5577_v1  ;;  %v5692_v53 = vadd.f32 %v5691_v55, %v5690_v20  ;;  %v6256_v20 = vld [vmem:[#allocation10 + $0xc0] ss:$16 sps:$4 sm:$0xff]   ;;  %v6258_v38 = vld [vmem:[#allocation10 + $0xc4] ss:$16 sps:$4 sm:$0xff]   ;;  %v6261_v55 = vld [vmem:[#allocation10 + $0x8c] ss:$16 sps:$4 sm:$0xff]  }
 0x2df   : > { %6012 = vmatmul.mubr.bf16.gmra.mrb[200].mxu0 %v1937_v33  ;;  %v6259_v33 = vld [vmem:[#allocation10 + $0x88] ss:$16 sps:$4 sm:$0xff]   ;;  %3811 = vmatprep.subr.bf16.mxu1 %v6258_v38 }
 0x2e0   : > { %6015 = vmatprep.mubr.bf16.mxu0 %v7231_v28  ;;  %v7275_v19 = vadd.f32 %v5692_v53, %v5580_v48  ;;  %v6255_v48 = vld [vmem:[#allocation10 + $0x6c] ss:$16 sps:$4 sm:$0xff]   ;;  %3812 = vmatpush1.bf16.msra.mxu1 %v6256_v20 }
 0x2e1   : > { %3998 = vmatprep.subr.bf16.mxu0 %v6255_v48 }
 0x2e2   : > { %v5587_v10 = vpop.f32.mrb[96].mxu0  ;;  %v5693_v62 = vpop.f32.mrb[124].mxu1  ;;  %3999 = vmatpush1.bf16.msra.mxu0 %v6253_v43 }
 0x2e3   : > { %v5588_v59 = vpop.f32.mrb[97].mxu0  ;;  %v5694_v45 = vpop.f32.mrb[125].mxu1  ;;  %4000 = vmatprep.subr.bf16.mxu0 %v6261_v55 }
 0x2e4   : > { %v5589_v16 = vadd.f32 %v5588_v59, %v5587_v10  ;;  %v5590_v31 = vpop.f32.mrb[98].mxu0  ;;  %v5695_v1 = vadd.f32 %v5694_v45, %v5693_v62  ;;  %v5696_v37 = vpop.f32.mrb[126].mxu1 }
 0x2e5   : > { %v5591_v28 = vpop.f32.mrb[99].mxu0  ;;  %v5697_v26 = vpop.f32.mrb[127].mxu1 }
 0x2e6   : > { %v5592_v7 = vadd.f32 %v5591_v28, %v5590_v31  ;;  %v7277_v41 = vadd.f32 %v5695_v1, %v5583_v11  ;;  %v5698_v39 = vadd.f32 %v5697_v26, %v5696_v37  ;;  %4001 = vmatpush1.bf16.msra.mxu0 %v6259_v33  ;;  %v6262_v31 = vld [vmem:[#allocation10 + $0xa8] ss:$16 sps:$4 sm:$0xff]   ;;  %v6264_v1 = vld [vmem:[#allocation10 + $0xac] ss:$16 sps:$4 sm:$0xff]  }
 0x2e7   : > { %6016 = vmatmul.mubr.bf16.gmra.mrb[204].mxu0 %v1939_v57  ;;  %4002 = vmatprep.subr.bf16.mxu0 %v6264_v1 }
 0x2e8   : > { %v7279_v44 = vadd.f32 %v5698_v39, %v5586_v29 }
 0x2ea   : > { %v5593_v13 = vpop.f32.mrb[100].mxu0  ;;  %v5699_v46 = vpop.f32.mrb[128].mxu1  ;;  %4003 = vmatpush1.bf16.msra.mxu0 %v6262_v31 }
 0x2eb   : > { %v5594_v63 = vpop.f32.mrb[101].mxu0  ;;  %v5700_v0 = vpop.f32.mrb[129].mxu1 }
 0x2ec   : > { %v5595_v42 = vadd.f32 %v5594_v63, %v5593_v13  ;;  %v5596_v58 = vpop.f32.mrb[102].mxu0  ;;  %v5701_v3 = vadd.f32 %v5700_v0, %v5699_v46  ;;  %v5702_v4 = vpop.f32.mrb[130].mxu1 }
 0x2ed   : > { %v5597_v9 = vpop.f32.mrb[103].mxu0  ;;  %v5703_v11 = vpop.f32.mrb[131].mxu1 }
 0x2ee   : > { %v5598_v14 = vadd.f32 %v5597_v9, %v5596_v58  ;;  %v7281_v23 = vadd.f32 %v5701_v3, %v5589_v16  ;;  %v5704_v24 = vadd.f32 %v5703_v11, %v5702_v4  ;;  %v6265_v4 = vld [vmem:[#allocation10 + $0xe0] ss:$16 sps:$4 sm:$0xff]   ;;  %v6267_v9 = vld [vmem:[#allocation10 + $0xe4] ss:$16 sps:$4 sm:$0xff]  }
 0x2ef   : > { %3813 = vmatprep.subr.bf16.mxu1 %v6267_v9 }
 0x2f0   : > { %v7283_v29 = vadd.f32 %v5704_v24, %v5592_v7  ;;  %v6270_v24 = vld [vmem:[#allocation10 + $0xcc] ss:$16 sps:$4 sm:$0xff]   ;;  %3814 = vmatpush1.bf16.msra.mxu1 %v6265_v4 }
 0x2f1   : > { %4004 = vmatprep.subr.bf16.mxu0 %v6270_v24 }
 0x2f2   : > { %v5599_v53 = vpop.f32.mrb[104].mxu0  ;;  %v5705_v32 = vpop.f32.mrb[132].mxu1 }
 0x2f3   : > { %v5600_v40 = vpop.f32.mrb[105].mxu0  ;;  %v5706_v54 = vpop.f32.mrb[133].mxu1 }
 0x2f4   : > { %v5601_v51 = vadd.f32 %v5600_v40, %v5599_v53  ;;  %v5602_v17 = vpop.f32.mrb[106].mxu0  ;;  %v5707_v5 = vadd.f32 %v5706_v54, %v5705_v32  ;;  %v5708_v10 = vpop.f32.mrb[134].mxu1 }
 0x2f5   : > { %v5603_v62 = vpop.f32.mrb[107].mxu0  ;;  %v5709_v57 = vpop.f32.mrb[135].mxu1 }
 0x2f6   : > { %v5604_v59 = vadd.f32 %v5603_v62, %v5602_v17  ;;  %v7285_v16 = vadd.f32 %v5707_v5, %v5595_v42  ;;  %v5710_v45 = vadd.f32 %v5709_v57, %v5708_v10 }
 0x2f8   : > { %v7287_v37 = vadd.f32 %v5710_v45, %v5598_v14  ;;  %v6268_v14 = vld [vmem:[#allocation10 + $0xc8] ss:$16 sps:$4 sm:$0xff]  }
 0x2f9   : > { %4005 = vmatpush1.bf16.msra.mxu0 %v6268_v14  ;;  %v6476_v14 = vmov 0  }
 0x2fa   : > { %v5605_v28 = vpop.f32.mrb[108].mxu0  ;;  %v5711_v7 = vpop.f32.mrb[136].mxu1  ;;  %3831 = vmatprep.mubr.bf16.mxu1 %v6476_v14  ;;  %4024 = vmatprep.mubr.bf16.mxu0 %v6476_v14 }
 0x2fb   : > { %v5606_v26 = vpop.f32.mrb[109].mxu0  ;;  %v5712_v43 = vpop.f32.mrb[137].mxu1 }
 0x2fc   : > { %v5607_v39 = vadd.f32 %v5606_v26, %v5605_v28  ;;  %v5608_v48 = vpop.f32.mrb[110].mxu0  ;;  %v5713_v13 = vadd.f32 %v5712_v43, %v5711_v7  ;;  %v5714_v46 = vpop.f32.mrb[138].mxu1 }
 0x2fd   : > { %v5609_v63 = vpop.f32.mrb[111].mxu0  ;;  %v5715_v58 = vpop.f32.mrb[139].mxu1 }
 0x2fe   : > { %v5610_v0 = vadd.f32 %v5609_v63, %v5608_v48  ;;  %v7289_v42 = vadd.f32 %v5713_v13, %v5601_v51  ;;  %v5716_v3 = vadd.f32 %v5715_v58, %v5714_v46  ;;  %v6273_v48 = vld [vmem:[#allocation10 + $0xec] ss:$16 sps:$4 sm:$0xff]  }
 0x2ff   : > { %4006 = vmatprep.subr.bf16.mxu0 %v6273_v48 }
 0x300   : > { %v7291_v11 = vadd.f32 %v5716_v3, %v5604_v59 }
 0x302   : > { %v5739_v20 = vpop.f32.mrb[112].mxu0  ;;  %v5717_v38 = vpop.f32.mrb[140].mxu1 }
 0x303   : > { %v5740_v33 = vpop.f32.mrb[113].mxu0  ;;  %v5718_v55 = vpop.f32.mrb[141].mxu1 }
 0x304   : > { %v5741_v53 = vadd.f32 %v5740_v33, %v5739_v20  ;;  %v5742_v32 = vpop.f32.mrb[114].mxu0  ;;  %v5719_v40 = vadd.f32 %v5718_v55, %v5717_v38  ;;  %v5720_v51 = vpop.f32.mrb[142].mxu1 }
 0x305   : > { %v5743_v54 = vpop.f32.mrb[115].mxu0  ;;  %v5721_v5 = vpop.f32.mrb[143].mxu1 }
 0x306   : > { %v3033_v17 = vadd.f32 %v5741_v53, %v7214_v36  ;;  %v5744_v10 = vadd.f32 %v5743_v54, %v5742_v32  ;;  %v7294_v62 = vadd.f32 %v5719_v40, %v5607_v39  ;;  %v5722_v59 = vadd.f32 %v5721_v5, %v5720_v51  ;;  %v6271_v36 = vld [vmem:[#allocation10 + $0xe8] ss:$16 sps:$4 sm:$0xff]  }
 0x307   : > { %4007 = vmatpush1.bf16.msra.mxu0 %v6271_v36 }
 0x308   : > { %v3036_v57 = vadd.f32 %v5744_v10, %v7220_v60  ;;  %v7297_v45 = vadd.f32 %v5722_v59, %v5610_v0 }
 0x30a   : > { %v5745_v31 = vpop.f32.mrb[116].mxu0  ;;  %v5851_v1 = vpop.f32.mrb[144].mxu1 }
 0x30b   : > { %v5746_v28 = vpop.f32.mrb[117].mxu0  ;;  %v5852_v26 = vpop.f32.mrb[145].mxu1 }
 0x30c   : > { %v5747_v7 = vadd.f32 %v5746_v28, %v5745_v31  ;;  %v5748_v43 = vpop.f32.mrb[118].mxu0  ;;  %v5853_v13 = vadd.f32 %v5852_v26, %v5851_v1  ;;  %v5854_v46 = vpop.f32.mrb[146].mxu1 }
 0x30d   : > { %v5749_v63 = vpop.f32.mrb[119].mxu0  ;;  %v5855_v3 = vpop.f32.mrb[147].mxu1 }
 0x30e   : > { %v3041_v58 = vadd.f32 %v5747_v7, %v7223_v12  ;;  %v5750_v39 = vadd.f32 %v5749_v63, %v5748_v43  ;;  %v5856_v4 = vadd.f32 %v5855_v3, %v5854_v46  ;;  %v7300_v60 = vadd.f32 %v5853_v13, %v3033_v17 }
 0x310   : > { %v3044_v0 = vadd.f32 %v5750_v39, %v7228_v52  ;;  %v7303_v9 = vadd.f32 %v5856_v4, %v3036_v57 }
 0x312   : > { %v5751_v24 = vpop.f32.mrb[120].mxu0  ;;  %v5857_v20 = vpop.f32.mrb[148].mxu1 }
 0x313   : > { %v5752_v38 = vpop.f32.mrb[121].mxu0  ;;  %v5858_v33 = vpop.f32.mrb[149].mxu1 }
 0x314   : > { %v5753_v12 = vadd.f32 %v5752_v38, %v5751_v24  ;;  %v5754_v55 = vpop.f32.mrb[122].mxu0  ;;  %v5859_v53 = vadd.f32 %v5858_v33, %v5857_v20  ;;  %v5860_v32 = vpop.f32.mrb[150].mxu1 }
 0x315   : > { %v5755_v40 = vpop.f32.mrb[123].mxu0  ;;  %v5861_v52 = vpop.f32.mrb[151].mxu1 }
 0x316   : > { %v3049_v51 = vadd.f32 %v5753_v12, %v7233_v6  ;;  %v5756_v54 = vadd.f32 %v5755_v40, %v5754_v55  ;;  %v5862_v17 = vadd.f32 %v5861_v52, %v5860_v32  ;;  %v7308_v5 = vadd.f32 %v5859_v53, %v3041_v58 }
 0x318   : > { %v3052_v10 = vadd.f32 %v5756_v54, %v7238_v15  ;;  %v7311_v59 = vadd.f32 %v5862_v17, %v3044_v0 }
 0x31a   : > { %v5757_v57 = vpop.f32.mrb[124].mxu0  ;;  %v5863_v31 = vpop.f32.mrb[152].mxu1 }
 0x31b   : > { %v5758_v1 = vpop.f32.mrb[125].mxu0  ;;  %v5864_v7 = vpop.f32.mrb[153].mxu1 }
 0x31c   : > { %v5759_v28 = vadd.f32 %v5758_v1, %v5757_v57  ;;  %v5760_v26 = vpop.f32.mrb[126].mxu0  ;;  %v5865_v43 = vadd.f32 %v5864_v7, %v5863_v31  ;;  %v5866_v48 = vpop.f32.mrb[154].mxu1 }
 0x31d   : > { %v5761_v13 = vpop.f32.mrb[127].mxu0  ;;  %v5867_v63 = vpop.f32.mrb[155].mxu1 }
 0x31e   : > { %v3057_v6 = vadd.f32 %v5759_v28, %v7241_v35  ;;  %v5762_v46 = vadd.f32 %v5761_v13, %v5760_v26  ;;  %v5868_v36 = vadd.f32 %v5867_v63, %v5866_v48  ;;  %v7314_v58 = vadd.f32 %v5865_v43, %v3049_v51 }
 0x320   : > { %v3060_v15 = vadd.f32 %v5762_v46, %v7246_v27  ;;  %v7317_v39 = vadd.f32 %v5868_v36, %v3052_v10 }
 0x322   : > { %v5763_v3 = vpop.f32.mrb[128].mxu0  ;;  %v5869_v4 = vpop.f32.mrb[156].mxu1 }
 0x323   : > { %v5764_v0 = vpop.f32.mrb[129].mxu0  ;;  %v5870_v20 = vpop.f32.mrb[157].mxu1 }
 0x324   : > { %v5765_v24 = vadd.f32 %v5764_v0, %v5763_v3  ;;  %v5766_v38 = vpop.f32.mrb[130].mxu0  ;;  %v5871_v12 = vadd.f32 %v5870_v20, %v5869_v4  ;;  %v5872_v33 = vpop.f32.mrb[158].mxu1 }
 0x325   : > { %v5767_v55 = vpop.f32.mrb[131].mxu0  ;;  %v5873_v32 = vpop.f32.mrb[159].mxu1 }
 0x326   : > { %v3065_v35 = vadd.f32 %v5765_v24, %v7248_v18  ;;  %v5768_v53 = vadd.f32 %v5767_v55, %v5766_v38  ;;  %v5874_v40 = vadd.f32 %v5873_v32, %v5872_v33  ;;  %v7320_v51 = vadd.f32 %v5871_v12, %v3057_v6 }
 0x328   : > { %v3068_v27 = vadd.f32 %v5768_v53, %v7250_v49  ;;  %v7323_v54 = vadd.f32 %v5874_v40, %v3060_v15 }
 0x32a   : > { %v5769_v52 = vpop.f32.mrb[132].mxu0  ;;  %v5875_v17 = vpop.f32.mrb[160].mxu1 }
 0x32b   : > { %v5770_v10 = vpop.f32.mrb[133].mxu0  ;;  %v5876_v31 = vpop.f32.mrb[161].mxu1 }
 0x32c   : > { %v5771_v57 = vadd.f32 %v5770_v10, %v5769_v52  ;;  %v5772_v1 = vpop.f32.mrb[134].mxu0  ;;  %v5877_v28 = vadd.f32 %v5876_v31, %v5875_v17  ;;  %v5878_v7 = vpop.f32.mrb[162].mxu1 }
 0x32d   : > { %v5773_v26 = vpop.f32.mrb[135].mxu0  ;;  %v5879_v48 = vpop.f32.mrb[163].mxu1 }
 0x32e   : > { %v3073_v18 = vadd.f32 %v5771_v57, %v7252_v30  ;;  %v5774_v43 = vadd.f32 %v5773_v26, %v5772_v1  ;;  %v5880_v13 = vadd.f32 %v5879_v48, %v5878_v7  ;;  %v7326_v6 = vadd.f32 %v5877_v28, %v3065_v35 }
 0x330   : > { %v3076_v49 = vadd.f32 %v5774_v43, %v7254_v2  ;;  %v7329_v46 = vadd.f32 %v5880_v13, %v3068_v27 }
 0x332   : > { %v5775_v63 = vpop.f32.mrb[136].mxu0  ;;  %v5881_v36 = vpop.f32.mrb[164].mxu1 }
 0x333   : > { %v5776_v15 = vpop.f32.mrb[137].mxu0  ;;  %v5882_v4 = vpop.f32.mrb[165].mxu1 }
 0x334   : > { %v5777_v3 = vadd.f32 %v5776_v15, %v5775_v63  ;;  %v5778_v0 = vpop.f32.mrb[138].mxu0  ;;  %v5883_v24 = vadd.f32 %v5882_v4, %v5881_v36  ;;  %v5884_v20 = vpop.f32.mrb[166].mxu1 }
 0x335   : > { %v5779_v38 = vpop.f32.mrb[139].mxu0  ;;  %v5885_v33 = vpop.f32.mrb[167].mxu1 }
 0x336   : > { %v3081_v30 = vadd.f32 %v5777_v3, %v7256_v25  ;;  %v5780_v12 = vadd.f32 %v5779_v38, %v5778_v0  ;;  %v5886_v55 = vadd.f32 %v5885_v33, %v5884_v20  ;;  %v7332_v35 = vadd.f32 %v5883_v24, %v3073_v18 }
 0x338   : > { %v3084_v2 = vadd.f32 %v5780_v12, %v7258_v34  ;;  %v7335_v53 = vadd.f32 %v5886_v55, %v3076_v49 }
 0x33a   : > { %v5781_v32 = vpop.f32.mrb[140].mxu0  ;;  %v5887_v40 = vpop.f32.mrb[168].mxu1 }
 0x33b   : > { %v5782_v27 = vpop.f32.mrb[141].mxu0  ;;  %v5888_v17 = vpop.f32.mrb[169].mxu1 }
 0x33c   : > { %v5783_v52 = vadd.f32 %v5782_v27, %v5781_v32  ;;  %v5784_v10 = vpop.f32.mrb[142].mxu0  ;;  %v5889_v57 = vadd.f32 %v5888_v17, %v5887_v40  ;;  %v5890_v31 = vpop.f32.mrb[170].mxu1 }
 0x33d   : > { %v5785_v1 = vpop.f32.mrb[143].mxu0  ;;  %v5891_v7 = vpop.f32.mrb[171].mxu1 }
 0x33e   : > { %v3089_v25 = vadd.f32 %v5783_v52, %v7260_v21  ;;  %v5786_v28 = vadd.f32 %v5785_v1, %v5784_v10  ;;  %v5892_v26 = vadd.f32 %v5891_v7, %v5890_v31  ;;  %v7338_v18 = vadd.f32 %v5889_v57, %v3081_v30 }
 0x340   : > { %v3092_v34 = vadd.f32 %v5786_v28, %v7262_v47  ;;  %v7341_v43 = vadd.f32 %v5892_v26, %v3084_v2 }
 0x342   : > { %v5787_v48 = vpop.f32.mrb[144].mxu0  ;;  %v5893_v13 = vpop.f32.mrb[172].mxu1 }
 0x343   : > { %v5788_v49 = vpop.f32.mrb[145].mxu0  ;;  %v5894_v36 = vpop.f32.mrb[173].mxu1 }
 0x344   : > { %v5789_v63 = vadd.f32 %v5788_v49, %v5787_v48  ;;  %v5790_v15 = vpop.f32.mrb[146].mxu0  ;;  %v5895_v3 = vadd.f32 %v5894_v36, %v5893_v13  ;;  %v5896_v4 = vpop.f32.mrb[174].mxu1 }
 0x345   : > { %v5791_v0 = vpop.f32.mrb[147].mxu0  ;;  %v5897_v20 = vpop.f32.mrb[175].mxu1 }
 0x346   : > { %v3097_v21 = vadd.f32 %v5789_v63, %v7264_v22  ;;  %v5792_v24 = vadd.f32 %v5791_v0, %v5790_v15  ;;  %v5898_v38 = vadd.f32 %v5897_v20, %v5896_v4  ;;  %v7344_v30 = vadd.f32 %v5895_v3, %v3089_v25 }
 0x348   : > { %v3100_v47 = vadd.f32 %v5792_v24, %v7266_v61  ;;  %v7347_v12 = vadd.f32 %v5898_v38, %v3092_v34 }
 0x34a   : > { %v5793_v33 = vpop.f32.mrb[148].mxu0  ;;  %v5899_v55 = vpop.f32.mrb[176].mxu1 }
 0x34b   : > { %v5794_v2 = vpop.f32.mrb[149].mxu0  ;;  %v5900_v40 = vpop.f32.mrb[177].mxu1 }
 0x34c   : > { %v5795_v32 = vadd.f32 %v5794_v2, %v5793_v33  ;;  %v5796_v27 = vpop.f32.mrb[150].mxu0  ;;  %v5901_v52 = vadd.f32 %v5900_v40, %v5899_v55  ;;  %v5902_v17 = vpop.f32.mrb[178].mxu1 }
 0x34d   : > { %v5797_v10 = vpop.f32.mrb[151].mxu0  ;;  %v5903_v31 = vpop.f32.mrb[179].mxu1 }
 0x34e   : > { %v3105_v22 = vadd.f32 %v5795_v32, %v7268_v56  ;;  %v5798_v57 = vadd.f32 %v5797_v10, %v5796_v27  ;;  %v5904_v1 = vadd.f32 %v5903_v31, %v5902_v17  ;;  %v7350_v25 = vadd.f32 %v5901_v52, %v3097_v21 }
 0x350   : > { %v3108_v61 = vadd.f32 %v5798_v57, %v7270_v50  ;;  %v7353_v28 = vadd.f32 %v5904_v1, %v3100_v47 }
 0x352   : > { %v5799_v7 = vpop.f32.mrb[152].mxu0  ;;  %v5905_v26 = vpop.f32.mrb[180].mxu1 }
 0x353   : > { %v5800_v34 = vpop.f32.mrb[153].mxu0  ;;  %v5906_v13 = vpop.f32.mrb[181].mxu1 }
 0x354   : > { %v5801_v48 = vadd.f32 %v5800_v34, %v5799_v7  ;;  %v5802_v49 = vpop.f32.mrb[154].mxu0  ;;  %v5907_v63 = vadd.f32 %v5906_v13, %v5905_v26  ;;  %v5908_v36 = vpop.f32.mrb[182].mxu1 }
 0x355   : > { %v5803_v15 = vpop.f32.mrb[155].mxu0  ;;  %v5909_v4 = vpop.f32.mrb[183].mxu1 }
 0x356   : > { %v3113_v56 = vadd.f32 %v5801_v48, %v7272_v8  ;;  %v5804_v3 = vadd.f32 %v5803_v15, %v5802_v49  ;;  %v5910_v0 = vadd.f32 %v5909_v4, %v5908_v36  ;;  %v7356_v21 = vadd.f32 %v5907_v63, %v3105_v22 }
 0x358   : > { %v3116_v50 = vadd.f32 %v5804_v3, %v7275_v19  ;;  %v7359_v24 = vadd.f32 %v5910_v0, %v3108_v61 }
 0x35a   : > { %v5805_v20 = vpop.f32.mrb[156].mxu0  ;;  %v5911_v38 = vpop.f32.mrb[184].mxu1 }
 0x35b   : > { %v5806_v47 = vpop.f32.mrb[157].mxu0  ;;  %v5912_v55 = vpop.f32.mrb[185].mxu1 }
 0x35c   : > { %v5807_v33 = vadd.f32 %v5806_v47, %v5805_v20  ;;  %v5808_v2 = vpop.f32.mrb[158].mxu0  ;;  %v5913_v32 = vadd.f32 %v5912_v55, %v5911_v38  ;;  %v5914_v40 = vpop.f32.mrb[186].mxu1 }
 0x35d   : > { %v5809_v27 = vpop.f32.mrb[159].mxu0  ;;  %v5915_v17 = vpop.f32.mrb[187].mxu1 }
 0x35e   : > { %v3121_v8 = vadd.f32 %v5807_v33, %v7277_v41  ;;  %v5810_v52 = vadd.f32 %v5809_v27, %v5808_v2  ;;  %v5916_v10 = vadd.f32 %v5915_v17, %v5914_v40  ;;  %v7362_v22 = vadd.f32 %v5913_v32, %v3113_v56 }
 0x360   : > { %v3124_v19 = vadd.f32 %v5810_v52, %v7279_v44  ;;  %v7365_v57 = vadd.f32 %v5916_v10, %v3116_v50 }
 0x362   : > { %v5811_v31 = vpop.f32.mrb[160].mxu0  ;;  %v5917_v1 = vpop.f32.mrb[188].mxu1 }
 0x363   : > { %v5812_v61 = vpop.f32.mrb[161].mxu0  ;;  %v5918_v26 = vpop.f32.mrb[189].mxu1 }
 0x364   : > { %v5813_v7 = vadd.f32 %v5812_v61, %v5811_v31  ;;  %v5814_v34 = vpop.f32.mrb[162].mxu0  ;;  %v5919_v48 = vadd.f32 %v5918_v26, %v5917_v1  ;;  %v5920_v13 = vpop.f32.mrb[190].mxu1 }
 0x365   : > { %v5815_v49 = vpop.f32.mrb[163].mxu0  ;;  %v5921_v36 = vpop.f32.mrb[191].mxu1 }
 0x366   : > { %v3129_v41 = vadd.f32 %v5813_v7, %v7281_v23  ;;  %v5816_v63 = vadd.f32 %v5815_v49, %v5814_v34  ;;  %v5922_v15 = vadd.f32 %v5921_v36, %v5920_v13  ;;  %v7368_v56 = vadd.f32 %v5919_v48, %v3121_v8 }
 0x368   : > { %v3132_v44 = vadd.f32 %v5816_v63, %v7283_v29  ;;  %v7371_v3 = vadd.f32 %v5922_v15, %v3124_v19 }
 0x36a   : > { %v5817_v4 = vpop.f32.mrb[164].mxu0  ;;  %v5923_v0 = vpop.f32.mrb[192].mxu1 }
 0x36b   : > { %v5818_v50 = vpop.f32.mrb[165].mxu0  ;;  %v5924_v38 = vpop.f32.mrb[193].mxu1 }
 0x36c   : > { %v5819_v20 = vadd.f32 %v5818_v50, %v5817_v4  ;;  %v5820_v47 = vpop.f32.mrb[166].mxu0  ;;  %v5925_v33 = vadd.f32 %v5924_v38, %v5923_v0  ;;  %v5926_v55 = vpop.f32.mrb[194].mxu1 }
 0x36d   : > { %v5821_v2 = vpop.f32.mrb[167].mxu0  ;;  %v5927_v40 = vpop.f32.mrb[195].mxu1 }
 0x36e   : > { %v3137_v23 = vadd.f32 %v5819_v20, %v7285_v16  ;;  %v5822_v32 = vadd.f32 %v5821_v2, %v5820_v47  ;;  %v5928_v27 = vadd.f32 %v5927_v40, %v5926_v55  ;;  %v7374_v8 = vadd.f32 %v5925_v33, %v3129_v41 }
 0x370   : > { %v3140_v29 = vadd.f32 %v5822_v32, %v7287_v37  ;;  %v7377_v52 = vadd.f32 %v5928_v27, %v3132_v44  ;;  %v7394_v27 = vld [vmem:[%s8146_s6] ss:$0 sm:$0xff] }
 0x372   : > { %v5823_v17 = vpop.f32.mrb[168].mxu0  ;;  %v5929_v10 = vpop.f32.mrb[196].mxu1 }
 0x373   : > { %v5824_v19 = vpop.f32.mrb[169].mxu0  ;;  %v5930_v1 = vpop.f32.mrb[197].mxu1 }
 0x374   : > { %v5825_v31 = vadd.f32 %v5824_v19, %v5823_v17  ;;  %v5826_v61 = vpop.f32.mrb[170].mxu0  ;;  %v5931_v7 = vadd.f32 %v5930_v1, %v5929_v10  ;;  %v5932_v26 = vpop.f32.mrb[198].mxu1 }
 0x375   : > { %v5827_v34 = vpop.f32.mrb[171].mxu0  ;;  %v5933_v13 = vpop.f32.mrb[199].mxu1 }
 0x376   : > { %v3145_v16 = vadd.f32 %v5825_v31, %v7289_v42  ;;  %v5828_v48 = vadd.f32 %v5827_v34, %v5826_v61  ;;  %v5934_v49 = vadd.f32 %v5933_v13, %v5932_v26  ;;  %v7380_v41 = vadd.f32 %v5931_v7, %v3137_v23 }
 0x378   : > { %v3148_v37 = vadd.f32 %v5828_v48, %v7291_v11  ;;  %v7383_v63 = vadd.f32 %v5934_v49, %v3140_v29 }
 0x37a   : > { %v5829_v36 = vpop.f32.mrb[172].mxu0  ;;  %v5935_v15 = vpop.f32.mrb[200].mxu1 }
 0x37b   : > { %v5830_v44 = vpop.f32.mrb[173].mxu0  ;;  %v5936_v0 = vpop.f32.mrb[201].mxu1 }
 0x37c   : > { %v5831_v4 = vadd.f32 %v5830_v44, %v5829_v36  ;;  %v5832_v50 = vpop.f32.mrb[174].mxu0  ;;  %v5937_v20 = vadd.f32 %v5936_v0, %v5935_v15  ;;  %v5938_v38 = vpop.f32.mrb[202].mxu1 }
 0x37d   : > { %v5833_v47 = vpop.f32.mrb[175].mxu0  ;;  %v5939_v55 = vpop.f32.mrb[203].mxu1 }
 0x37e   : > { %v3153_v42 = vadd.f32 %v5831_v4, %v7294_v62  ;;  %v5834_v33 = vadd.f32 %v5833_v47, %v5832_v50  ;;  %v5940_v2 = vadd.f32 %v5939_v55, %v5938_v38  ;;  %v7386_v23 = vadd.f32 %v5937_v20, %v3145_v16  ;;  %v7400_v62 = vld [vmem:[%s8147_s7] ss:$0 sm:$0xff] }
 0x380   : > { %v3156_v11 = vadd.f32 %v5834_v33, %v7297_v45  ;;  %v7389_v32 = vadd.f32 %v5940_v2, %v3148_v37 }
 0x382   : > { %v5989_v40 = vpop.f32.mrb[176].mxu0  ;;  %v5941_v29 = vpop.f32.mrb[204].mxu1 }
 0x383   : > { %v3363_v17 = vadd.f32 %v5989_v40, %v7308_v5  ;;  %v3354_v10 = vpop.f32.mrb[177].mxu0  ;;  %v5942_v19 = vpop.f32.mrb[205].mxu1 }
 0x384   : > { %v3355_v45 = vadd.f32 %v3354_v10, %v7300_v60  ;;  %v5990_v31 = vpop.f32.mrb[178].mxu0  ;;  %v5943_v61 = vadd.f32 %v5942_v19, %v5941_v29  ;;  %v5944_v7 = vpop.f32.mrb[206].mxu1 }
 0x385   : > { %v3490_v1 = vmul.f32 %v7394_v27, %v3363_v17  ;;  %v3366_v26 = vadd.f32 %v5990_v31, %v7311_v59  ;;  %v3357_v34 = vpop.f32.mrb[179].mxu0  ;;  %v5945_v5 = vpop.f32.mrb[207].mxu1 }
 0x386   : > { %v3488_v16 = vmul.f32 %v7394_v27, %v3355_v45  ;;  %v3358_v48 = vadd.f32 %v3357_v34, %v7303_v9  ;;  %v5946_v37 = vadd.f32 %v5945_v5, %v5944_v7  ;;  %v7409_v36 = vadd.f32 %v5943_v61, %v3153_v42 }
 0x387   : > { %v3529_v13 = vadd.f32 %v7400_v62, %v3490_v1  ;;  %v3491_v49 = vmul.f32 %v7394_v27, %v3366_v26 }
 0x388   : > { %v3527_v60 = vadd.f32 %v7400_v62, %v3488_v16  ;;  %v3489_v15 = vmul.f32 %v7394_v27, %v3358_v48  ;;  %v7414_v59 = vadd.f32 %v5946_v37, %v3156_v11 }
 0x389   : > { %v3530_v44 = vadd.f32 %v7400_v62, %v3491_v49  ;;  %v3561_v50 = vmax.f32 %v3529_v13, 0.0 }
 0x38a   : > { %v3528_v4 = vadd.f32 %v7400_v62, %v3489_v15  ;;  %v5993_v0 = vpop.f32.mrb[180].mxu0  ;;  %v3559_v47 = vmax.f32 %v3527_v60, 0.0 }
 0x38b   : > { %v3562_v9 = vmax.f32 %v3530_v44, 0.0  ;;  %v3379_v20 = vadd.f32 %v5993_v0, %v7320_v51  ;;  %v3370_v38 = vpop.f32.mrb[181].mxu0 }
 0x38c   : > { %v3560_v33 = vmax.f32 %v3528_v4, 0.0  ;;  %v3371_v42 = vadd.f32 %v3370_v38, %v7314_v58  ;;  %v5994_v55 = vpop.f32.mrb[182].mxu0 }
 0x38d   : > { %v3494_v2 = vmul.f32 %v7394_v27, %v3379_v20  ;;  %v3382_v40 = vadd.f32 %v5994_v55, %v7323_v54  ;;  %v3373_v29 = vpop.f32.mrb[183].mxu0  ;;  %v3592_v11 = vpack.c.bf16 %v3562_v9, %v3561_v50 }
 0x38e   : > { %v3591_v17 = vpack.c.bf16 %v3560_v33, %v3559_v47  ;;  %v3492_v10 = vmul.f32 %v7394_v27, %v3371_v42  ;;  %v3374_v19 = vadd.f32 %v3373_v29, %v7317_v39 }
 0x38f   : > { %v3533_v45 = vadd.f32 %v7400_v62, %v3494_v2  ;;  %v3495_v51 = vmul.f32 %v7394_v27, %v3382_v40 }
 0x390   : > { %v3531_v31 = vadd.f32 %v7400_v62, %v3492_v10  ;;  %v3493_v58 = vmul.f32 %v7394_v27, %v3374_v19  ;;  %3832 = vmatmul.mubr.bf16.vlgmr.msra.gmra.mrb[208].mxu1 %v3591_v17  ;;  %4025 = vmatmul.mubr.bf16.vlgmr.msra.gmra.mrb[208].mxu0 %v3591_v17 }
 0x391   : > { %v3534_v1 = vadd.f32 %v7400_v62, %v3495_v51  ;;  %3841 = vmatprep.mubr.bf16.mxu1 %v6476_v14  ;;  %4034 = vmatprep.mubr.bf16.mxu0 %v6476_v14  ;;  %v3565_v39 = vmax.f32 %v3533_v45, 0.0 }
 0x392   : > { %v3532_v54 = vadd.f32 %v7400_v62, %v3493_v58  ;;  %v5997_v61 = vpop.f32.mrb[184].mxu0  ;;  %v3563_v16 = vmax.f32 %v3531_v31, 0.0 }
 0x393   : > { %v3566_v7 = vmax.f32 %v3534_v1, 0.0  ;;  %v3395_v26 = vadd.f32 %v5997_v61, %v7332_v35  ;;  %v3386_v34 = vpop.f32.mrb[185].mxu0 }
 0x394   : > { %v3564_v5 = vmax.f32 %v3532_v54, 0.0  ;;  %v3387_v48 = vadd.f32 %v3386_v34, %v7326_v6  ;;  %v5998_v13 = vpop.f32.mrb[186].mxu0 }
 0x395   : > { %v3498_v49 = vmul.f32 %v7394_v27, %v3395_v26  ;;  %v3398_v37 = vadd.f32 %v5998_v13, %v7335_v53  ;;  %v3389_v60 = vpop.f32.mrb[187].mxu0  ;;  %v3594_v15 = vpack.c.bf16 %v3566_v7, %v3565_v39 }
 0x396   : > { %v3496_v44 = vmul.f32 %v7394_v27, %v3387_v48  ;;  %v3390_v4 = vadd.f32 %v3389_v60, %v7329_v46  ;;  %v3593_v0 = vpack.c.bf16 %v3564_v5, %v3563_v16 }
 0x397   : > { %v3537_v50 = vadd.f32 %v7400_v62, %v3498_v49  ;;  %v3499_v35 = vmul.f32 %v7394_v27, %v3398_v37 }
 0x398   : > { %v3535_v9 = vadd.f32 %v7400_v62, %v3496_v44  ;;  %v3497_v6 = vmul.f32 %v7394_v27, %v3390_v4  ;;  %3842 = vmatmul.mubr.bf16.gmra.mrb[212].mxu1 %v3592_v11  ;;  %4035 = vmatmul.mubr.bf16.gmra.mrb[212].mxu0 %v3592_v11 }
 0x399   : > { %v3538_v20 = vadd.f32 %v7400_v62, %v3499_v35  ;;  %3851 = vmatprep.mubr.bf16.mxu1 %v6476_v14  ;;  %4044 = vmatprep.mubr.bf16.mxu0 %v6476_v14  ;;  %v3569_v38 = vmax.f32 %v3537_v50, 0.0 }
 0x39a   : > { %v3536_v53 = vadd.f32 %v7400_v62, %v3497_v6  ;;  %v6001_v46 = vpop.f32.mrb[188].mxu0  ;;  %v3567_v55 = vmax.f32 %v3535_v9, 0.0 }
 0x39b   : > { %v3570_v47 = vmax.f32 %v3538_v20, 0.0  ;;  %v3411_v33 = vadd.f32 %v6001_v46, %v7344_v30  ;;  %v3402_v42 = vpop.f32.mrb[189].mxu0 }
 0x39c   : > { %v3568_v2 = vmax.f32 %v3536_v53, 0.0  ;;  %v3403_v40 = vadd.f32 %v3402_v42, %v7338_v18  ;;  %v6002_v29 = vpop.f32.mrb[190].mxu0 }
 0x39d   : > { %v3502_v11 = vmul.f32 %v7394_v27, %v3411_v33  ;;  %v3414_v17 = vadd.f32 %v6002_v29, %v7347_v12  ;;  %v3405_v10 = vpop.f32.mrb[191].mxu0  ;;  %v7449_v19 = vpack.c.bf16 %v3570_v47, %v3569_v38 }
 0x39e   : > { %v3500_v45 = vmul.f32 %v7394_v27, %v3403_v40  ;;  %v3406_v51 = vadd.f32 %v3405_v10, %v7341_v43  ;;  %v3595_v31 = vpack.c.bf16 %v3568_v2, %v3567_v55 }
 0x39f   : > { %v3541_v30 = vadd.f32 %v7400_v62, %v3502_v11  ;;  %v3503_v58 = vmul.f32 %v7394_v27, %v3414_v17 }
 0x3a0   : > { %v3539_v1 = vadd.f32 %v7400_v62, %v3500_v45  ;;  %v3501_v18 = vmul.f32 %v7394_v27, %v3406_v51  ;;  %3852 = vmatmul.mubr.bf16.gmra.mrb[216].mxu1 %v3593_v0  ;;  %4045 = vmatmul.mubr.bf16.gmra.mrb[216].mxu0 %v3593_v0 }
 0x3a1   : > { %v3542_v12 = vadd.f32 %v7400_v62, %v3503_v58  ;;  %3861 = vmatprep.mubr.bf16.mxu1 %v6476_v14  ;;  %4054 = vmatprep.mubr.bf16.mxu0 %v6476_v14  ;;  %v3573_v61 = vmax.f32 %v3541_v30, 0.0 }
 0x3a2   : > { %v3540_v54 = vadd.f32 %v7400_v62, %v3501_v18  ;;  %v6005_v43 = vpop.f32.mrb[192].mxu0  ;;  %v3571_v34 = vmax.f32 %v3539_v1, 0.0 }
 0x3a3   : > { %v3574_v39 = vmax.f32 %v3542_v12, 0.0  ;;  %v3427_v7 = vadd.f32 %v6005_v43, %v7356_v21  ;;  %v3418_v26 = vpop.f32.mrb[193].mxu0 }
 0x3a4   : > { %v3572_v16 = vmax.f32 %v3540_v54, 0.0  ;;  %v3419_v5 = vadd.f32 %v3418_v26, %v7350_v25  ;;  %v6006_v48 = vpop.f32.mrb[194].mxu0 }
 0x3a5   : > { %v3506_v13 = vmul.f32 %v7394_v27, %v3427_v7  ;;  %v3430_v49 = vadd.f32 %v6006_v48, %v7359_v24  ;;  %v3421_v37 = vpop.f32.mrb[195].mxu0  ;;  %v7465_v60 = vpack.c.bf16 %v3574_v39, %v3573_v61 }
 0x3a6   : > { %v3504_v44 = vmul.f32 %v7394_v27, %v3419_v5  ;;  %v3422_v4 = vadd.f32 %v3421_v37, %v7353_v28  ;;  %v7469_v0 = vpack.c.bf16 %v3572_v16, %v3571_v34 }
 0x3a7   : > { %v3545_v21 = vadd.f32 %v7400_v62, %v3506_v13  ;;  %v3507_v50 = vmul.f32 %v7394_v27, %v3430_v49 }
 0x3a8   : > { %v3543_v25 = vadd.f32 %v7400_v62, %v3504_v44  ;;  %v3505_v35 = vmul.f32 %v7394_v27, %v3422_v4  ;;  %3862 = vmatmul.mubr.bf16.gmra.mrb[220].mxu1 %v3594_v15  ;;  %4055 = vmatmul.mubr.bf16.gmra.mrb[220].mxu0 %v3594_v15 }
 0x3a9   : > { %v3546_v24 = vadd.f32 %v7400_v62, %v3507_v50  ;;  %3871 = vmatprep.mubr.bf16.mxu1 %v6476_v14  ;;  %4064 = vmatprep.mubr.bf16.mxu0 %v6476_v14  ;;  %v3577_v6 = vmax.f32 %v3545_v21, 0.0 }
 0x3aa   : > { %v3544_v28 = vadd.f32 %v7400_v62, %v3505_v35  ;;  %v6009_v9 = vpop.f32.mrb[196].mxu0  ;;  %v3575_v38 = vmax.f32 %v3543_v25, 0.0 }
 0x3ab   : > { %v3578_v20 = vmax.f32 %v3546_v24, 0.0  ;;  %v3443_v53 = vadd.f32 %v6009_v9, %v7368_v56  ;;  %v3434_v46 = vpop.f32.mrb[197].mxu0 }
 0x3ac   : > { %v3576_v47 = vmax.f32 %v3544_v28, 0.0  ;;  %v3435_v33 = vadd.f32 %v3434_v46, %v7362_v22  ;;  %v6010_v42 = vpop.f32.mrb[198].mxu0 }
 0x3ad   : > { %v3510_v15 = vmul.f32 %v7394_v27, %v3443_v53  ;;  %v3446_v55 = vadd.f32 %v6010_v42, %v7371_v3  ;;  %v3437_v2 = vpop.f32.mrb[199].mxu0  ;;  %v7483_v40 = vpack.c.bf16 %v3578_v20, %v3577_v6 }
 0x3ae   : > { %v3508_v29 = vmul.f32 %v7394_v27, %v3435_v33  ;;  %v3438_v11 = vadd.f32 %v3437_v2, %v7365_v57  ;;  %v7487_v17 = vpack.c.bf16 %v3576_v47, %v3575_v38 }
 0x3af   : > { %v3549_v56 = vadd.f32 %v7400_v62, %v3510_v15  ;;  %v3511_v10 = vmul.f32 %v7394_v27, %v3446_v55 }
 0x3b0   : > { %v3547_v22 = vadd.f32 %v7400_v62, %v3508_v29  ;;  %v3509_v45 = vmul.f32 %v7394_v27, %v3438_v11  ;;  %3872 = vmatmul.mubr.bf16.gmra.mrb[224].mxu1 %v3595_v31  ;;  %4065 = vmatmul.mubr.bf16.gmra.mrb[224].mxu0 %v3595_v31 }
 0x3b1   : > { %v3550_v3 = vadd.f32 %v7400_v62, %v3511_v10  ;;  %3881 = vmatprep.mubr.bf16.mxu1 %v6476_v14  ;;  %4074 = vmatprep.mubr.bf16.mxu0 %v6476_v14  ;;  %v3581_v30 = vmax.f32 %v3549_v56, 0.0  ;;  %v4335_v56 = vld [vmem:[%s8175_s19] sm:$0xf] }
 0x3b2   : > { %v3548_v57 = vadd.f32 %v7400_v62, %v3509_v45  ;;  %v6013_v51 = vpop.f32.mrb[200].mxu0  ;;  %v3579_v12 = vmax.f32 %v3547_v22, 0.0 }
 0x3b3   : > { %v3582_v58 = vmax.f32 %v3550_v3, 0.0  ;;  %v3459_v1 = vadd.f32 %v6013_v51, %v7380_v41  ;;  %v3450_v18 = vpop.f32.mrb[201].mxu0 }
 0x3b4   : > { %v3580_v54 = vmax.f32 %v3548_v57, 0.0  ;;  %v3451_v43 = vadd.f32 %v3450_v18, %v7374_v8  ;;  %v6014_v61 = vpop.f32.mrb[202].mxu0 }
 0x3b5   : > { %v3514_v31 = vmul.f32 %v7394_v27, %v3459_v1  ;;  %v3462_v39 = vadd.f32 %v6014_v61, %v7383_v63  ;;  %v3453_v7 = vpop.f32.mrb[203].mxu0  ;;  %v3602_v26 = vpack.c.bf16 %v3582_v58, %v3581_v30  ;;  %v4485_v61 = vld [vmem:[%s6734_s24] sm:$0xff] }
 0x3b6   : > { %v3512_v34 = vmul.f32 %v7394_v27, %v3451_v43  ;;  %v3454_v16 = vadd.f32 %v3453_v7, %v7377_v52  ;;  %v3601_v5 = vpack.c.bf16 %v3580_v54, %v3579_v12 }
 0x3b7   : > { %v3553_v48 = vadd.f32 %v7400_v62, %v3514_v31  ;;  %v3515_v41 = vmul.f32 %v7394_v27, %v3462_v39  ;;  %v4487_v31 = vld [vmem:[%s6734_s24 + $0x10] sm:$0xff] }
 0x3b8   : > { %v3551_v13 = vadd.f32 %v7400_v62, %v3512_v34  ;;  %v3513_v8 = vmul.f32 %v7394_v27, %v3454_v16  ;;  %3882 = vmatmul.mubr.bf16.gmra.mrb[228].mxu1 %v7449_v19  ;;  %4075 = vmatmul.mubr.bf16.gmra.mrb[228].mxu0 %v7449_v19 }
 0x3b9   : > { %v3554_v63 = vadd.f32 %v7400_v62, %v3515_v41  ;;  %3891 = vmatprep.mubr.bf16.mxu1 %v6476_v14  ;;  %4084 = vmatprep.mubr.bf16.mxu0 %v6476_v14  ;;  %v3585_v37 = vmax.f32 %v3553_v48, 0.0  ;;  %v4486_v48 = vld [vmem:[%s6734_s24 + $0x8] sm:$0xff]  ;;  %v4488_v41 = vld [vmem:[%s6734_s24 + $0x18] sm:$0xff] }
 0x3ba   : > { %v3552_v52 = vadd.f32 %v7400_v62, %v3513_v8  ;;  %v6017_v49 = vpop.f32.mrb[204].mxu0  ;;  %v3583_v50 = vmax.f32 %v3551_v13, 0.0 }
 0x3bb   : > { %v3586_v44 = vmax.f32 %v3554_v63, 0.0  ;;  %v3475_v4 = vadd.f32 %v6017_v49, %v7409_v36  ;;  %v3466_v21 = vpop.f32.mrb[205].mxu0 }
 0x3bc   : > { %v3584_v25 = vmax.f32 %v3552_v52, 0.0  ;;  %v3467_v35 = vadd.f32 %v3466_v21, %v7386_v23  ;;  %v6018_v24 = vpop.f32.mrb[206].mxu0 }
 0x3bd   : > { %v3604_v19 = vpack.c.bf16 %v3586_v44, %v3585_v37  ;;  %v3518_v28 = vmul.f32 %v7394_v27, %v3475_v4  ;;  %v3478_v9 = vadd.f32 %v6018_v24, %v7414_v59  ;;  %v3469_v6 = vpop.f32.mrb[207].mxu0  ;;  %v4489_v44 = vld [vmem:[%s6734_s24 + $0x20] sm:$0xff]  ;;  %v4491_v4 = vld [vmem:[%s6734_s24 + $0x30] sm:$0xff] }
 0x3be   : > { %v3603_v20 = vpack.c.bf16 %v3584_v25, %v3583_v50  ;;  %v3516_v53 = vmul.f32 %v7394_v27, %v3467_v35  ;;  %v3470_v46 = vadd.f32 %v3469_v6, %v7389_v32 }
 0x3bf   : > { %v3557_v38 = vadd.f32 %v7400_v62, %v3518_v28  ;;  %v3519_v36 = vmul.f32 %v7394_v27, %v3478_v9  ;;  %v4490_v28 = vld [vmem:[%s6734_s24 + $0x28] sm:$0xff]  ;;  %v4492_v9 = vld [vmem:[%s6734_s24 + $0x38] sm:$0xff] }
 0x3c0   : > { %v3555_v47 = vadd.f32 %v7400_v62, %v3516_v53  ;;  %v3517_v23 = vmul.f32 %v7394_v27, %v3470_v46  ;;  %3892 = vmatmul.mubr.bf16.gmra.mrb[232].mxu1 %v7469_v0  ;;  %4085 = vmatmul.mubr.bf16.gmra.mrb[232].mxu0 %v7469_v0  ;;  %v4187_v27 = vlaneseq }
 0x3c1   : > { %v3558_v59 = vadd.f32 %v7400_v62, %v3519_v36  ;;  %3901 = vmatprep.mubr.bf16.mxu1 %v6476_v14  ;;  %4094 = vmatprep.mubr.bf16.mxu0 %v6476_v14  ;;  %v3589_v33 = vmax.f32 %v3557_v38, 0.0 }
 0x3c2   : > { %v3556_v32 = vadd.f32 %v7400_v62, %v3517_v23  ;;  %v3587_v15 = vmax.f32 %v3555_v47, 0.0  ;;  %v4188_v62 = vshrl.u32 %v4187_v27, 7 }
 0x3c3   : > { %v3590_v42 = vmax.f32 %v3558_v59, 0.0 }
 0x3c4   : > { %v3588_v55 = vmax.f32 %v3556_v32, 0.0  ;;  %v4197_v0 = vsub.s32 2, %v4188_v62  ;;  %v4193_v11 = vsub.s32 1, %v4188_v62 }
 0x3c5   : > { %v3606_v2 = vpack.c.bf16 %v3590_v42, %v3589_v33 }
 0x3c6   : > { %v3605_v29 = vpack.c.bf16 %v3588_v55, %v3587_v15  ;;  %v7567_v57 = vrot.slane %v4335_v56, %v4197_v0  ;;  %v7569_v58 = vrot.slane %v4335_v56, %v4193_v11 }
 0x3c8   : > { %3902 = vmatmul.mubr.bf16.gmra.mrb[236].mxu1 %v7465_v60  ;;  %4095 = vmatmul.mubr.bf16.gmra.mrb[236].mxu0 %v7465_v60  ;;  %v4189_v60 = vsub.s32 0, %v4188_v62 }
 0x3c9   : > { %3911 = vmatprep.mubr.bf16.mxu1 %v6476_v14  ;;  %4104 = vmatprep.mubr.bf16.mxu0 %v6476_v14 }
 0x3ca   : > { %v7565_v3 = vrot.slane %v4335_v56, %v4189_v60 }
 0x3d0   : > { %3912 = vmatmul.mubr.bf16.gmra.mrb[240].mxu1 %v7487_v17  ;;  %4105 = vmatmul.mubr.bf16.gmra.mrb[240].mxu0 %v7487_v17  ;;  %v4201_v17 = vsub.s32 3, %v4188_v62 }
 0x3d1   : > { %3921 = vmatprep.mubr.bf16.mxu1 %v6476_v14  ;;  %4114 = vmatprep.mubr.bf16.mxu0 %v6476_v14 }
 0x3d2   : > { %v7571_v1 = vrot.slane %v4335_v56, %v4201_v17  ;;  %v4495_v56 = vld [vmem:[%s6734_s24 + $0x50] sm:$0xff] }
 0x3d8   : > { %3922 = vmatmul.mubr.bf16.gmra.mrb[244].mxu1 %v7483_v40  ;;  %4115 = vmatmul.mubr.bf16.gmra.mrb[244].mxu0 %v7483_v40  ;;  %v4185_v40 = vld [vmem:[%s8148_s8] sm:$0xf] }
 0x3d9   : > { %3931 = vmatprep.mubr.bf16.mxu1 %v6476_v14  ;;  %4124 = vmatprep.mubr.bf16.mxu0 %v6476_v14  ;;  %v7557_v10 = vrot.slane %v4185_v40, %v4189_v60  ;;  %v7561_v22 = vrot.slane %v4185_v40, %v4193_v11  ;;  %v7563_v45 = vrot.slane %v4185_v40, %v4201_v17  ;;  %v4493_v17 = vld [vmem:[%s6734_s24 + $0x40] sm:$0xff] }
 0x3e0   : > { %3932 = vmatmul.mubr.bf16.gmra.mrb[248].mxu1 %v3601_v5  ;;  %4125 = vmatmul.mubr.bf16.gmra.mrb[248].mxu0 %v3601_v5 }
 0x3e1   : > { %3941 = vmatprep.mubr.bf16.mxu1 %v6476_v14  ;;  %4134 = vmatprep.mubr.bf16.mxu0 %v6476_v14 }
 0x3e8   : > { %3942 = vmatmul.mubr.bf16.gmra.mrb[252].mxu1 %v3602_v26  ;;  %4135 = vmatmul.mubr.bf16.gmra.mrb[252].mxu0 %v3602_v26 }
 0x3e9   : > { %3951 = vmatprep.mubr.bf16.mxu1 %v6476_v14  ;;  %4144 = vmatprep.mubr.bf16.mxu0 %v6476_v14 }
 0x3f0   : > { %3952 = vmatmul.mubr.bf16.gmra.mrb[0].mxu1 %v3603_v20  ;;  %4145 = vmatmul.mubr.bf16.gmra.mrb[0].mxu0 %v3603_v20 }
 0x3f1   : > { %3961 = vmatprep.mubr.bf16.mxu1 %v6476_v14  ;;  %4154 = vmatprep.mubr.bf16.mxu0 %v6476_v14 }
 0x3f8   : > { %3962 = vmatmul.mubr.bf16.gmra.mrb[4].mxu1 %v3604_v19  ;;  %4155 = vmatmul.mubr.bf16.gmra.mrb[4].mxu0 %v3604_v19 }
 0x3f9   : > { %3971 = vmatprep.mubr.bf16.mxu1 %v6476_v14  ;;  %4164 = vmatprep.mubr.bf16.mxu0 %v6476_v14 }
 0x400   : > { %3972 = vmatmul.mubr.bf16.gmra.mrb[8].mxu1 %v3605_v29  ;;  %4165 = vmatmul.mubr.bf16.gmra.mrb[8].mxu0 %v3605_v29 }
 0x401   : > { %3981 = vmatprep.mubr.bf16.mxu1 %v6476_v14  ;;  %4174 = vmatprep.mubr.bf16.mxu0 %v6476_v14  ;;  %v7559_v14 = vrot.slane %v4185_v40, %v4197_v0 }
 0x408   : > { %3982 = vmatmul.mubr.bf16.gmra.mrb[12].mxu1 %v3606_v2  ;;  %4175 = vmatmul.mubr.bf16.gmra.mrb[12].mxu0 %v3606_v2 }
 0x463   : > { %v3833_v51 = vpop.f32.mrb[208].mxu1  ;;  %v4026_v30 = vpop.f32.mrb[208].mxu0 }
 0x464   : > { %v4207_v18 = vmul.f32 %v7557_v10, %v3833_v51  ;;  %v4209_v12 = vmul.f32 %v7559_v14, %v4026_v30  ;;  %v3835_v54 = vpop.f32.mrb[209].mxu1  ;;  %v4028_v43 = vpop.f32.mrb[209].mxu0 }
 0x465   : > { %v4208_v39 = vmul.f32 %v7561_v22, %v3835_v54  ;;  %v4210_v7 = vmul.f32 %v7563_v45, %v4028_v43  ;;  %v3837_v26 = vpop.f32.mrb[210].mxu1  ;;  %v4030_v34 = vpop.f32.mrb[210].mxu0 }
 0x466   : > { %v4357_v16 = vadd.f32 %v7565_v3, %v4207_v18  ;;  %v4359_v5 = vadd.f32 %v7567_v57, %v4209_v12  ;;  %v4211_v13 = vmul.f32 %v7557_v10, %v3837_v26  ;;  %v4213_v8 = vmul.f32 %v7559_v14, %v4030_v34  ;;  %v3839_v63 = vpop.f32.mrb[211].mxu1  ;;  %v4032_v52 = vpop.f32.mrb[211].mxu0 }
 0x467   : > { %v4358_v49 = vadd.f32 %v7569_v58, %v4208_v39  ;;  %v4360_v37 = vadd.f32 %v7571_v1, %v4210_v7  ;;  %v4212_v21 = vmul.f32 %v7561_v22, %v3839_v63  ;;  %v4214_v50 = vmul.f32 %v7563_v45, %v4032_v52 }
 0x468   : > { %v4613_v25 = vadd.f32 %v4485_v61, %v4357_v16  ;;  %v4615_v35 = vadd.f32 %v4487_v31, %v4359_v5  ;;  %v4361_v24 = vadd.f32 %v7565_v3, %v4211_v13  ;;  %v4363_v19 = vadd.f32 %v7567_v57, %v4213_v8  ;;  %v4494_v61 = vld [vmem:[%s6734_s24 + $0x48] sm:$0xff]  ;;  %v4496_v31 = vld [vmem:[%s6734_s24 + $0x58] sm:$0xff] }
 0x469   : > { %v4614_v6 = vadd.f32 %v4486_v48, %v4358_v49  ;;  %v4616_v20 = vadd.f32 %v4488_v41, %v4360_v37  ;;  %v4362_v53 = vadd.f32 %v7569_v58, %v4212_v21  ;;  %v4364_v46 = vadd.f32 %v7571_v1, %v4214_v50  ;;  %v4497_v48 = vld [vmem:[%s6734_s24 + $0x60] sm:$0xff]  ;;  %v4499_v41 = vld [vmem:[%s6734_s24 + $0x70] sm:$0xff] }
 0x46a   : > { %v4741_v38 = vmax.f32 %v4613_v25, 0.0  ;;  %v4743_v36 = vmax.f32 %v4615_v35, 0.0  ;;  %v4617_v47 = vadd.f32 %v4489_v44, %v4361_v24  ;;  %v4619_v23 = vadd.f32 %v4491_v4, %v4363_v19  ;;  %v4498_v44 = vld [vmem:[%s6734_s24 + $0x68] sm:$0xff]  ;;  %v4500_v4 = vld [vmem:[%s6734_s24 + $0x78] sm:$0xff] }
 0x46b   : > { %v4742_v59 = vmax.f32 %v4614_v6, 0.0  ;;  %v4744_v32 = vmax.f32 %v4616_v20, 0.0  ;;  %v4618_v33 = vadd.f32 %v4490_v28, %v4362_v53  ;;  %v4620_v42 = vadd.f32 %v4492_v9, %v4364_v46  ;;  %v3843_v15 = vpop.f32.mrb[212].mxu1  ;;  %v4036_v55 = vpop.f32.mrb[212].mxu0 }
 0x46c   : > { %4869 = vst [vmem:[%s7599_s21] sm:$0xff] %v4741_v38  ;;  %4871 = vst [vmem:[%s7599_s21 + $0x10] sm:$0xff] %v4743_v36  ;;  %v4745_v2 = vmax.f32 %v4617_v47, 0.0  ;;  %v4747_v29 = vmax.f32 %v4619_v23, 0.0  ;;  %v4215_v27 = vmul.f32 %v7557_v10, %v3843_v15  ;;  %v4217_v62 = vmul.f32 %v7559_v14, %v4036_v55  ;;  %v3845_v60 = vpop.f32.mrb[213].mxu1  ;;  %v4038_v0 = vpop.f32.mrb[213].mxu0 }
 0x46d   : > { %4870 = vst [vmem:[%s7599_s21 + $0x8] sm:$0xff] %v4742_v59  ;;  %4872 = vst [vmem:[%s7599_s21 + $0x18] sm:$0xff] %v4744_v32  ;;  %v4746_v40 = vmax.f32 %v4618_v33, 0.0  ;;  %v4748_v11 = vmax.f32 %v4620_v42, 0.0  ;;  %v4216_v51 = vmul.f32 %v7561_v22, %v3845_v60  ;;  %v4218_v30 = vmul.f32 %v7563_v45, %v4038_v0  ;;  %v3847_v18 = vpop.f32.mrb[214].mxu1  ;;  %v4040_v12 = vpop.f32.mrb[214].mxu0 }
 0x46e   : > { %4873 = vst [vmem:[%s7599_s21 + $0x20] sm:$0xff] %v4745_v2  ;;  %4875 = vst [vmem:[%s7599_s21 + $0x30] sm:$0xff] %v4747_v29  ;;  %v4365_v54 = vadd.f32 %v7565_v3, %v4215_v27  ;;  %v4367_v43 = vadd.f32 %v7567_v57, %v4217_v62  ;;  %v4219_v39 = vmul.f32 %v7557_v10, %v3847_v18  ;;  %v3849_v26 = vpop.f32.mrb[215].mxu1  ;;  %v4042_v34 = vpop.f32.mrb[215].mxu0  ;;  %v4501_v2 = vld [vmem:[%s6734_s24 + $0x80] sm:$0xff]  ;;  %v4503_v29 = vld [vmem:[%s6734_s24 + $0x90] sm:$0xff] }
 0x46f   : > { %v4221_v7 = vmul.f32 %v7559_v14, %v4040_v12  ;;  %4874 = vst [vmem:[%s7599_s21 + $0x28] sm:$0xff] %v4746_v40  ;;  %4876 = vst [vmem:[%s7599_s21 + $0x38] sm:$0xff] %v4748_v11  ;;  %v4366_v16 = vadd.f32 %v7569_v58, %v4216_v51  ;;  %v4368_v5 = vadd.f32 %v7571_v1, %v4218_v30 }
 0x470   : > { %v4220_v13 = vmul.f32 %v7561_v22, %v3849_v26  ;;  %v4222_v8 = vmul.f32 %v7563_v45, %v4042_v34  ;;  %v4621_v63 = vadd.f32 %v4493_v17, %v4365_v54  ;;  %v4623_v52 = vadd.f32 %v4495_v56, %v4367_v43  ;;  %v4502_v17 = vld [vmem:[%s6734_s24 + $0x88] sm:$0xff]  ;;  %v4504_v56 = vld [vmem:[%s6734_s24 + $0x98] sm:$0xff] }
 0x471   : > { %v4369_v49 = vadd.f32 %v7565_v3, %v4219_v39  ;;  %v4371_v37 = vadd.f32 %v7567_v57, %v4221_v7  ;;  %v4622_v21 = vadd.f32 %v4494_v61, %v4366_v16  ;;  %v4624_v50 = vadd.f32 %v4496_v31, %v4368_v5  ;;  %v4505_v61 = vld [vmem:[%s6734_s24 + $0xa0] sm:$0xff]  ;;  %v4507_v31 = vld [vmem:[%s6734_s24 + $0xb0] sm:$0xff] }
 0x472   : > { %v4370_v25 = vadd.f32 %v7569_v58, %v4220_v13  ;;  %v4372_v35 = vadd.f32 %v7571_v1, %v4222_v8  ;;  %v4749_v24 = vmax.f32 %v4621_v63, 0.0  ;;  %v4751_v19 = vmax.f32 %v4623_v52, 0.0 }
 0x473   : > { %v4625_v28 = vadd.f32 %v4497_v48, %v4369_v49  ;;  %v4627_v9 = vadd.f32 %v4499_v41, %v4371_v37  ;;  %v4750_v6 = vmax.f32 %v4622_v21, 0.0  ;;  %v4752_v20 = vmax.f32 %v4624_v50, 0.0  ;;  %v3853_v38 = vpop.f32.mrb[216].mxu1  ;;  %v4046_v36 = vpop.f32.mrb[216].mxu0  ;;  %v4506_v48 = vld [vmem:[%s6734_s24 + $0xa8] sm:$0xff]  ;;  %v4508_v41 = vld [vmem:[%s6734_s24 + $0xb8] sm:$0xff] }
 0x474   : > { %v4626_v53 = vadd.f32 %v4498_v44, %v4370_v25  ;;  %v4628_v46 = vadd.f32 %v4500_v4, %v4372_v35  ;;  %4877 = vst [vmem:[%s7599_s21 + $0x40] sm:$0xff] %v4749_v24  ;;  %4879 = vst [vmem:[%s7599_s21 + $0x50] sm:$0xff] %v4751_v19  ;;  %v4223_v59 = vmul.f32 %v7557_v10, %v3853_v38  ;;  %v3855_v33 = vpop.f32.mrb[217].mxu1  ;;  %v4048_v42 = vpop.f32.mrb[217].mxu0 }
 0x475   : > { %v4753_v47 = vmax.f32 %v4625_v28, 0.0  ;;  %v4755_v23 = vmax.f32 %v4627_v9, 0.0  ;;  %v4225_v32 = vmul.f32 %v7559_v14, %v4046_v36  ;;  %4878 = vst [vmem:[%s7599_s21 + $0x48] sm:$0xff] %v4750_v6  ;;  %4880 = vst [vmem:[%s7599_s21 + $0x58] sm:$0xff] %v4752_v20  ;;  %v4224_v27 = vmul.f32 %v7561_v22, %v3855_v33  ;;  %v3857_v60 = vpop.f32.mrb[218].mxu1  ;;  %v4050_v0 = vpop.f32.mrb[218].mxu0 }
 0x476   : > { %v4754_v15 = vmax.f32 %v4626_v53, 0.0  ;;  %v4756_v55 = vmax.f32 %v4628_v46, 0.0  ;;  %v4226_v62 = vmul.f32 %v7563_v45, %v4048_v42  ;;  %v4373_v40 = vadd.f32 %v7565_v3, %v4223_v59  ;;  %v3859_v18 = vpop.f32.mrb[219].mxu1  ;;  %v4052_v12 = vpop.f32.mrb[219].mxu0 }
 0x477   : > { %4881 = vst [vmem:[%s7599_s21 + $0x60] sm:$0xff] %v4753_v47  ;;  %4883 = vst [vmem:[%s7599_s21 + $0x70] sm:$0xff] %v4755_v23  ;;  %v4375_v11 = vadd.f32 %v7567_v57, %v4225_v32  ;;  %v4227_v51 = vmul.f32 %v7557_v10, %v3857_v60  ;;  %v4229_v30 = vmul.f32 %v7559_v14, %v4050_v0  ;;  %v4509_v47 = vld [vmem:[%s6734_s24 + $0xc0] sm:$0xff]  ;;  %v4511_v23 = vld [vmem:[%s6734_s24 + $0xd0] sm:$0xff] }
 0x478   : > { %4882 = vst [vmem:[%s7599_s21 + $0x68] sm:$0xff] %v4754_v15  ;;  %4884 = vst [vmem:[%s7599_s21 + $0x78] sm:$0xff] %v4756_v55  ;;  %v4374_v54 = vadd.f32 %v7569_v58, %v4224_v27  ;;  %v4376_v43 = vadd.f32 %v7571_v1, %v4226_v62  ;;  %v4228_v39 = vmul.f32 %v7561_v22, %v3859_v18 }
 0x479   : > { %v4230_v7 = vmul.f32 %v7563_v45, %v4052_v12  ;;  %v4629_v26 = vadd.f32 %v4501_v2, %v4373_v40  ;;  %v4631_v34 = vadd.f32 %v4503_v29, %v4375_v11  ;;  %v4377_v16 = vadd.f32 %v7565_v3, %v4227_v51  ;;  %v4510_v2 = vld [vmem:[%s6734_s24 + $0xc8] sm:$0xff]  ;;  %v4512_v29 = vld [vmem:[%s6734_s24 + $0xd8] sm:$0xff] }
 0x47a   : > { %v4379_v5 = vadd.f32 %v7567_v57, %v4229_v30  ;;  %v4630_v13 = vadd.f32 %v4502_v17, %v4374_v54  ;;  %v4632_v8 = vadd.f32 %v4504_v56, %v4376_v43  ;;  %v4378_v63 = vadd.f32 %v7569_v58, %v4228_v39  ;;  %v4513_v17 = vld [vmem:[%s6734_s24 + $0xe0] sm:$0xff]  ;;  %v4515_v56 = vld [vmem:[%s6734_s24 + $0xf0] sm:$0xff] }
 0x47b   : > { %v4380_v52 = vadd.f32 %v7571_v1, %v4230_v7  ;;  %v4757_v49 = vmax.f32 %v4629_v26, 0.0  ;;  %v4759_v37 = vmax.f32 %v4631_v34, 0.0  ;;  %v4633_v44 = vadd.f32 %v4505_v61, %v4377_v16  ;;  %v3863_v24 = vpop.f32.mrb[220].mxu1  ;;  %v4056_v19 = vpop.f32.mrb[220].mxu0  ;;  %v4514_v61 = vld [vmem:[%s6734_s24 + $0xe8] sm:$0xff] }
 0x47c   : > { %v4635_v4 = vadd.f32 %v4507_v31, %v4379_v5  ;;  %v4758_v21 = vmax.f32 %v4630_v13, 0.0  ;;  %v4760_v50 = vmax.f32 %v4632_v8, 0.0  ;;  %v4634_v25 = vadd.f32 %v4506_v48, %v4378_v63  ;;  %v3865_v53 = vpop.f32.mrb[221].mxu1  ;;  %v4058_v46 = vpop.f32.mrb[221].mxu0  ;;  %v4516_v31 = vld [vmem:[%s6734_s24 + $0xf8] sm:$0xff] }
 0x47d   : > { %v4636_v35 = vadd.f32 %v4508_v41, %v4380_v52  ;;  %4885 = vst [vmem:[%s7599_s21 + $0x80] sm:$0xff] %v4757_v49  ;;  %4887 = vst [vmem:[%s7599_s21 + $0x90] sm:$0xff] %v4759_v37  ;;  %v4761_v28 = vmax.f32 %v4633_v44, 0.0  ;;  %v4231_v6 = vmul.f32 %v7557_v10, %v3863_v24  ;;  %v4233_v20 = vmul.f32 %v7559_v14, %v4056_v19  ;;  %v3867_v33 = vpop.f32.mrb[222].mxu1  ;;  %v4060_v42 = vpop.f32.mrb[222].mxu0 }
 0x47e   : > { %v4763_v9 = vmax.f32 %v4635_v4, 0.0  ;;  %4886 = vst [vmem:[%s7599_s21 + $0x88] sm:$0xff] %v4758_v21  ;;  %4888 = vst [vmem:[%s7599_s21 + $0x98] sm:$0xff] %v4760_v50  ;;  %v4762_v38 = vmax.f32 %v4634_v25, 0.0  ;;  %v4232_v59 = vmul.f32 %v7561_v22, %v3865_v53  ;;  %v4234_v32 = vmul.f32 %v7563_v45, %v4058_v46  ;;  %v3869_v60 = vpop.f32.mrb[223].mxu1  ;;  %v4062_v0 = vpop.f32.mrb[223].mxu0 }
 0x47f   : > { %v4764_v36 = vmax.f32 %v4636_v35, 0.0  ;;  %4889 = vst [vmem:[%s7599_s21 + $0xa0] sm:$0xff] %v4761_v28  ;;  %v4381_v15 = vadd.f32 %v7565_v3, %v4231_v6  ;;  %v4383_v55 = vadd.f32 %v7567_v57, %v4233_v20  ;;  %v4235_v27 = vmul.f32 %v7557_v10, %v3867_v33  ;;  %v4517_v28 = vld [vmem:[%s6734_s24 + $0x100] sm:$0xff] }
 0x480   : > { %4891 = vst [vmem:[%s7599_s21 + $0xb0] sm:$0xff] %v4763_v9  ;;  %v4237_v62 = vmul.f32 %v7559_v14, %v4060_v42  ;;  %4890 = vst [vmem:[%s7599_s21 + $0xa8] sm:$0xff] %v4762_v38  ;;  %v4382_v40 = vadd.f32 %v7569_v58, %v4232_v59  ;;  %v4384_v11 = vadd.f32 %v7571_v1, %v4234_v32  ;;  %v4519_v9 = vld [vmem:[%s6734_s24 + $0x110] sm:$0xff] }
 0x481   : > { %4892 = vst [vmem:[%s7599_s21 + $0xb8] sm:$0xff] %v4764_v36  ;;  %v4236_v51 = vmul.f32 %v7561_v22, %v3869_v60  ;;  %v4238_v30 = vmul.f32 %v7563_v45, %v4062_v0  ;;  %v4637_v18 = vadd.f32 %v4509_v47, %v4381_v15  ;;  %v4639_v12 = vadd.f32 %v4511_v23, %v4383_v55  ;;  %v4518_v47 = vld [vmem:[%s6734_s24 + $0x108] sm:$0xff]  ;;  %v4520_v23 = vld [vmem:[%s6734_s24 + $0x118] sm:$0xff] }
 0x482   : > { %v4385_v54 = vadd.f32 %v7565_v3, %v4235_v27  ;;  %v4387_v43 = vadd.f32 %v7567_v57, %v4237_v62  ;;  %v4638_v39 = vadd.f32 %v4510_v2, %v4382_v40  ;;  %v4640_v7 = vadd.f32 %v4512_v29, %v4384_v11  ;;  %v4521_v2 = vld [vmem:[%s6734_s24 + $0x120] sm:$0xff]  ;;  %v4523_v29 = vld [vmem:[%s6734_s24 + $0x130] sm:$0xff] }
 0x483   : > { %v4386_v26 = vadd.f32 %v7569_v58, %v4236_v51  ;;  %v4388_v34 = vadd.f32 %v7571_v1, %v4238_v30  ;;  %v4765_v16 = vmax.f32 %v4637_v18, 0.0  ;;  %v4767_v5 = vmax.f32 %v4639_v12, 0.0  ;;  %v3873_v49 = vpop.f32.mrb[224].mxu1  ;;  %v4066_v37 = vpop.f32.mrb[224].mxu0 }
 0x484   : > { %v4641_v48 = vadd.f32 %v4513_v17, %v4385_v54  ;;  %v4643_v41 = vadd.f32 %v4515_v56, %v4387_v43  ;;  %v4766_v13 = vmax.f32 %v4638_v39, 0.0  ;;  %v4768_v8 = vmax.f32 %v4640_v7, 0.0  ;;  %v3875_v25 = vpop.f32.mrb[225].mxu1  ;;  %v4068_v35 = vpop.f32.mrb[225].mxu0  ;;  %v4522_v17 = vld [vmem:[%s6734_s24 + $0x128] sm:$0xff]  ;;  %v4524_v56 = vld [vmem:[%s6734_s24 + $0x138] sm:$0xff] }
 0x485   : > { %v4642_v63 = vadd.f32 %v4514_v61, %v4386_v26  ;;  %v4644_v52 = vadd.f32 %v4516_v31, %v4388_v34  ;;  %4893 = vst [vmem:[%s7599_s21 + $0xc0] sm:$0xff] %v4765_v16  ;;  %4895 = vst [vmem:[%s7599_s21 + $0xd0] sm:$0xff] %v4767_v5  ;;  %v4239_v21 = vmul.f32 %v7557_v10, %v3873_v49  ;;  %v3877_v53 = vpop.f32.mrb[226].mxu1  ;;  %v4070_v46 = vpop.f32.mrb[226].mxu0 }
 0x486   : > { %v4769_v44 = vmax.f32 %v4641_v48, 0.0  ;;  %v4771_v4 = vmax.f32 %v4643_v41, 0.0  ;;  %v4241_v50 = vmul.f32 %v7559_v14, %v4066_v37  ;;  %4894 = vst [vmem:[%s7599_s21 + $0xc8] sm:$0xff] %v4766_v13  ;;  %4896 = vst [vmem:[%s7599_s21 + $0xd8] sm:$0xff] %v4768_v8  ;;  %v4240_v6 = vmul.f32 %v7561_v22, %v3875_v25  ;;  %v3879_v33 = vpop.f32.mrb[227].mxu1  ;;  %v4072_v42 = vpop.f32.mrb[227].mxu0 }
 0x487   : > { %v4770_v24 = vmax.f32 %v4642_v63, 0.0  ;;  %v4772_v19 = vmax.f32 %v4644_v52, 0.0  ;;  %v4242_v20 = vmul.f32 %v7563_v45, %v4068_v35  ;;  %v4389_v38 = vadd.f32 %v7565_v3, %v4239_v21 }
 0x488   : > { %4897 = vst [vmem:[%s7599_s21 + $0xe0] sm:$0xff] %v4769_v44  ;;  %4899 = vst [vmem:[%s7599_s21 + $0xf0] sm:$0xff] %v4771_v4  ;;  %v4391_v36 = vadd.f32 %v7567_v57, %v4241_v50  ;;  %v4243_v59 = vmul.f32 %v7557_v10, %v3877_v53  ;;  %v4245_v32 = vmul.f32 %v7559_v14, %v4070_v46  ;;  %v4525_v44 = vld [vmem:[%s6734_s24 + $0x140] sm:$0xff]  ;;  %v4527_v4 = vld [vmem:[%s6734_s24 + $0x150] sm:$0xff] }
 0x489   : > { %4898 = vst [vmem:[%s7599_s21 + $0xe8] sm:$0xff] %v4770_v24  ;;  %4900 = vst [vmem:[%s7599_s21 + $0xf8] sm:$0xff] %v4772_v19  ;;  %v4390_v15 = vadd.f32 %v7569_v58, %v4240_v6  ;;  %v4392_v55 = vadd.f32 %v7571_v1, %v4242_v20  ;;  %v4244_v27 = vmul.f32 %v7561_v22, %v3879_v33 }
 0x48a   : > { %v4246_v62 = vmul.f32 %v7563_v45, %v4072_v42  ;;  %v4645_v60 = vadd.f32 %v4517_v28, %v4389_v38  ;;  %v4647_v0 = vadd.f32 %v4519_v9, %v4391_v36  ;;  %v4393_v40 = vadd.f32 %v7565_v3, %v4243_v59  ;;  %v4526_v28 = vld [vmem:[%s6734_s24 + $0x148] sm:$0xff]  ;;  %v4528_v9 = vld [vmem:[%s6734_s24 + $0x158] sm:$0xff] }
 0x48b   : > { %v4395_v11 = vadd.f32 %v7567_v57, %v4245_v32  ;;  %v4646_v51 = vadd.f32 %v4518_v47, %v4390_v15  ;;  %v4648_v30 = vadd.f32 %v4520_v23, %v4392_v55  ;;  %v4394_v18 = vadd.f32 %v7569_v58, %v4244_v27  ;;  %v3883_v16 = vpop.f32.mrb[228].mxu1  ;;  %v4076_v5 = vpop.f32.mrb[228].mxu0  ;;  %v4529_v47 = vld [vmem:[%s6734_s24 + $0x160] sm:$0xff]  ;;  %v4531_v23 = vld [vmem:[%s6734_s24 + $0x170] sm:$0xff] }
 0x48c   : > { %v4396_v12 = vadd.f32 %v7571_v1, %v4246_v62  ;;  %v4773_v54 = vmax.f32 %v4645_v60, 0.0  ;;  %v4775_v43 = vmax.f32 %v4647_v0, 0.0  ;;  %v4649_v61 = vadd.f32 %v4521_v2, %v4393_v40  ;;  %v3885_v63 = vpop.f32.mrb[229].mxu1  ;;  %v4078_v52 = vpop.f32.mrb[229].mxu0  ;;  %v4530_v2 = vld [vmem:[%s6734_s24 + $0x168] sm:$0xff] }
 0x48d   : > { %v4651_v31 = vadd.f32 %v4523_v29, %v4395_v11  ;;  %v4774_v39 = vmax.f32 %v4646_v51, 0.0  ;;  %v4776_v7 = vmax.f32 %v4648_v30, 0.0  ;;  %v4650_v26 = vadd.f32 %v4522_v17, %v4394_v18  ;;  %v3887_v25 = vpop.f32.mrb[230].mxu1  ;;  %v4080_v35 = vpop.f32.mrb[230].mxu0  ;;  %v4532_v29 = vld [vmem:[%s6734_s24 + $0x178] sm:$0xff] }
 0x48e   : > { %v4652_v34 = vadd.f32 %v4524_v56, %v4396_v12  ;;  %4901 = vst [vmem:[%s7599_s21 + $0x100] sm:$0xff] %v4773_v54  ;;  %4903 = vst [vmem:[%s7599_s21 + $0x110] sm:$0xff] %v4775_v43  ;;  %v4777_v48 = vmax.f32 %v4649_v61, 0.0  ;;  %v4247_v13 = vmul.f32 %v7557_v10, %v3883_v16  ;;  %v4249_v8 = vmul.f32 %v7559_v14, %v4076_v5  ;;  %v3889_v53 = vpop.f32.mrb[231].mxu1  ;;  %v4082_v46 = vpop.f32.mrb[231].mxu0 }
 0x48f   : > { %v4779_v41 = vmax.f32 %v4651_v31, 0.0  ;;  %4902 = vst [vmem:[%s7599_s21 + $0x108] sm:$0xff] %v4774_v39  ;;  %4904 = vst [vmem:[%s7599_s21 + $0x118] sm:$0xff] %v4776_v7  ;;  %v4778_v49 = vmax.f32 %v4650_v26, 0.0  ;;  %v4248_v21 = vmul.f32 %v7561_v22, %v3885_v63  ;;  %v4250_v50 = vmul.f32 %v7563_v45, %v4078_v52 }
 0x490   : > { %v4780_v37 = vmax.f32 %v4652_v34, 0.0  ;;  %4905 = vst [vmem:[%s7599_s21 + $0x120] sm:$0xff] %v4777_v48  ;;  %v4397_v24 = vadd.f32 %v7565_v3, %v4247_v13  ;;  %v4399_v19 = vadd.f32 %v7567_v57, %v4249_v8  ;;  %v4251_v6 = vmul.f32 %v7557_v10, %v3887_v25  ;;  %v4533_v48 = vld [vmem:[%s6734_s24 + $0x180] sm:$0xff] }
 0x491   : > { %4907 = vst [vmem:[%s7599_s21 + $0x130] sm:$0xff] %v4779_v41  ;;  %v4253_v20 = vmul.f32 %v7559_v14, %v4080_v35  ;;  %4906 = vst [vmem:[%s7599_s21 + $0x128] sm:$0xff] %v4778_v49  ;;  %v4398_v38 = vadd.f32 %v7569_v58, %v4248_v21  ;;  %v4400_v36 = vadd.f32 %v7571_v1, %v4250_v50  ;;  %v4535_v41 = vld [vmem:[%s6734_s24 + $0x190] sm:$0xff] }
 0x492   : > { %4908 = vst [vmem:[%s7599_s21 + $0x138] sm:$0xff] %v4780_v37  ;;  %v4252_v59 = vmul.f32 %v7561_v22, %v3889_v53  ;;  %v4254_v32 = vmul.f32 %v7563_v45, %v4082_v46  ;;  %v4653_v33 = vadd.f32 %v4525_v44, %v4397_v24  ;;  %v4655_v42 = vadd.f32 %v4527_v4, %v4399_v19  ;;  %v4534_v44 = vld [vmem:[%s6734_s24 + $0x188] sm:$0xff]  ;;  %v4536_v4 = vld [vmem:[%s6734_s24 + $0x198] sm:$0xff] }
 0x493   : > { %v4401_v15 = vadd.f32 %v7565_v3, %v4251_v6  ;;  %v4403_v55 = vadd.f32 %v7567_v57, %v4253_v20  ;;  %v4654_v27 = vadd.f32 %v4526_v28, %v4398_v38  ;;  %v4656_v62 = vadd.f32 %v4528_v9, %v4400_v36  ;;  %v3893_v54 = vpop.f32.mrb[232].mxu1  ;;  %v4086_v43 = vpop.f32.mrb[232].mxu0  ;;  %v4537_v28 = vld [vmem:[%s6734_s24 + $0x1a0] sm:$0xff]  ;;  %v4539_v9 = vld [vmem:[%s6734_s24 + $0x1b0] sm:$0xff] }
 0x494   : > { %v4402_v60 = vadd.f32 %v7569_v58, %v4252_v59  ;;  %v4404_v0 = vadd.f32 %v7571_v1, %v4254_v32  ;;  %v4781_v40 = vmax.f32 %v4653_v33, 0.0  ;;  %v4783_v11 = vmax.f32 %v4655_v42, 0.0  ;;  %v3895_v26 = vpop.f32.mrb[233].mxu1  ;;  %v4088_v34 = vpop.f32.mrb[233].mxu0 }
 0x495   : > { %v4657_v17 = vadd.f32 %v4529_v47, %v4401_v15  ;;  %v4659_v56 = vadd.f32 %v4531_v23, %v4403_v55  ;;  %v4782_v51 = vmax.f32 %v4654_v27, 0.0  ;;  %v4784_v30 = vmax.f32 %v4656_v62, 0.0  ;;  %v3897_v63 = vpop.f32.mrb[234].mxu1  ;;  %v4090_v52 = vpop.f32.mrb[234].mxu0  ;;  %v4538_v47 = vld [vmem:[%s6734_s24 + $0x1a8] sm:$0xff]  ;;  %v4540_v23 = vld [vmem:[%s6734_s24 + $0x1b8] sm:$0xff] }
 0x496   : > { %v4658_v18 = vadd.f32 %v4530_v2, %v4402_v60  ;;  %v4660_v12 = vadd.f32 %v4532_v29, %v4404_v0  ;;  %4909 = vst [vmem:[%s7599_s21 + $0x140] sm:$0xff] %v4781_v40  ;;  %4911 = vst [vmem:[%s7599_s21 + $0x150] sm:$0xff] %v4783_v11  ;;  %v4255_v39 = vmul.f32 %v7557_v10, %v3893_v54  ;;  %v3899_v25 = vpop.f32.mrb[235].mxu1  ;;  %v4092_v35 = vpop.f32.mrb[235].mxu0 }
 0x497   : > { %v4785_v61 = vmax.f32 %v4657_v17, 0.0  ;;  %v4787_v31 = vmax.f32 %v4659_v56, 0.0  ;;  %v4257_v7 = vmul.f32 %v7559_v14, %v4086_v43  ;;  %4910 = vst [vmem:[%s7599_s21 + $0x148] sm:$0xff] %v4782_v51  ;;  %4912 = vst [vmem:[%s7599_s21 + $0x158] sm:$0xff] %v4784_v30  ;;  %v4256_v13 = vmul.f32 %v7561_v22, %v3895_v26 }
 0x498   : > { %v4786_v16 = vmax.f32 %v4658_v18, 0.0  ;;  %v4788_v5 = vmax.f32 %v4660_v12, 0.0  ;;  %v4258_v8 = vmul.f32 %v7563_v45, %v4088_v34  ;;  %v4405_v49 = vadd.f32 %v7565_v3, %v4255_v39 }
 0x499   : > { %4913 = vst [vmem:[%s7599_s21 + $0x160] sm:$0xff] %v4785_v61  ;;  %4915 = vst [vmem:[%s7599_s21 + $0x170] sm:$0xff] %v4787_v31  ;;  %v4407_v37 = vadd.f32 %v7567_v57, %v4257_v7  ;;  %v4259_v21 = vmul.f32 %v7557_v10, %v3897_v63  ;;  %v4261_v50 = vmul.f32 %v7559_v14, %v4090_v52  ;;  %v4541_v61 = vld [vmem:[%s6734_s24 + $0x1c0] sm:$0xff]  ;;  %v4543_v31 = vld [vmem:[%s6734_s24 + $0x1d0] sm:$0xff] }
 0x49a   : > { %4914 = vst [vmem:[%s7599_s21 + $0x168] sm:$0xff] %v4786_v16  ;;  %4916 = vst [vmem:[%s7599_s21 + $0x178] sm:$0xff] %v4788_v5  ;;  %v4406_v24 = vadd.f32 %v7569_v58, %v4256_v13  ;;  %v4408_v19 = vadd.f32 %v7571_v1, %v4258_v8  ;;  %v4260_v6 = vmul.f32 %v7561_v22, %v3899_v25 }
 0x49b   : > { %v4262_v20 = vmul.f32 %v7563_v45, %v4092_v35  ;;  %v4661_v53 = vadd.f32 %v4533_v48, %v4405_v49  ;;  %v4663_v46 = vadd.f32 %v4535_v41, %v4407_v37  ;;  %v4409_v38 = vadd.f32 %v7565_v3, %v4259_v21  ;;  %v3903_v40 = vpop.f32.mrb[236].mxu1  ;;  %v4096_v11 = vpop.f32.mrb[236].mxu0  ;;  %v4542_v48 = vld [vmem:[%s6734_s24 + $0x1c8] sm:$0xff]  ;;  %v4544_v41 = vld [vmem:[%s6734_s24 + $0x1d8] sm:$0xff] }
 0x49c   : > { %v4411_v36 = vadd.f32 %v7567_v57, %v4261_v50  ;;  %v4662_v59 = vadd.f32 %v4534_v44, %v4406_v24  ;;  %v4664_v32 = vadd.f32 %v4536_v4, %v4408_v19  ;;  %v4410_v33 = vadd.f32 %v7569_v58, %v4260_v6  ;;  %v3905_v18 = vpop.f32.mrb[237].mxu1  ;;  %v4098_v12 = vpop.f32.mrb[237].mxu0  ;;  %v4545_v44 = vld [vmem:[%s6734_s24 + $0x1e0] sm:$0xff]  ;;  %v4547_v4 = vld [vmem:[%s6734_s24 + $0x1f0] sm:$0xff] }
 0x49d   : > { %v4412_v42 = vadd.f32 %v7571_v1, %v4262_v20  ;;  %v4789_v15 = vmax.f32 %v4661_v53, 0.0  ;;  %v4791_v55 = vmax.f32 %v4663_v46, 0.0  ;;  %v4665_v2 = vadd.f32 %v4537_v28, %v4409_v38  ;;  %v3907_v26 = vpop.f32.mrb[238].mxu1  ;;  %v4100_v34 = vpop.f32.mrb[238].mxu0  ;;  %v4546_v28 = vld [vmem:[%s6734_s24 + $0x1e8] sm:$0xff] }
 0x49e   : > { %v4667_v29 = vadd.f32 %v4539_v9, %v4411_v36  ;;  %v4790_v27 = vmax.f32 %v4662_v59, 0.0  ;;  %v4792_v62 = vmax.f32 %v4664_v32, 0.0  ;;  %v4666_v60 = vadd.f32 %v4538_v47, %v4410_v33  ;;  %v3909_v63 = vpop.f32.mrb[239].mxu1  ;;  %v4102_v52 = vpop.f32.mrb[239].mxu0  ;;  %v4548_v9 = vld [vmem:[%s6734_s24 + $0x1f8] sm:$0xff] }
 0x49f   : > { %v4668_v0 = vadd.f32 %v4540_v23, %v4412_v42  ;;  %4917 = vst [vmem:[%s7599_s21 + $0x180] sm:$0xff] %v4789_v15  ;;  %4919 = vst [vmem:[%s7599_s21 + $0x190] sm:$0xff] %v4791_v55  ;;  %v4793_v17 = vmax.f32 %v4665_v2, 0.0  ;;  %v4263_v51 = vmul.f32 %v7557_v10, %v3903_v40  ;;  %v4265_v30 = vmul.f32 %v7559_v14, %v4096_v11 }
 0x4a0   : > { %v4795_v56 = vmax.f32 %v4667_v29, 0.0  ;;  %4918 = vst [vmem:[%s7599_s21 + $0x188] sm:$0xff] %v4790_v27  ;;  %4920 = vst [vmem:[%s7599_s21 + $0x198] sm:$0xff] %v4792_v62  ;;  %v4794_v54 = vmax.f32 %v4666_v60, 0.0  ;;  %v4264_v39 = vmul.f32 %v7561_v22, %v3905_v18  ;;  %v4266_v7 = vmul.f32 %v7563_v45, %v4098_v12 }
 0x4a1   : > { %v4796_v43 = vmax.f32 %v4668_v0, 0.0  ;;  %4921 = vst [vmem:[%s7599_s21 + $0x1a0] sm:$0xff] %v4793_v17  ;;  %v4413_v16 = vadd.f32 %v7565_v3, %v4263_v51  ;;  %v4415_v5 = vadd.f32 %v7567_v57, %v4265_v30  ;;  %v4267_v13 = vmul.f32 %v7557_v10, %v3907_v26  ;;  %v4549_v17 = vld [vmem:[%s6734_s24 + $0x200] sm:$0xff] }
 0x4a2   : > { %4923 = vst [vmem:[%s7599_s21 + $0x1b0] sm:$0xff] %v4795_v56  ;;  %v4269_v8 = vmul.f32 %v7559_v14, %v4100_v34  ;;  %4922 = vst [vmem:[%s7599_s21 + $0x1a8] sm:$0xff] %v4794_v54  ;;  %v4414_v49 = vadd.f32 %v7569_v58, %v4264_v39  ;;  %v4416_v37 = vadd.f32 %v7571_v1, %v4266_v7  ;;  %v4551_v56 = vld [vmem:[%s6734_s24 + $0x210] sm:$0xff] }
 0x4a3   : > { %4924 = vst [vmem:[%s7599_s21 + $0x1b8] sm:$0xff] %v4796_v43  ;;  %v4268_v21 = vmul.f32 %v7561_v22, %v3909_v63  ;;  %v4270_v50 = vmul.f32 %v7563_v45, %v4102_v52  ;;  %v4669_v25 = vadd.f32 %v4541_v61, %v4413_v16  ;;  %v4671_v35 = vadd.f32 %v4543_v31, %v4415_v5  ;;  %v3913_v15 = vpop.f32.mrb[240].mxu1  ;;  %v4106_v55 = vpop.f32.mrb[240].mxu0  ;;  %v4550_v61 = vld [vmem:[%s6734_s24 + $0x208] sm:$0xff]  ;;  %v4552_v31 = vld [vmem:[%s6734_s24 + $0x218] sm:$0xff] }
 0x4a4   : > { %v4417_v24 = vadd.f32 %v7565_v3, %v4267_v13  ;;  %v4419_v19 = vadd.f32 %v7567_v57, %v4269_v8  ;;  %v4670_v6 = vadd.f32 %v4542_v48, %v4414_v49  ;;  %v4672_v20 = vadd.f32 %v4544_v41, %v4416_v37  ;;  %v3915_v60 = vpop.f32.mrb[241].mxu1  ;;  %v4108_v0 = vpop.f32.mrb[241].mxu0  ;;  %v4553_v48 = vld [vmem:[%s6734_s24 + $0x220] sm:$0xff]  ;;  %v4555_v41 = vld [vmem:[%s6734_s24 + $0x230] sm:$0xff] }
 0x4a5   : > { %v4418_v53 = vadd.f32 %v7569_v58, %v4268_v21  ;;  %v4420_v46 = vadd.f32 %v7571_v1, %v4270_v50  ;;  %v4797_v38 = vmax.f32 %v4669_v25, 0.0  ;;  %v4799_v36 = vmax.f32 %v4671_v35, 0.0  ;;  %v3917_v18 = vpop.f32.mrb[242].mxu1  ;;  %v4110_v12 = vpop.f32.mrb[242].mxu0 }
 0x4a6   : > { %v4673_v47 = vadd.f32 %v4545_v44, %v4417_v24  ;;  %v4675_v23 = vadd.f32 %v4547_v4, %v4419_v19  ;;  %v4798_v59 = vmax.f32 %v4670_v6, 0.0  ;;  %v4800_v32 = vmax.f32 %v4672_v20, 0.0  ;;  %v3919_v26 = vpop.f32.mrb[243].mxu1  ;;  %v4112_v34 = vpop.f32.mrb[243].mxu0  ;;  %v4554_v44 = vld [vmem:[%s6734_s24 + $0x228] sm:$0xff]  ;;  %v4556_v4 = vld [vmem:[%s6734_s24 + $0x238] sm:$0xff] }
 0x4a7   : > { %v4674_v33 = vadd.f32 %v4546_v28, %v4418_v53  ;;  %v4676_v42 = vadd.f32 %v4548_v9, %v4420_v46  ;;  %4925 = vst [vmem:[%s7599_s21 + $0x1c0] sm:$0xff] %v4797_v38  ;;  %4927 = vst [vmem:[%s7599_s21 + $0x1d0] sm:$0xff] %v4799_v36  ;;  %v4271_v27 = vmul.f32 %v7557_v10, %v3913_v15 }
 0x4a8   : > { %v4801_v2 = vmax.f32 %v4673_v47, 0.0  ;;  %v4803_v29 = vmax.f32 %v4675_v23, 0.0  ;;  %v4273_v62 = vmul.f32 %v7559_v14, %v4106_v55  ;;  %4926 = vst [vmem:[%s7599_s21 + $0x1c8] sm:$0xff] %v4798_v59  ;;  %4928 = vst [vmem:[%s7599_s21 + $0x1d8] sm:$0xff] %v4800_v32  ;;  %v4272_v51 = vmul.f32 %v7561_v22, %v3915_v60 }
 0x4a9   : > { %v4802_v40 = vmax.f32 %v4674_v33, 0.0  ;;  %v4804_v11 = vmax.f32 %v4676_v42, 0.0  ;;  %v4274_v30 = vmul.f32 %v7563_v45, %v4108_v0  ;;  %v4421_v54 = vadd.f32 %v7565_v3, %v4271_v27 }
 0x4aa   : > { %4929 = vst [vmem:[%s7599_s21 + $0x1e0] sm:$0xff] %v4801_v2  ;;  %4931 = vst [vmem:[%s7599_s21 + $0x1f0] sm:$0xff] %v4803_v29  ;;  %v4423_v43 = vadd.f32 %v7567_v57, %v4273_v62  ;;  %v4275_v39 = vmul.f32 %v7557_v10, %v3917_v18  ;;  %v4277_v7 = vmul.f32 %v7559_v14, %v4110_v12  ;;  %v4557_v2 = vld [vmem:[%s6734_s24 + $0x240] sm:$0xff]  ;;  %v4559_v29 = vld [vmem:[%s6734_s24 + $0x250] sm:$0xff] }
 0x4ab   : > { %4930 = vst [vmem:[%s7599_s21 + $0x1e8] sm:$0xff] %v4802_v40  ;;  %4932 = vst [vmem:[%s7599_s21 + $0x1f8] sm:$0xff] %v4804_v11  ;;  %v4422_v16 = vadd.f32 %v7569_v58, %v4272_v51  ;;  %v4424_v5 = vadd.f32 %v7571_v1, %v4274_v30  ;;  %v4276_v13 = vmul.f32 %v7561_v22, %v3919_v26  ;;  %v3923_v38 = vpop.f32.mrb[244].mxu1  ;;  %v4116_v36 = vpop.f32.mrb[244].mxu0 }
 0x4ac   : > { %v4278_v8 = vmul.f32 %v7563_v45, %v4112_v34  ;;  %v4677_v63 = vadd.f32 %v4549_v17, %v4421_v54  ;;  %v4679_v52 = vadd.f32 %v4551_v56, %v4423_v43  ;;  %v4425_v49 = vadd.f32 %v7565_v3, %v4275_v39  ;;  %v3925_v33 = vpop.f32.mrb[245].mxu1  ;;  %v4118_v42 = vpop.f32.mrb[245].mxu0  ;;  %v4558_v17 = vld [vmem:[%s6734_s24 + $0x248] sm:$0xff]  ;;  %v4560_v56 = vld [vmem:[%s6734_s24 + $0x258] sm:$0xff] }
 0x4ad   : > { %v4427_v37 = vadd.f32 %v7567_v57, %v4277_v7  ;;  %v4678_v21 = vadd.f32 %v4550_v61, %v4422_v16  ;;  %v4680_v50 = vadd.f32 %v4552_v31, %v4424_v5  ;;  %v4426_v25 = vadd.f32 %v7569_v58, %v4276_v13  ;;  %v3927_v60 = vpop.f32.mrb[246].mxu1  ;;  %v4120_v0 = vpop.f32.mrb[246].mxu0  ;;  %v4561_v61 = vld [vmem:[%s6734_s24 + $0x260] sm:$0xff]  ;;  %v4563_v31 = vld [vmem:[%s6734_s24 + $0x270] sm:$0xff] }
 0x4ae   : > { %v4428_v35 = vadd.f32 %v7571_v1, %v4278_v8  ;;  %v4805_v24 = vmax.f32 %v4677_v63, 0.0  ;;  %v4807_v19 = vmax.f32 %v4679_v52, 0.0  ;;  %v4681_v28 = vadd.f32 %v4553_v48, %v4425_v49  ;;  %v3929_v18 = vpop.f32.mrb[247].mxu1  ;;  %v4122_v12 = vpop.f32.mrb[247].mxu0  ;;  %v4562_v48 = vld [vmem:[%s6734_s24 + $0x268] sm:$0xff] }
 0x4af   : > { %v4683_v9 = vadd.f32 %v4555_v41, %v4427_v37  ;;  %v4806_v6 = vmax.f32 %v4678_v21, 0.0  ;;  %v4808_v20 = vmax.f32 %v4680_v50, 0.0  ;;  %v4682_v53 = vadd.f32 %v4554_v44, %v4426_v25  ;;  %v4564_v41 = vld [vmem:[%s6734_s24 + $0x278] sm:$0xff] }
 0x4b0   : > { %v4684_v46 = vadd.f32 %v4556_v4, %v4428_v35  ;;  %4933 = vst [vmem:[%s7599_s21 + $0x200] sm:$0xff] %v4805_v24  ;;  %4935 = vst [vmem:[%s7599_s21 + $0x210] sm:$0xff] %v4807_v19  ;;  %v4809_v47 = vmax.f32 %v4681_v28, 0.0  ;;  %v4279_v59 = vmul.f32 %v7557_v10, %v3923_v38  ;;  %v4281_v32 = vmul.f32 %v7559_v14, %v4116_v36 }
 0x4b1   : > { %v4811_v23 = vmax.f32 %v4683_v9, 0.0  ;;  %4934 = vst [vmem:[%s7599_s21 + $0x208] sm:$0xff] %v4806_v6  ;;  %4936 = vst [vmem:[%s7599_s21 + $0x218] sm:$0xff] %v4808_v20  ;;  %v4810_v15 = vmax.f32 %v4682_v53, 0.0  ;;  %v4280_v27 = vmul.f32 %v7561_v22, %v3925_v33  ;;  %v4282_v62 = vmul.f32 %v7563_v45, %v4118_v42 }
 0x4b2   : > { %v4812_v55 = vmax.f32 %v4684_v46, 0.0  ;;  %4937 = vst [vmem:[%s7599_s21 + $0x220] sm:$0xff] %v4809_v47  ;;  %v4429_v40 = vadd.f32 %v7565_v3, %v4279_v59  ;;  %v4431_v11 = vadd.f32 %v7567_v57, %v4281_v32  ;;  %v4283_v51 = vmul.f32 %v7557_v10, %v3927_v60  ;;  %v4565_v47 = vld [vmem:[%s6734_s24 + $0x280] sm:$0xff] }
 0x4b3   : > { %4939 = vst [vmem:[%s7599_s21 + $0x230] sm:$0xff] %v4811_v23  ;;  %v4285_v30 = vmul.f32 %v7559_v14, %v4120_v0  ;;  %4938 = vst [vmem:[%s7599_s21 + $0x228] sm:$0xff] %v4810_v15  ;;  %v4430_v54 = vadd.f32 %v7569_v58, %v4280_v27  ;;  %v4432_v43 = vadd.f32 %v7571_v1, %v4282_v62  ;;  %v3933_v24 = vpop.f32.mrb[248].mxu1  ;;  %v4126_v19 = vpop.f32.mrb[248].mxu0  ;;  %v4567_v23 = vld [vmem:[%s6734_s24 + $0x290] sm:$0xff] }
 0x4b4   : > { %4940 = vst [vmem:[%s7599_s21 + $0x238] sm:$0xff] %v4812_v55  ;;  %v4284_v39 = vmul.f32 %v7561_v22, %v3929_v18  ;;  %v4286_v7 = vmul.f32 %v7563_v45, %v4122_v12  ;;  %v4685_v26 = vadd.f32 %v4557_v2, %v4429_v40  ;;  %v4687_v34 = vadd.f32 %v4559_v29, %v4431_v11  ;;  %v3935_v53 = vpop.f32.mrb[249].mxu1  ;;  %v4128_v46 = vpop.f32.mrb[249].mxu0  ;;  %v4566_v2 = vld [vmem:[%s6734_s24 + $0x288] sm:$0xff]  ;;  %v4568_v29 = vld [vmem:[%s6734_s24 + $0x298] sm:$0xff] }
 0x4b5   : > { %v4433_v16 = vadd.f32 %v7565_v3, %v4283_v51  ;;  %v4435_v5 = vadd.f32 %v7567_v57, %v4285_v30  ;;  %v4686_v13 = vadd.f32 %v4558_v17, %v4430_v54  ;;  %v4688_v8 = vadd.f32 %v4560_v56, %v4432_v43  ;;  %v3937_v33 = vpop.f32.mrb[250].mxu1  ;;  %v4130_v42 = vpop.f32.mrb[250].mxu0  ;;  %v4569_v17 = vld [vmem:[%s6734_s24 + $0x2a0] sm:$0xff]  ;;  %v4571_v56 = vld [vmem:[%s6734_s24 + $0x2b0] sm:$0xff] }
 0x4b6   : > { %v4434_v63 = vadd.f32 %v7569_v58, %v4284_v39  ;;  %v4436_v52 = vadd.f32 %v7571_v1, %v4286_v7  ;;  %v4813_v49 = vmax.f32 %v4685_v26, 0.0  ;;  %v4815_v37 = vmax.f32 %v4687_v34, 0.0  ;;  %v3939_v60 = vpop.f32.mrb[251].mxu1  ;;  %v4132_v0 = vpop.f32.mrb[251].mxu0 }
 0x4b7   : > { %v4689_v44 = vadd.f32 %v4561_v61, %v4433_v16  ;;  %v4691_v4 = vadd.f32 %v4563_v31, %v4435_v5  ;;  %v4814_v21 = vmax.f32 %v4686_v13, 0.0  ;;  %v4816_v50 = vmax.f32 %v4688_v8, 0.0  ;;  %v4570_v61 = vld [vmem:[%s6734_s24 + $0x2a8] sm:$0xff]  ;;  %v4572_v31 = vld [vmem:[%s6734_s24 + $0x2b8] sm:$0xff] }
 0x4b8   : > { %v4690_v25 = vadd.f32 %v4562_v48, %v4434_v63  ;;  %v4692_v35 = vadd.f32 %v4564_v41, %v4436_v52  ;;  %4941 = vst [vmem:[%s7599_s21 + $0x240] sm:$0xff] %v4813_v49  ;;  %4943 = vst [vmem:[%s7599_s21 + $0x250] sm:$0xff] %v4815_v37  ;;  %v4287_v6 = vmul.f32 %v7557_v10, %v3933_v24 }
 0x4b9   : > { %v4817_v28 = vmax.f32 %v4689_v44, 0.0  ;;  %v4819_v9 = vmax.f32 %v4691_v4, 0.0  ;;  %v4289_v20 = vmul.f32 %v7559_v14, %v4126_v19  ;;  %4942 = vst [vmem:[%s7599_s21 + $0x248] sm:$0xff] %v4814_v21  ;;  %4944 = vst [vmem:[%s7599_s21 + $0x258] sm:$0xff] %v4816_v50  ;;  %v4288_v59 = vmul.f32 %v7561_v22, %v3935_v53 }
 0x4ba   : > { %v4818_v38 = vmax.f32 %v4690_v25, 0.0  ;;  %v4820_v36 = vmax.f32 %v4692_v35, 0.0  ;;  %v4290_v32 = vmul.f32 %v7563_v45, %v4128_v46  ;;  %v4437_v15 = vadd.f32 %v7565_v3, %v4287_v6 }
 0x4bb   : > { %4945 = vst [vmem:[%s7599_s21 + $0x260] sm:$0xff] %v4817_v28  ;;  %4947 = vst [vmem:[%s7599_s21 + $0x270] sm:$0xff] %v4819_v9  ;;  %v4439_v55 = vadd.f32 %v7567_v57, %v4289_v20  ;;  %v4291_v27 = vmul.f32 %v7557_v10, %v3937_v33  ;;  %v4293_v62 = vmul.f32 %v7559_v14, %v4130_v42  ;;  %v3943_v49 = vpop.f32.mrb[252].mxu1  ;;  %v4136_v37 = vpop.f32.mrb[252].mxu0  ;;  %v4573_v28 = vld [vmem:[%s6734_s24 + $0x2c0] sm:$0xff]  ;;  %v4575_v9 = vld [vmem:[%s6734_s24 + $0x2d0] sm:$0xff] }
 0x4bc   : > { %4946 = vst [vmem:[%s7599_s21 + $0x268] sm:$0xff] %v4818_v38  ;;  %4948 = vst [vmem:[%s7599_s21 + $0x278] sm:$0xff] %v4820_v36  ;;  %v4438_v40 = vadd.f32 %v7569_v58, %v4288_v59  ;;  %v4440_v11 = vadd.f32 %v7571_v1, %v4290_v32  ;;  %v4292_v51 = vmul.f32 %v7561_v22, %v3939_v60  ;;  %v3945_v25 = vpop.f32.mrb[253].mxu1  ;;  %v4138_v35 = vpop.f32.mrb[253].mxu0 }
 0x4bd   : > { %v4294_v30 = vmul.f32 %v7563_v45, %v4132_v0  ;;  %v4693_v18 = vadd.f32 %v4565_v47, %v4437_v15  ;;  %v4695_v12 = vadd.f32 %v4567_v23, %v4439_v55  ;;  %v4441_v54 = vadd.f32 %v7565_v3, %v4291_v27  ;;  %v3947_v53 = vpop.f32.mrb[254].mxu1  ;;  %v4140_v46 = vpop.f32.mrb[254].mxu0  ;;  %v4574_v47 = vld [vmem:[%s6734_s24 + $0x2c8] sm:$0xff]  ;;  %v4576_v23 = vld [vmem:[%s6734_s24 + $0x2d8] sm:$0xff] }
 0x4be   : > { %v4443_v43 = vadd.f32 %v7567_v57, %v4293_v62  ;;  %v4694_v39 = vadd.f32 %v4566_v2, %v4438_v40  ;;  %v4696_v7 = vadd.f32 %v4568_v29, %v4440_v11  ;;  %v4442_v26 = vadd.f32 %v7569_v58, %v4292_v51  ;;  %v3949_v33 = vpop.f32.mrb[255].mxu1  ;;  %v4142_v42 = vpop.f32.mrb[255].mxu0  ;;  %v4577_v2 = vld [vmem:[%s6734_s24 + $0x2e0] sm:$0xff]  ;;  %v4579_v29 = vld [vmem:[%s6734_s24 + $0x2f0] sm:$0xff] }
 0x4bf   : > { %v4444_v34 = vadd.f32 %v7571_v1, %v4294_v30  ;;  %v4821_v16 = vmax.f32 %v4693_v18, 0.0  ;;  %v4823_v5 = vmax.f32 %v4695_v12, 0.0  ;;  %v4697_v48 = vadd.f32 %v4569_v17, %v4441_v54  ;;  %v4578_v17 = vld [vmem:[%s6734_s24 + $0x2e8] sm:$0xff] }
 0x4c0   : > { %v4699_v41 = vadd.f32 %v4571_v56, %v4443_v43  ;;  %v4822_v13 = vmax.f32 %v4694_v39, 0.0  ;;  %v4824_v8 = vmax.f32 %v4696_v7, 0.0  ;;  %v4698_v63 = vadd.f32 %v4570_v61, %v4442_v26  ;;  %v4580_v56 = vld [vmem:[%s6734_s24 + $0x2f8] sm:$0xff] }
 0x4c1   : > { %v4700_v52 = vadd.f32 %v4572_v31, %v4444_v34  ;;  %4949 = vst [vmem:[%s7599_s21 + $0x280] sm:$0xff] %v4821_v16  ;;  %4951 = vst [vmem:[%s7599_s21 + $0x290] sm:$0xff] %v4823_v5  ;;  %v4825_v44 = vmax.f32 %v4697_v48, 0.0  ;;  %v4295_v21 = vmul.f32 %v7557_v10, %v3943_v49  ;;  %v4297_v50 = vmul.f32 %v7559_v14, %v4136_v37 }
 0x4c2   : > { %v4827_v4 = vmax.f32 %v4699_v41, 0.0  ;;  %4950 = vst [vmem:[%s7599_s21 + $0x288] sm:$0xff] %v4822_v13  ;;  %4952 = vst [vmem:[%s7599_s21 + $0x298] sm:$0xff] %v4824_v8  ;;  %v4826_v24 = vmax.f32 %v4698_v63, 0.0  ;;  %v4296_v6 = vmul.f32 %v7561_v22, %v3945_v25  ;;  %v4298_v20 = vmul.f32 %v7563_v45, %v4138_v35 }
 0x4c3   : > { %v4828_v19 = vmax.f32 %v4700_v52, 0.0  ;;  %4953 = vst [vmem:[%s7599_s21 + $0x2a0] sm:$0xff] %v4825_v44  ;;  %v4445_v38 = vadd.f32 %v7565_v3, %v4295_v21  ;;  %v4447_v36 = vadd.f32 %v7567_v57, %v4297_v50  ;;  %v4299_v59 = vmul.f32 %v7557_v10, %v3947_v53  ;;  %v3953_v16 = vpop.f32.mrb[0].mxu1  ;;  %v4146_v5 = vpop.f32.mrb[0].mxu0  ;;  %v4581_v44 = vld [vmem:[%s6734_s24 + $0x300] sm:$0xff] }
 0x4c4   : > { %4955 = vst [vmem:[%s7599_s21 + $0x2b0] sm:$0xff] %v4827_v4  ;;  %v4301_v32 = vmul.f32 %v7559_v14, %v4140_v46  ;;  %4954 = vst [vmem:[%s7599_s21 + $0x2a8] sm:$0xff] %v4826_v24  ;;  %v4446_v15 = vadd.f32 %v7569_v58, %v4296_v6  ;;  %v4448_v55 = vadd.f32 %v7571_v1, %v4298_v20  ;;  %v3955_v63 = vpop.f32.mrb[1].mxu1  ;;  %v4148_v52 = vpop.f32.mrb[1].mxu0  ;;  %v4583_v4 = vld [vmem:[%s6734_s24 + $0x310] sm:$0xff] }
 0x4c5   : > { %4956 = vst [vmem:[%s7599_s21 + $0x2b8] sm:$0xff] %v4828_v19  ;;  %v4300_v27 = vmul.f32 %v7561_v22, %v3949_v33  ;;  %v4302_v62 = vmul.f32 %v7563_v45, %v4142_v42  ;;  %v4701_v60 = vadd.f32 %v4573_v28, %v4445_v38  ;;  %v4703_v0 = vadd.f32 %v4575_v9, %v4447_v36  ;;  %v3957_v25 = vpop.f32.mrb[2].mxu1  ;;  %v4150_v35 = vpop.f32.mrb[2].mxu0  ;;  %v4582_v28 = vld [vmem:[%s6734_s24 + $0x308] sm:$0xff]  ;;  %v4584_v9 = vld [vmem:[%s6734_s24 + $0x318] sm:$0xff] }
 0x4c6   : > { %v4449_v40 = vadd.f32 %v7565_v3, %v4299_v59  ;;  %v4451_v11 = vadd.f32 %v7567_v57, %v4301_v32  ;;  %v4702_v51 = vadd.f32 %v4574_v47, %v4446_v15  ;;  %v4704_v30 = vadd.f32 %v4576_v23, %v4448_v55  ;;  %v3959_v53 = vpop.f32.mrb[3].mxu1  ;;  %v4152_v46 = vpop.f32.mrb[3].mxu0  ;;  %v4585_v47 = vld [vmem:[%s6734_s24 + $0x320] sm:$0xff]  ;;  %v4587_v23 = vld [vmem:[%s6734_s24 + $0x330] sm:$0xff] }
 0x4c7   : > { %v4450_v18 = vadd.f32 %v7569_v58, %v4300_v27  ;;  %v4452_v12 = vadd.f32 %v7571_v1, %v4302_v62  ;;  %v4829_v54 = vmax.f32 %v4701_v60, 0.0  ;;  %v4831_v43 = vmax.f32 %v4703_v0, 0.0 }
 0x4c8   : > { %v4705_v61 = vadd.f32 %v4577_v2, %v4449_v40  ;;  %v4707_v31 = vadd.f32 %v4579_v29, %v4451_v11  ;;  %v4830_v39 = vmax.f32 %v4702_v51, 0.0  ;;  %v4832_v7 = vmax.f32 %v4704_v30, 0.0  ;;  %v4586_v2 = vld [vmem:[%s6734_s24 + $0x328] sm:$0xff]  ;;  %v4588_v29 = vld [vmem:[%s6734_s24 + $0x338] sm:$0xff] }
 0x4c9   : > { %v4706_v26 = vadd.f32 %v4578_v17, %v4450_v18  ;;  %v4708_v34 = vadd.f32 %v4580_v56, %v4452_v12  ;;  %4957 = vst [vmem:[%s7599_s21 + $0x2c0] sm:$0xff] %v4829_v54  ;;  %4959 = vst [vmem:[%s7599_s21 + $0x2d0] sm:$0xff] %v4831_v43  ;;  %v4303_v13 = vmul.f32 %v7557_v10, %v3953_v16 }
 0x4ca   : > { %v4833_v48 = vmax.f32 %v4705_v61, 0.0  ;;  %v4835_v41 = vmax.f32 %v4707_v31, 0.0  ;;  %v4305_v8 = vmul.f32 %v7559_v14, %v4146_v5  ;;  %4958 = vst [vmem:[%s7599_s21 + $0x2c8] sm:$0xff] %v4830_v39  ;;  %4960 = vst [vmem:[%s7599_s21 + $0x2d8] sm:$0xff] %v4832_v7  ;;  %v4304_v21 = vmul.f32 %v7561_v22, %v3955_v63 }
 0x4cb   : > { %v4834_v49 = vmax.f32 %v4706_v26, 0.0  ;;  %v4836_v37 = vmax.f32 %v4708_v34, 0.0  ;;  %v4306_v50 = vmul.f32 %v7563_v45, %v4148_v52  ;;  %v4453_v24 = vadd.f32 %v7565_v3, %v4303_v13  ;;  %v3963_v54 = vpop.f32.mrb[4].mxu1  ;;  %v4156_v43 = vpop.f32.mrb[4].mxu0 }
 0x4cc   : > { %4961 = vst [vmem:[%s7599_s21 + $0x2e0] sm:$0xff] %v4833_v48  ;;  %4963 = vst [vmem:[%s7599_s21 + $0x2f0] sm:$0xff] %v4835_v41  ;;  %v4455_v19 = vadd.f32 %v7567_v57, %v4305_v8  ;;  %v4307_v6 = vmul.f32 %v7557_v10, %v3957_v25  ;;  %v4309_v20 = vmul.f32 %v7559_v14, %v4150_v35  ;;  %v3965_v26 = vpop.f32.mrb[5].mxu1  ;;  %v4158_v34 = vpop.f32.mrb[5].mxu0  ;;  %v4589_v48 = vld [vmem:[%s6734_s24 + $0x340] sm:$0xff]  ;;  %v4591_v41 = vld [vmem:[%s6734_s24 + $0x350] sm:$0xff] }
 0x4cd   : > { %4962 = vst [vmem:[%s7599_s21 + $0x2e8] sm:$0xff] %v4834_v49  ;;  %4964 = vst [vmem:[%s7599_s21 + $0x2f8] sm:$0xff] %v4836_v37  ;;  %v4454_v38 = vadd.f32 %v7569_v58, %v4304_v21  ;;  %v4456_v36 = vadd.f32 %v7571_v1, %v4306_v50  ;;  %v4308_v59 = vmul.f32 %v7561_v22, %v3959_v53  ;;  %v3967_v63 = vpop.f32.mrb[6].mxu1  ;;  %v4160_v52 = vpop.f32.mrb[6].mxu0 }
 0x4ce   : > { %v4310_v32 = vmul.f32 %v7563_v45, %v4152_v46  ;;  %v4709_v33 = vadd.f32 %v4581_v44, %v4453_v24  ;;  %v4711_v42 = vadd.f32 %v4583_v4, %v4455_v19  ;;  %v4457_v15 = vadd.f32 %v7565_v3, %v4307_v6  ;;  %v4590_v44 = vld [vmem:[%s6734_s24 + $0x348] sm:$0xff]  ;;  %v4592_v4 = vld [vmem:[%s6734_s24 + $0x358] sm:$0xff]  ;;  %v3969_v25 = vpop.f32.mrb[7].mxu1  ;;  %v4162_v35 = vpop.f32.mrb[7].mxu0 }
 0x4cf   : > { %v4459_v55 = vadd.f32 %v7567_v57, %v4309_v20  ;;  %v4710_v27 = vadd.f32 %v4582_v28, %v4454_v38  ;;  %v4712_v62 = vadd.f32 %v4584_v9, %v4456_v36  ;;  %v4458_v60 = vadd.f32 %v7569_v58, %v4308_v59  ;;  %v4593_v28 = vld [vmem:[%s6734_s24 + $0x360] sm:$0xff]  ;;  %v4595_v9 = vld [vmem:[%s6734_s24 + $0x370] sm:$0xff] }
 0x4d0   : > { %v4460_v0 = vadd.f32 %v7571_v1, %v4310_v32  ;;  %v4837_v40 = vmax.f32 %v4709_v33, 0.0  ;;  %v4839_v11 = vmax.f32 %v4711_v42, 0.0  ;;  %v4713_v17 = vadd.f32 %v4585_v47, %v4457_v15  ;;  %v4594_v47 = vld [vmem:[%s6734_s24 + $0x368] sm:$0xff] }
 0x4d1   : > { %v4715_v56 = vadd.f32 %v4587_v23, %v4459_v55  ;;  %v4838_v51 = vmax.f32 %v4710_v27, 0.0  ;;  %v4840_v30 = vmax.f32 %v4712_v62, 0.0  ;;  %v4714_v18 = vadd.f32 %v4586_v2, %v4458_v60  ;;  %v4596_v23 = vld [vmem:[%s6734_s24 + $0x378] sm:$0xff] }
 0x4d2   : > { %v4716_v12 = vadd.f32 %v4588_v29, %v4460_v0  ;;  %4965 = vst [vmem:[%s7599_s21 + $0x300] sm:$0xff] %v4837_v40  ;;  %4967 = vst [vmem:[%s7599_s21 + $0x310] sm:$0xff] %v4839_v11  ;;  %v4841_v61 = vmax.f32 %v4713_v17, 0.0  ;;  %v4311_v39 = vmul.f32 %v7557_v10, %v3963_v54  ;;  %v4313_v7 = vmul.f32 %v7559_v14, %v4156_v43 }
 0x4d3   : > { %v4843_v31 = vmax.f32 %v4715_v56, 0.0  ;;  %4966 = vst [vmem:[%s7599_s21 + $0x308] sm:$0xff] %v4838_v51  ;;  %4968 = vst [vmem:[%s7599_s21 + $0x318] sm:$0xff] %v4840_v30  ;;  %v4842_v16 = vmax.f32 %v4714_v18, 0.0  ;;  %v4312_v13 = vmul.f32 %v7561_v22, %v3965_v26  ;;  %v4314_v8 = vmul.f32 %v7563_v45, %v4158_v34  ;;  %v3973_v40 = vpop.f32.mrb[8].mxu1  ;;  %v4166_v11 = vpop.f32.mrb[8].mxu0 }
 0x4d4   : > { %v4844_v5 = vmax.f32 %v4716_v12, 0.0  ;;  %4969 = vst [vmem:[%s7599_s21 + $0x320] sm:$0xff] %v4841_v61  ;;  %v4461_v49 = vadd.f32 %v7565_v3, %v4311_v39  ;;  %v4463_v37 = vadd.f32 %v7567_v57, %v4313_v7  ;;  %v4315_v21 = vmul.f32 %v7557_v10, %v3967_v63  ;;  %v3975_v18 = vpop.f32.mrb[9].mxu1  ;;  %v4168_v12 = vpop.f32.mrb[9].mxu0  ;;  %v4597_v61 = vld [vmem:[%s6734_s24 + $0x380] sm:$0xff] }
 0x4d5   : > { %4971 = vst [vmem:[%s7599_s21 + $0x330] sm:$0xff] %v4843_v31  ;;  %v4317_v50 = vmul.f32 %v7559_v14, %v4160_v52  ;;  %4970 = vst [vmem:[%s7599_s21 + $0x328] sm:$0xff] %v4842_v16  ;;  %v4462_v24 = vadd.f32 %v7569_v58, %v4312_v13  ;;  %v4464_v19 = vadd.f32 %v7571_v1, %v4314_v8  ;;  %v4599_v31 = vld [vmem:[%s6734_s24 + $0x390] sm:$0xff]  ;;  %v3977_v26 = vpop.f32.mrb[10].mxu1  ;;  %v4170_v34 = vpop.f32.mrb[10].mxu0 }
 0x4d6   : > { %4972 = vst [vmem:[%s7599_s21 + $0x338] sm:$0xff] %v4844_v5  ;;  %v4316_v6 = vmul.f32 %v7561_v22, %v3969_v25  ;;  %v4318_v20 = vmul.f32 %v7563_v45, %v4162_v35  ;;  %v4717_v53 = vadd.f32 %v4589_v48, %v4461_v49  ;;  %v4719_v46 = vadd.f32 %v4591_v41, %v4463_v37  ;;  %v4598_v48 = vld [vmem:[%s6734_s24 + $0x388] sm:$0xff]  ;;  %v4600_v41 = vld [vmem:[%s6734_s24 + $0x398] sm:$0xff]  ;;  %v3979_v63 = vpop.f32.mrb[11].mxu1  ;;  %v4172_v52 = vpop.f32.mrb[11].mxu0 }
 0x4d7   : > { %v4465_v38 = vadd.f32 %v7565_v3, %v4315_v21  ;;  %v4467_v36 = vadd.f32 %v7567_v57, %v4317_v50  ;;  %v4718_v59 = vadd.f32 %v4590_v44, %v4462_v24  ;;  %v4720_v32 = vadd.f32 %v4592_v4, %v4464_v19  ;;  %v4601_v44 = vld [vmem:[%s6734_s24 + $0x3a0] sm:$0xff]  ;;  %v4603_v4 = vld [vmem:[%s6734_s24 + $0x3b0] sm:$0xff] }
 0x4d8   : > { %v4466_v33 = vadd.f32 %v7569_v58, %v4316_v6  ;;  %v4468_v42 = vadd.f32 %v7571_v1, %v4318_v20  ;;  %v4845_v15 = vmax.f32 %v4717_v53, 0.0  ;;  %v4847_v55 = vmax.f32 %v4719_v46, 0.0 }
 0x4d9   : > { %v4721_v2 = vadd.f32 %v4593_v28, %v4465_v38  ;;  %v4723_v29 = vadd.f32 %v4595_v9, %v4467_v36  ;;  %v4846_v27 = vmax.f32 %v4718_v59, 0.0  ;;  %v4848_v62 = vmax.f32 %v4720_v32, 0.0  ;;  %v4602_v28 = vld [vmem:[%s6734_s24 + $0x3a8] sm:$0xff]  ;;  %v4604_v9 = vld [vmem:[%s6734_s24 + $0x3b8] sm:$0xff] }
 0x4da   : > { %v4722_v60 = vadd.f32 %v4594_v47, %v4466_v33  ;;  %v4724_v0 = vadd.f32 %v4596_v23, %v4468_v42  ;;  %4973 = vst [vmem:[%s7599_s21 + $0x340] sm:$0xff] %v4845_v15  ;;  %4975 = vst [vmem:[%s7599_s21 + $0x350] sm:$0xff] %v4847_v55  ;;  %v4319_v51 = vmul.f32 %v7557_v10, %v3973_v40 }
 0x4db   : > { %v4849_v17 = vmax.f32 %v4721_v2, 0.0  ;;  %v4851_v56 = vmax.f32 %v4723_v29, 0.0  ;;  %v4321_v30 = vmul.f32 %v7559_v14, %v4166_v11  ;;  %4974 = vst [vmem:[%s7599_s21 + $0x348] sm:$0xff] %v4846_v27  ;;  %4976 = vst [vmem:[%s7599_s21 + $0x358] sm:$0xff] %v4848_v62  ;;  %v4320_v39 = vmul.f32 %v7561_v22, %v3975_v18  ;;  %v3983_v15 = vpop.f32.mrb[12].mxu1  ;;  %v4176_v55 = vpop.f32.mrb[12].mxu0 }
 0x4dc   : > { %v4850_v54 = vmax.f32 %v4722_v60, 0.0  ;;  %v4852_v43 = vmax.f32 %v4724_v0, 0.0  ;;  %v4322_v7 = vmul.f32 %v7563_v45, %v4168_v12  ;;  %v4469_v16 = vadd.f32 %v7565_v3, %v4319_v51  ;;  %v3985_v60 = vpop.f32.mrb[13].mxu1  ;;  %v4178_v0 = vpop.f32.mrb[13].mxu0 }
 0x4dd   : > { %4977 = vst [vmem:[%s7599_s21 + $0x360] sm:$0xff] %v4849_v17  ;;  %4979 = vst [vmem:[%s7599_s21 + $0x370] sm:$0xff] %v4851_v56  ;;  %v4471_v5 = vadd.f32 %v7567_v57, %v4321_v30  ;;  %v4323_v13 = vmul.f32 %v7557_v10, %v3977_v26  ;;  %v4325_v8 = vmul.f32 %v7559_v14, %v4170_v34  ;;  %v4605_v17 = vld [vmem:[%s6734_s24 + $0x3c0] sm:$0xff]  ;;  %v4607_v56 = vld [vmem:[%s6734_s24 + $0x3d0] sm:$0xff]  ;;  %v3987_v18 = vpop.f32.mrb[14].mxu1  ;;  %v4180_v12 = vpop.f32.mrb[14].mxu0 }
 0x4de   : > { %4978 = vst [vmem:[%s7599_s21 + $0x368] sm:$0xff] %v4850_v54  ;;  %4980 = vst [vmem:[%s7599_s21 + $0x378] sm:$0xff] %v4852_v43  ;;  %v4470_v49 = vadd.f32 %v7569_v58, %v4320_v39  ;;  %v4472_v37 = vadd.f32 %v7571_v1, %v4322_v7  ;;  %v4324_v21 = vmul.f32 %v7561_v22, %v3979_v63  ;;  %v3989_v26 = vpop.f32.mrb[15].mxu1  ;;  %v4182_v34 = vpop.f32.mrb[15].mxu0 }
 0x4df   : > { %v4326_v50 = vmul.f32 %v7563_v45, %v4172_v52  ;;  %v4725_v25 = vadd.f32 %v4597_v61, %v4469_v16  ;;  %v4727_v35 = vadd.f32 %v4599_v31, %v4471_v5  ;;  %v4473_v24 = vadd.f32 %v7565_v3, %v4323_v13  ;;  %v4606_v61 = vld [vmem:[%s6734_s24 + $0x3c8] sm:$0xff]  ;;  %v4608_v31 = vld [vmem:[%s6734_s24 + $0x3d8] sm:$0xff] }
 0x4e0   : > { %v4475_v19 = vadd.f32 %v7567_v57, %v4325_v8  ;;  %v4726_v6 = vadd.f32 %v4598_v48, %v4470_v49  ;;  %v4728_v20 = vadd.f32 %v4600_v41, %v4472_v37  ;;  %v4474_v53 = vadd.f32 %v7569_v58, %v4324_v21  ;;  %v4609_v48 = vld [vmem:[%s6734_s24 + $0x3e0] sm:$0xff]  ;;  %v4611_v41 = vld [vmem:[%s6734_s24 + $0x3f0] sm:$0xff]  ;;  %v4610_v49 = vld [vmem:[%s6734_s24 + $0x3e8] sm:$0xff] }
 0x4e1   : > { %v4476_v46 = vadd.f32 %v7571_v1, %v4326_v50  ;;  %v4853_v38 = vmax.f32 %v4725_v25, 0.0  ;;  %v4855_v36 = vmax.f32 %v4727_v35, 0.0  ;;  %v4729_v47 = vadd.f32 %v4601_v44, %v4473_v24  ;;  %v4612_v37 = vld [vmem:[%s6734_s24 + $0x3f8] sm:$0xff] }
 0x4e2   : > { %v4731_v23 = vadd.f32 %v4603_v4, %v4475_v19  ;;  %v4854_v59 = vmax.f32 %v4726_v6, 0.0  ;;  %v4856_v32 = vmax.f32 %v4728_v20, 0.0  ;;  %v4730_v33 = vadd.f32 %v4602_v28, %v4474_v53 }
 0x4e3   : > { %v4732_v42 = vadd.f32 %v4604_v9, %v4476_v46  ;;  %4981 = vst [vmem:[%s7599_s21 + $0x380] sm:$0xff] %v4853_v38  ;;  %4983 = vst [vmem:[%s7599_s21 + $0x390] sm:$0xff] %v4855_v36  ;;  %v4857_v2 = vmax.f32 %v4729_v47, 0.0  ;;  %v4327_v27 = vmul.f32 %v7557_v10, %v3983_v15  ;;  %v4329_v62 = vmul.f32 %v7559_v14, %v4176_v55 }
 0x4e4   : > { %v4859_v29 = vmax.f32 %v4731_v23, 0.0  ;;  %4982 = vst [vmem:[%s7599_s21 + $0x388] sm:$0xff] %v4854_v59  ;;  %4984 = vst [vmem:[%s7599_s21 + $0x398] sm:$0xff] %v4856_v32  ;;  %v4858_v40 = vmax.f32 %v4730_v33, 0.0  ;;  %v4328_v51 = vmul.f32 %v7561_v22, %v3985_v60  ;;  %v4330_v30 = vmul.f32 %v7563_v45, %v4178_v0 }
 0x4e5   : > { %v4860_v11 = vmax.f32 %v4732_v42, 0.0  ;;  %4985 = vst [vmem:[%s7599_s21 + $0x3a0] sm:$0xff] %v4857_v2  ;;  %v4477_v54 = vadd.f32 %v7565_v3, %v4327_v27  ;;  %v4479_v43 = vadd.f32 %v7567_v57, %v4329_v62  ;;  %v4331_v39 = vmul.f32 %v7557_v10, %v3987_v18 }
 0x4e6   : > { %4987 = vst [vmem:[%s7599_s21 + $0x3b0] sm:$0xff] %v4859_v29  ;;  %v4333_v7 = vmul.f32 %v7559_v14, %v4180_v12  ;;  %4986 = vst [vmem:[%s7599_s21 + $0x3a8] sm:$0xff] %v4858_v40  ;;  %v4478_v16 = vadd.f32 %v7569_v58, %v4328_v51  ;;  %v4480_v5 = vadd.f32 %v7571_v1, %v4330_v30 }
 0x4e7   : > { %4988 = vst [vmem:[%s7599_s21 + $0x3b8] sm:$0xff] %v4860_v11  ;;  %v4332_v13 = vmul.f32 %v7561_v22, %v3989_v26  ;;  %v4334_v10 = vmul.f32 %v7563_v45, %v4182_v34  ;;  %v4733_v8 = vadd.f32 %v4605_v17, %v4477_v54  ;;  %v4735_v63 = vadd.f32 %v4607_v56, %v4479_v43 }
 0x4e8   : > { %v4481_v14 = vadd.f32 %v7565_v3, %v4331_v39  ;;  %v4483_v52 = vadd.f32 %v7567_v57, %v4333_v7  ;;  %v4734_v44 = vadd.f32 %v4606_v61, %v4478_v16  ;;  %v4736_v4 = vadd.f32 %v4608_v31, %v4480_v5 }
 0x4e9   : > { %v4482_v21 = vadd.f32 %v7569_v58, %v4332_v13  ;;  %v4484_v50 = vadd.f32 %v7571_v1, %v4334_v10  ;;  %v4861_v22 = vmax.f32 %v4733_v8, 0.0  ;;  %v4863_v45 = vmax.f32 %v4735_v63, 0.0 }
 0x4ea   : > { %v4737_v25 = vadd.f32 %v4609_v48, %v4481_v14  ;;  %v4739_v3 = vadd.f32 %v4611_v41, %v4483_v52  ;;  %v4862_v57 = vmax.f32 %v4734_v44, 0.0  ;;  %v4864_v35 = vmax.f32 %v4736_v4, 0.0 }
 0x4eb   : > { %v4738_v24 = vadd.f32 %v4610_v49, %v4482_v21  ;;  %v4740_v19 = vadd.f32 %v4612_v37, %v4484_v50  ;;  %4989 = vst [vmem:[%s7599_s21 + $0x3c0] sm:$0xff] %v4861_v22  ;;  %4991 = vst [vmem:[%s7599_s21 + $0x3d0] sm:$0xff] %v4863_v45 }
 0x4ec   : > { %v4865_v58 = vmax.f32 %v4737_v25, 0.0  ;;  %v4867_v1 = vmax.f32 %v4739_v3, 0.0  ;;  %4990 = vst [vmem:[%s7599_s21 + $0x3c8] sm:$0xff] %v4862_v57  ;;  %4992 = vst [vmem:[%s7599_s21 + $0x3d8] sm:$0xff] %v4864_v35 }
 0x4ed   : > { %v4866_v28 = vmax.f32 %v4738_v24, 0.0  ;;  %v4868_v9 = vmax.f32 %v4740_v19, 0.0 }
 0x4ee   : > { %4993 = vst [vmem:[%s7599_s21 + $0x3e0] sm:$0xff] %v4865_v58  ;;  %4995 = vst [vmem:[%s7599_s21 + $0x3f0] sm:$0xff] %v4867_v1 }
 0x4ef   : > { %4994 = vst [vmem:[%s7599_s21 + $0x3e8] sm:$0xff] %v4866_v28  ;;  %4996 = vst [vmem:[%s7599_s21 + $0x3f8] sm:$0xff] %v4868_v9 }
 0x4f0   : > { %6402 = shalt.err (!%p6399_p4)
}
 0x4f1   : > { %s6403_s13 = scalar_lea.hbm %s8088_s22, 16384  ;;  %s6407_s21 = scalar_lea.hbm %s8176_s26, 32768 }
 0x4f2   : > { %p6404_p9 = scmp.ne.s32.totalorder %s8088_s22, %s6403_s13  ;;  %p6408_p8 = scmp.lt.u32.totalorder %s8088_s22, %s8176_s26 }
 0x4f3   : > { %p6409_p13 = scmp.lt.u32.totalorder %s6407_s21, %s6403_s13  ;;  %p6411_p10 = scmp.lt.u32.totalorder %s6403_s13, %s8088_s22 }
 0x4f4   : > { %p6405_p0 = pnand %p6404_p9, %p6680_p5 }
 0x4f5   : > { %p6410_p6 = por %p6409_p13, %p6408_p8 }
 0x4f6   : > { %p6406_p11 = pneg %p6405_p0 }
 0x4f7   : > { %p6412_p3 = por %p6411_p10, %p6410_p6 }
 0x4f9   : > { %p6413_p7 = pnand %p6412_p3, %p6406_p11 }
 0x4fb   : > { %6416 = shalt.err (!%p6413_p7)
}
 0x4fc   : > { %s6478_s24 = smov 512   ;;  %s6479_s27 = smov 32  }
 0x4fd   : > { %6049 = dma.vmem_to_hbm [thread:$0]  (%p6680_p5), %s8090_s29, 16384, %s8088_s22, %s4998_s30, %s6478_s24, %s6478_s24, %s6479_s27  }
 0x4fe PF: > { %s8177_s23 = sld [smem:[#allocation17_spill]]  ;;  %s8178_s10 = sld [smem:[#allocation18_spill]] }
 0x4ff   : > { %p8180_p2 = scmp.ge.s32.totalorder %s6463_s16, 2 }
 0x504   : > { %s5026_s11 = sand.u32 1, %s8177_s23   ;;  %p8179_p12 = scmp.ne.s32.totalorder %s8178_s10, 0 }
 0x505   : > { %s5027_s13 = scalar_lea.sflag [#allocation6], %s5026_s11 }
 0x506   : > { %p6066_p1 = pnand %p8180_p2, %p8179_p12 }
 0x508   : > { %6446 = dma.done.wait (!%p6066_p1), %s5027_s13, 16384  }
 0x509   : > { %6448 = vsyncadd (!%p6066_p1), %s5027_s13, 4294950912  ;;  %p25_p4 = scmp.ge.s32.totalorder %s6666_s9, 4   ;;  %s8181_s13 = smov %s6455_s14 }
 0x50a   : > { %s8182_s14 = smov %s6459_s15  ;;  %s8183_s15 = smov %s6676_s20 }
 0x50b   : > { %s8184_s16 = smov %s6666_s9  ;;  %27 = sbr.rel (!%p25_p4) target bundleno = 10 (0xa), region = 120 }
 0x512   :  { %5032 = vsyncpa [#allocation5], 1 }
 0x513   :  { %5034 = vsyncpa [#allocation5 + $0x1], 1 }
 0x514   :  { %5035 = vsyncpa [#allocation8], 1 }
 0x515   :  { %5036 = vsyncpa [#allocation11], 1 }
 0x516   :  { %5037 = vsyncpa [#allocation6], 1 }
 0x517   :  { %5039 = vsyncpa [#allocation6 + $0x1], 1 }

</bundles_post_ra>
